<compile_context>
chip_gen: v7x
topology: tpu7x:2x2x1
jax: 0.10.0
libtpu: 0.0.40
codegen_flags: <defaults>
</compile_context>

<pallas_src>
import functools
import math

import jax
import jax.numpy as jnp
from jax.experimental import pallas as pl
from jax.experimental.pallas import tpu as pltpu


def _layernorm(x, w, b, eps=1e-5):
    mu = jnp.mean(x, axis=-1, keepdims=True)
    var = jnp.mean(jnp.square(x - mu), axis=-1, keepdims=True)
    return (x - mu) * jax.lax.rsqrt(var + eps) * w + b


def time_encoder_kernel(x_ref,
                        wqkv_ref, bqkv_ref, wo_ref, bo_ref,
                        w1_ref, b1_ref, w2_ref, b2_ref,
                        ln1w_ref, ln1b_ref, ln2w_ref, ln2b_ref,
                        o_ref, *, n_heads, n_layers, d_model):
    S = x_ref.shape[0]
    D = d_model
    R = x_ref.shape[1] // D            # rows (batch*channels) in this block
    H = n_heads
    dh = D // H
    RS = R * S

    # ---- unpack lane-dense slab (S, R*D) -> (R*S, D), rows ordered r*S+s ----
    x_dense = x_ref[...].astype(jnp.float32)
    x = jnp.concatenate(
        [x_dense[:, r * D:(r + 1) * D] for r in range(R)], axis=0)

    for l in range(n_layers):          # static unroll over layers (tiny model)
        wqkv = wqkv_ref[l]             # (D, 3D), q-scale pre-folded
        bqkv = bqkv_ref[l]             # (1, 3D)
        wo = wo_ref[l]                 # (D, D)
        bo = bo_ref[l]                 # (1, D)

        # ---- self attention: single fused QKV matmul over all rows --------
        qkv = jnp.dot(x, wqkv, preferred_element_type=jnp.float32) + bqkv  # (RS, 3D)

        # Heads must move from the lane dim to the batch dim exactly once;
        # static dh-wide slices + axis-0 concat keeps the lowering to ops that
        # are known-good in Mosaic (no rank-4 transpose). Batch index = h*R+r.
        def heads_to_batch(g, qkv=qkv):
            return jnp.concatenate(
                [qkv[:, g * D + h * dh: g * D + (h + 1) * dh].reshape(R, S, dh)
                 for h in range(H)], axis=0)                      # (H*R, S, dh)

        qh = heads_to_batch(0)
        kh = heads_to_batch(1)
        vh = heads_to_batch(2)

        # Two batched einsums over ALL heads at once.
        s = jnp.einsum('bqd,bkd->bqk', qh, kh,
                       preferred_element_type=jnp.float32)        # (H*R, S, S)
        s = s - jnp.max(s, axis=-1, keepdims=True)
        p = jnp.exp(s)
        p = p * pl.reciprocal(jnp.sum(p, axis=-1, keepdims=True), approx=True)
        ctx = jnp.einsum('bqk,bkd->bqd', p, vh,
                         preferred_element_type=jnp.float32)      # (H*R, S, dh)

        # Re-assemble (R*S, D) (columns = h*dh + d) and do ONE K=D out-proj.
        ctx = jnp.concatenate(
            [ctx[h * R:(h + 1) * R] for h in range(H)], axis=-1).reshape(RS, D)
        attn = jnp.dot(ctx, wo, preferred_element_type=jnp.float32) + bo

        # residual + LayerNorm1 (post-norm)
        x = _layernorm(x + attn, ln1w_ref[l], ln1b_ref[l])

        # ---- feed-forward --------------------------------------------------
        h1 = jnp.maximum(
            jnp.dot(x, w1_ref[l], preferred_element_type=jnp.float32) + b1_ref[l],
            0.0)
        ff = jnp.dot(h1, w2_ref[l], preferred_element_type=jnp.float32) + b2_ref[l]

        # residual + LayerNorm2
        x = _layernorm(x + ff, ln2w_ref[l], ln2b_ref[l])

    # ---- pack back to the lane-dense slab (S, R*D) --------------------------
    o_ref[...] = jnp.concatenate(
        [x[r * S:(r + 1) * S, :] for r in range(R)], axis=-1).astype(o_ref.dtype)


def _prepare_layer(params, n_heads):
    """PyTorch (out,in) weights -> (in,out) layout with 1/sqrt(dh) folded into q."""
    (wqkv, bqkv, wo, bo, w1, b1, w2, b2, ln1w, ln1b, ln2w, ln2b) = params
    d_model = wo.shape[0]
    scale = 1.0 / math.sqrt(d_model // n_heads)
    wqkv = wqkv.at[:d_model, :].multiply(scale)       # scale q rows
    bqkv = bqkv.at[:, :d_model].multiply(scale)
    return (wqkv.T, bqkv, wo.T, bo, w1.T, b1, w2.T, b2, ln1w, ln1b, ln2w, ln2b)


def _num_tensorcores():
    """Best-effort TensorCores-per-chip (2 on v7x, 1 on v5e/v6e); safe fallback 1."""
    try:
        info = pltpu.get_tpu_info()
        for attr in ("num_cores", "core_count", "num_tensorcores",
                     "tensor_cores_per_chip"):
            v = getattr(info, attr, None)
            if isinstance(v, int) and v > 0:
                return v
    except Exception:
        pass
    return 1


def time_encoder_forward(emb, layer_params_list, n_heads):
    """emb: (B, C, S, D) -> (B, C, S, D). Whole TimeEncoder in ONE pallas_call."""
    B, C, S, D = emb.shape
    rows = B * C
    n_layers = len(layer_params_list)

    prepared = [_prepare_layer(p, n_heads) for p in layer_params_list]
    stacked = [jnp.stack(ws, axis=0) for ws in zip(*prepared)]   # leading layer dim

    # Lane-dense I/O slab: (S, rows*D); last dim = 256 here (full lane tiles).
    # Wrapper-side transpose/reshape is pure layout plumbing outside the kernel.
    x = emb.reshape(rows, S, D).transpose(1, 0, 2).reshape(S, rows * D)

    # Row-block split only when >= 2 TensorCores exist (v7x megacore); on
    # v5e/v6e a 2-step grid is purely sequential overhead and halves matmul M.
    n_row_blocks = 1
    if (_num_tensorcores() >= 2 and rows % 2 == 0
            and ((rows // 2) * D) % 128 == 0):
        n_row_blocks = 2
    rb = rows // n_row_blocks

    # Weight blocks are constant across grid steps, so Pallas skips the re-DMA
    # after step 0.
    weight_specs = [pl.BlockSpec(w.shape, lambda r: (0, 0, 0)) for w in stacked]

    out = pl.pallas_call(
        functools.partial(time_encoder_kernel, n_heads=n_heads,
                          n_layers=n_layers, d_model=D),
        out_shape=jax.ShapeDtypeStruct((S, rows * D), emb.dtype),
        grid_spec=pl.GridSpec(
            grid=(n_row_blocks,),
            in_specs=[pl.BlockSpec((S, rb * D), lambda r: (0, r))] + weight_specs,
            out_specs=pl.BlockSpec((S, rb * D), lambda r: (0, r)),
        ),
        compiler_params=pltpu.CompilerParams(
            dimension_semantics=("parallel",)),
    )(x, *stacked)

    return out.reshape(S, rows, D).transpose(1, 0, 2).reshape(B, C, S, D)


# ---------------------------------------------------------------------------
# Parameter init (PyTorch layout) + pure-JAX reference for verification.
# ---------------------------------------------------------------------------
def _trunc_normal(key, shape, std=0.02):
    return std * jax.random.truncated_normal(key, -2.0, 2.0, shape, jnp.float32)


def init_layer_params(key, d_model, d_ff):
    ks = jax.random.split(key, 4)
    wqkv = _trunc_normal(ks[0], (3 * d_model, d_model))
    bqkv = jnp.zeros((1, 3 * d_model), jnp.float32)
    wo = _trunc_normal(ks[1], (d_model, d_model))
    bo = jnp.zeros((1, d_model), jnp.float32)
    w1 = _trunc_normal(ks[2], (d_ff, d_model))
    b1 = jnp.zeros((1, d_ff), jnp.float32)
    w2 = _trunc_normal(ks[3], (d_model, d_ff))
    b2 = jnp.zeros((1, d_model), jnp.float32)
    ln1w = jnp.ones((1, d_model), jnp.float32)
    ln1b = jnp.zeros((1, d_model), jnp.float32)
    ln2w = jnp.ones((1, d_model), jnp.float32)
    ln2b = jnp.zeros((1, d_model), jnp.float32)
    return (wqkv, bqkv, wo, bo, w1, b1, w2, b2, ln1w, ln1b, ln2w, ln2b)


def reference_forward(emb, layer_params_list, n_heads):
    """Pure-JAX reference of nn.TransformerEncoder (eval mode, post-norm)."""
    B, C, S, D = emb.shape
    dh = D // n_heads
    x = emb.reshape(B * C, S, D).astype(jnp.float32)

    def ln(x, w, b, eps=1e-5):
        mu = jnp.mean(x, axis=-1, keepdims=True)
        var = jnp.mean(jnp.square(x - mu), axis=-1, keepdims=True)
        return (x - mu) / jnp.sqrt(var + eps) * w + b

    for (wqkv, bqkv, wo, bo, w1, b1, w2, b2, l1w, l1b, l2w, l2b) in layer_params_list:
        qkv = jnp.einsum('bsd,ed->bse', x, wqkv) + bqkv[0]
        q, k, v = qkv[..., :D], qkv[..., D:2 * D], qkv[..., 2 * D:]
        q = q.reshape(-1, S, n_heads, dh).transpose(0, 2, 1, 3)
        k = k.reshape(-1, S, n_heads, dh).transpose(0, 2, 1, 3)
        v = v.reshape(-1, S, n_heads, dh).transpose(0, 2, 1, 3)
        s = jnp.einsum('bhqd,bhkd->bhqk', q, k) / math.sqrt(dh)
        p = jax.nn.softmax(s, axis=-1)
        ctx = jnp.einsum('bhqk,bhkd->bhqd', p, v).transpose(0, 2, 1, 3).reshape(-1, S, D)
        attn = jnp.einsum('bsd,ed->bse', ctx, wo) + bo[0]
        x = ln(x + attn, l1w[0], l1b[0])
        h1 = jax.nn.relu(jnp.einsum('bsd,fd->bsf', x, w1) + b1[0])
        ff = jnp.einsum('bsf,df->bsd', h1, w2) + b2[0]
        x = ln(x + ff, l2w[0], l2b[0])
    return x.reshape(B, C, S, D)


if __name__ == "__main__":
    # Brant-style params: d_model=32, n_heads=4, d_ff=64, n_blocks=2
    B, C, S, D = 2, 4, 8, 32
    n_heads, d_ff, n_blocks = 4, 64, 2

    key = jax.random.PRNGKey(0)
    k_emb, *k_layers = jax.random.split(key, n_blocks + 1)

    emb = jax.random.normal(k_emb, (B, C, S, D), jnp.float32)
    layer_params_list = [init_layer_params(k, D, d_ff) for k in k_layers]

    out = time_encoder_forward(emb, layer_params_list, n_heads)
    out = jax.block_until_ready(out)
    assert out.shape == (B, C, S, D)

    ref = jax.block_until_ready(reference_forward(emb, layer_params_list, n_heads))
    max_err = float(jnp.max(jnp.abs(out - ref)))
    assert max_err < 1e-2, f"max abs error {max_err}"

    print("KERNEL_OK")
</pallas_src>

<mosaic_0001>
module attributes {stable_mosaic.version = 11 : i64} {
  func.func @time_encoder_kernel(%arg0: i32, %arg1: memref<8x256xf32, #tpu.memory_space<vmem>>, %arg2: memref<2x32x96xf32, #tpu.memory_space<vmem>>, %arg3: memref<2x1x96xf32, #tpu.memory_space<vmem>>, %arg4: memref<2x32x32xf32, #tpu.memory_space<vmem>>, %arg5: memref<2x1x32xf32, #tpu.memory_space<vmem>>, %arg6: memref<2x32x64xf32, #tpu.memory_space<vmem>>, %arg7: memref<2x1x64xf32, #tpu.memory_space<vmem>>, %arg8: memref<2x64x32xf32, #tpu.memory_space<vmem>>, %arg9: memref<2x1x32xf32, #tpu.memory_space<vmem>>, %arg10: memref<2x1x32xf32, #tpu.memory_space<vmem>>, %arg11: memref<2x1x32xf32, #tpu.memory_space<vmem>>, %arg12: memref<2x1x32xf32, #tpu.memory_space<vmem>>, %arg13: memref<2x1x32xf32, #tpu.memory_space<vmem>>, %arg14: memref<8x256xf32, #tpu.memory_space<vmem>>) attributes {dimension_semantics = [#tpu.dimension_semantics<parallel>], iteration_bounds = array<i64: 1>, scalar_prefetch = 0 : i64, scratch_operands = 0 : i64, tpu.core_type = #tpu.core_type<tc>, window_params = [{transform_indices = @transform_0, window_bounds = array<i64: 8, 256>}, {pipeline_mode = #tpu.pipeline_mode<synchronous>, transform_indices = @transform_1, window_bounds = array<i64: 2, 32, 96>}, {pipeline_mode = #tpu.pipeline_mode<synchronous>, transform_indices = @transform_2, window_bounds = array<i64: 2, 1, 96>}, {pipeline_mode = #tpu.pipeline_mode<synchronous>, transform_indices = @transform_3, window_bounds = array<i64: 2, 32, 32>}, {pipeline_mode = #tpu.pipeline_mode<synchronous>, transform_indices = @transform_4, window_bounds = array<i64: 2, 1, 32>}, {pipeline_mode = #tpu.pipeline_mode<synchronous>, transform_indices = @transform_5, window_bounds = array<i64: 2, 32, 64>}, {pipeline_mode = #tpu.pipeline_mode<synchronous>, transform_indices = @transform_6, window_bounds = array<i64: 2, 1, 64>}, {pipeline_mode = #tpu.pipeline_mode<synchronous>, transform_indices = @transform_7, window_bounds = array<i64: 2, 64, 32>}, {pipeline_mode = #tpu.pipeline_mode<synchronous>, transform_indices = @transform_8, window_bounds = array<i64: 2, 1, 32>}, {pipeline_mode = #tpu.pipeline_mode<synchronous>, transform_indices = @transform_9, window_bounds = array<i64: 2, 1, 32>}, {pipeline_mode = #tpu.pipeline_mode<synchronous>, transform_indices = @transform_10, window_bounds = array<i64: 2, 1, 32>}, {pipeline_mode = #tpu.pipeline_mode<synchronous>, transform_indices = @transform_11, window_bounds = array<i64: 2, 1, 32>}, {pipeline_mode = #tpu.pipeline_mode<synchronous>, transform_indices = @transform_12, window_bounds = array<i64: 2, 1, 32>}, {transform_indices = @transform_13, window_bounds = array<i64: 8, 256>}]} {
    %c0 = arith.constant 0 : index
    %c0_0 = arith.constant 0 : index
    %0 = vector.load %arg1[%c0, %c0_0] : memref<8x256xf32, #tpu.memory_space<vmem>>, vector<8x256xf32>
    %1 = vector.extract_strided_slice %0 {offsets = [0, 0], sizes = [8, 32], strides = [1, 1]} : vector<8x256xf32> to vector<8x32xf32>
    %2 = vector.extract_strided_slice %0 {offsets = [0, 32], sizes = [8, 32], strides = [1, 1]} : vector<8x256xf32> to vector<8x32xf32>
    %3 = vector.extract_strided_slice %0 {offsets = [0, 64], sizes = [8, 32], strides = [1, 1]} : vector<8x256xf32> to vector<8x32xf32>
    %4 = vector.extract_strided_slice %0 {offsets = [0, 96], sizes = [8, 32], strides = [1, 1]} : vector<8x256xf32> to vector<8x32xf32>
    %5 = vector.extract_strided_slice %0 {offsets = [0, 128], sizes = [8, 32], strides = [1, 1]} : vector<8x256xf32> to vector<8x32xf32>
    %6 = vector.extract_strided_slice %0 {offsets = [0, 160], sizes = [8, 32], strides = [1, 1]} : vector<8x256xf32> to vector<8x32xf32>
    %7 = vector.extract_strided_slice %0 {offsets = [0, 192], sizes = [8, 32], strides = [1, 1]} : vector<8x256xf32> to vector<8x32xf32>
    %8 = vector.extract_strided_slice %0 {offsets = [0, 224], sizes = [8, 32], strides = [1, 1]} : vector<8x256xf32> to vector<8x32xf32>
    %9 = tpu.concatenate %1, %2, %3, %4, %5, %6, %7, %8 in 0 : vector<8x32xf32>, vector<8x32xf32>, vector<8x32xf32>, vector<8x32xf32>, vector<8x32xf32>, vector<8x32xf32>, vector<8x32xf32>, vector<8x32xf32> -> vector<64x32xf32>
    %c0_1 = arith.constant 0 : index
    %c0_2 = arith.constant 0 : index
    %c0_3 = arith.constant 0 : index
    %10 = vector.load %arg2[%c0_1, %c0_2, %c0_3] : memref<2x32x96xf32, #tpu.memory_space<vmem>>, vector<1x32x96xf32>
    %11 = vector.shape_cast %10 : vector<1x32x96xf32> to vector<32x96xf32>
    %c0_4 = arith.constant 0 : index
    %c0_5 = arith.constant 0 : index
    %c0_6 = arith.constant 0 : index
    %12 = vector.load %arg3[%c0_4, %c0_5, %c0_6] : memref<2x1x96xf32, #tpu.memory_space<vmem>>, vector<1x1x96xf32>
    %13 = vector.shape_cast %12 : vector<1x1x96xf32> to vector<1x96xf32>
    %c0_7 = arith.constant 0 : index
    %c0_8 = arith.constant 0 : index
    %c0_9 = arith.constant 0 : index
    %14 = vector.load %arg4[%c0_7, %c0_8, %c0_9] : memref<2x32x32xf32, #tpu.memory_space<vmem>>, vector<1x32x32xf32>
    %15 = vector.shape_cast %14 : vector<1x32x32xf32> to vector<32x32xf32>
    %c0_10 = arith.constant 0 : index
    %c0_11 = arith.constant 0 : index
    %c0_12 = arith.constant 0 : index
    %16 = vector.load %arg5[%c0_10, %c0_11, %c0_12] : memref<2x1x32xf32, #tpu.memory_space<vmem>>, vector<1x1x32xf32>
    %17 = vector.shape_cast %16 : vector<1x1x32xf32> to vector<1x32xf32>
    %cst = arith.constant dense<0.000000e+00> : vector<64x96xf32>
    %18 = tpu.matmul %9, %11, %cst {dimension_numbers = #tpu.dot_dimension_numbers<[1], [0], [0], [1], [0, 0, 1, 1], [], []>} : vector<64x32xf32>, vector<32x96xf32>, vector<64x96xf32> -> vector<64x96xf32>
    %19 = vector.broadcast %13 : vector<1x96xf32> to vector<64x96xf32>
    %20 = arith.addf %18, %19 : vector<64x96xf32>
    %21 = vector.extract_strided_slice %20 {offsets = [0, 0], sizes = [64, 8], strides = [1, 1]} : vector<64x96xf32> to vector<64x8xf32>
    %22 = vector.shape_cast %21 : vector<64x8xf32> to vector<8x8x8xf32>
    %23 = vector.extract_strided_slice %20 {offsets = [0, 8], sizes = [64, 8], strides = [1, 1]} : vector<64x96xf32> to vector<64x8xf32>
    %24 = vector.shape_cast %23 : vector<64x8xf32> to vector<8x8x8xf32>
    %25 = vector.extract_strided_slice %20 {offsets = [0, 16], sizes = [64, 8], strides = [1, 1]} : vector<64x96xf32> to vector<64x8xf32>
    %26 = vector.shape_cast %25 : vector<64x8xf32> to vector<8x8x8xf32>
    %27 = vector.extract_strided_slice %20 {offsets = [0, 24], sizes = [64, 8], strides = [1, 1]} : vector<64x96xf32> to vector<64x8xf32>
    %28 = vector.shape_cast %27 : vector<64x8xf32> to vector<8x8x8xf32>
    %29 = tpu.concatenate %22, %24, %26, %28 in 0 : vector<8x8x8xf32>, vector<8x8x8xf32>, vector<8x8x8xf32>, vector<8x8x8xf32> -> vector<32x8x8xf32>
    %30 = vector.extract_strided_slice %20 {offsets = [0, 32], sizes = [64, 8], strides = [1, 1]} : vector<64x96xf32> to vector<64x8xf32>
    %31 = vector.shape_cast %30 : vector<64x8xf32> to vector<8x8x8xf32>
    %32 = vector.extract_strided_slice %20 {offsets = [0, 40], sizes = [64, 8], strides = [1, 1]} : vector<64x96xf32> to vector<64x8xf32>
    %33 = vector.shape_cast %32 : vector<64x8xf32> to vector<8x8x8xf32>
    %34 = vector.extract_strided_slice %20 {offsets = [0, 48], sizes = [64, 8], strides = [1, 1]} : vector<64x96xf32> to vector<64x8xf32>
    %35 = vector.shape_cast %34 : vector<64x8xf32> to vector<8x8x8xf32>
    %36 = vector.extract_strided_slice %20 {offsets = [0, 56], sizes = [64, 8], strides = [1, 1]} : vector<64x96xf32> to vector<64x8xf32>
    %37 = vector.shape_cast %36 : vector<64x8xf32> to vector<8x8x8xf32>
    %38 = tpu.concatenate %31, %33, %35, %37 in 0 : vector<8x8x8xf32>, vector<8x8x8xf32>, vector<8x8x8xf32>, vector<8x8x8xf32> -> vector<32x8x8xf32>
    %39 = vector.extract_strided_slice %20 {offsets = [0, 64], sizes = [64, 8], strides = [1, 1]} : vector<64x96xf32> to vector<64x8xf32>
    %40 = vector.shape_cast %39 : vector<64x8xf32> to vector<8x8x8xf32>
    %41 = vector.extract_strided_slice %20 {offsets = [0, 72], sizes = [64, 8], strides = [1, 1]} : vector<64x96xf32> to vector<64x8xf32>
    %42 = vector.shape_cast %41 : vector<64x8xf32> to vector<8x8x8xf32>
    %43 = vector.extract_strided_slice %20 {offsets = [0, 80], sizes = [64, 8], strides = [1, 1]} : vector<64x96xf32> to vector<64x8xf32>
    %44 = vector.shape_cast %43 : vector<64x8xf32> to vector<8x8x8xf32>
    %45 = vector.extract_strided_slice %20 {offsets = [0, 88], sizes = [64, 8], strides = [1, 1]} : vector<64x96xf32> to vector<64x8xf32>
    %46 = vector.shape_cast %45 : vector<64x8xf32> to vector<8x8x8xf32>
    %47 = tpu.concatenate %40, %42, %44, %46 in 0 : vector<8x8x8xf32>, vector<8x8x8xf32>, vector<8x8x8xf32>, vector<8x8x8xf32> -> vector<32x8x8xf32>
    "tpu.trace_start"() <{level = 10 : i32, message = "bqd,bkd->bqk"}> : () -> ()
    %cst_13 = arith.constant dense<0.000000e+00> : vector<32x8x8xf32>
    %48 = tpu.matmul %29, %38, %cst_13 {dimension_numbers = #tpu.dot_dimension_numbers<[2], [2], [1], [1], [0, 0, 0, 1, 1, 1], [0], [0]>} : vector<32x8x8xf32>, vector<32x8x8xf32>, vector<32x8x8xf32> -> vector<32x8x8xf32>
    "tpu.trace_stop"() : () -> ()
    %cst_14 = arith.constant dense<0xFF800000> : vector<32x8xf32>
    %49 = vector.multi_reduction <maximumf>, %48, %cst_14 [2] : vector<32x8x8xf32> to vector<32x8xf32>
    %50 = vector.shape_cast %49 : vector<32x8xf32> to vector<32x8x1xf32>
    %51 = vector.broadcast %50 : vector<32x8x1xf32> to vector<32x8x8xf32>
    %52 = arith.subf %48, %51 : vector<32x8x8xf32>
    %53 = math.exp %52 : vector<32x8x8xf32>
    %cst_15 = arith.constant dense<0.000000e+00> : vector<32x8xf32>
    %54 = vector.multi_reduction <add>, %53, %cst_15 [2] : vector<32x8x8xf32> to vector<32x8xf32>
    %55 = vector.shape_cast %54 : vector<32x8xf32> to vector<32x8x1xf32>
    %56 = tpu.reciprocal %55 {approx = true} : vector<32x8x1xf32> -> vector<32x8x1xf32>
    %57 = vector.broadcast %56 : vector<32x8x1xf32> to vector<32x8x8xf32>
    %58 = arith.mulf %53, %57 : vector<32x8x8xf32>
    "tpu.trace_start"() <{level = 10 : i32, message = "bqk,bkd->bqd"}> : () -> ()
    %cst_16 = arith.constant dense<0.000000e+00> : vector<32x8x8xf32>
    %59 = tpu.matmul %58, %47, %cst_16 {dimension_numbers = #tpu.dot_dimension_numbers<[2], [1], [1], [2], [0, 0, 0, 1, 1, 2], [0], [0]>} : vector<32x8x8xf32>, vector<32x8x8xf32>, vector<32x8x8xf32> -> vector<32x8x8xf32>
    "tpu.trace_stop"() : () -> ()
    %60 = vector.extract_strided_slice %59 {offsets = [0, 0, 0], sizes = [8, 8, 8], strides = [1, 1, 1]} : vector<32x8x8xf32> to vector<8x8x8xf32>
    %61 = vector.extract_strided_slice %59 {offsets = [8, 0, 0], sizes = [8, 8, 8], strides = [1, 1, 1]} : vector<32x8x8xf32> to vector<8x8x8xf32>
    %62 = vector.extract_strided_slice %59 {offsets = [16, 0, 0], sizes = [8, 8, 8], strides = [1, 1, 1]} : vector<32x8x8xf32> to vector<8x8x8xf32>
    %63 = vector.extract_strided_slice %59 {offsets = [24, 0, 0], sizes = [8, 8, 8], strides = [1, 1, 1]} : vector<32x8x8xf32> to vector<8x8x8xf32>
    %64 = tpu.concatenate %60, %61, %62, %63 in 2 : vector<8x8x8xf32>, vector<8x8x8xf32>, vector<8x8x8xf32>, vector<8x8x8xf32> -> vector<8x8x32xf32>
    %65 = vector.shape_cast %64 : vector<8x8x32xf32> to vector<64x32xf32>
    %cst_17 = arith.constant dense<0.000000e+00> : vector<64x32xf32>
    %66 = tpu.matmul %65, %15, %cst_17 {dimension_numbers = #tpu.dot_dimension_numbers<[1], [0], [0], [1], [0, 0, 1, 1], [], []>} : vector<64x32xf32>, vector<32x32xf32>, vector<64x32xf32> -> vector<64x32xf32>
    %67 = vector.broadcast %17 : vector<1x32xf32> to vector<64x32xf32>
    %68 = arith.addf %66, %67 : vector<64x32xf32>
    %69 = arith.addf %9, %68 : vector<64x32xf32>
    %c0_18 = arith.constant 0 : index
    %c0_19 = arith.constant 0 : index
    %c0_20 = arith.constant 0 : index
    %70 = vector.load %arg10[%c0_18, %c0_19, %c0_20] : memref<2x1x32xf32, #tpu.memory_space<vmem>>, vector<1x1x32xf32>
    %71 = vector.shape_cast %70 : vector<1x1x32xf32> to vector<1x32xf32>
    %c0_21 = arith.constant 0 : index
    %c0_22 = arith.constant 0 : index
    %c0_23 = arith.constant 0 : index
    %72 = vector.load %arg11[%c0_21, %c0_22, %c0_23] : memref<2x1x32xf32, #tpu.memory_space<vmem>>, vector<1x1x32xf32>
    %73 = vector.shape_cast %72 : vector<1x1x32xf32> to vector<1x32xf32>
    %cst_24 = arith.constant dense<0.000000e+00> : vector<64xf32>
    %74 = vector.multi_reduction <add>, %69, %cst_24 [1] : vector<64x32xf32> to vector<64xf32>
    %75 = vector.shape_cast %74 : vector<64xf32> to vector<64x1xf32>
    %cst_25 = arith.constant 3.200000e+01 : f32
    %76 = vector.broadcast %cst_25 : f32 to vector<64x1xf32>
    %77 = arith.divf %75, %76 : vector<64x1xf32>
    %78 = vector.broadcast %77 : vector<64x1xf32> to vector<64x32xf32>
    %79 = arith.subf %69, %78 : vector<64x32xf32>
    %80 = arith.mulf %79, %79 : vector<64x32xf32>
    %cst_26 = arith.constant dense<0.000000e+00> : vector<64xf32>
    %81 = vector.multi_reduction <add>, %80, %cst_26 [1] : vector<64x32xf32> to vector<64xf32>
    %82 = vector.shape_cast %81 : vector<64xf32> to vector<64x1xf32>
    %cst_27 = arith.constant 3.200000e+01 : f32
    %83 = vector.broadcast %cst_27 : f32 to vector<64x1xf32>
    %84 = arith.divf %82, %83 : vector<64x1xf32>
    %85 = vector.broadcast %77 : vector<64x1xf32> to vector<64x32xf32>
    %86 = arith.subf %69, %85 : vector<64x32xf32>
    %cst_28 = arith.constant 9.99999974E-6 : f32
    %87 = vector.broadcast %cst_28 : f32 to vector<64x1xf32>
    %88 = arith.addf %84, %87 : vector<64x1xf32>
    %89 = math.rsqrt %88 : vector<64x1xf32>
    %90 = vector.broadcast %89 : vector<64x1xf32> to vector<64x32xf32>
    %91 = arith.mulf %86, %90 : vector<64x32xf32>
    %92 = vector.broadcast %71 : vector<1x32xf32> to vector<64x32xf32>
    %93 = arith.mulf %91, %92 : vector<64x32xf32>
    %94 = vector.broadcast %73 : vector<1x32xf32> to vector<64x32xf32>
    %95 = arith.addf %93, %94 : vector<64x32xf32>
    %c0_29 = arith.constant 0 : index
    %c0_30 = arith.constant 0 : index
    %c0_31 = arith.constant 0 : index
    %96 = vector.load %arg6[%c0_29, %c0_30, %c0_31] : memref<2x32x64xf32, #tpu.memory_space<vmem>>, vector<1x32x64xf32>
    %97 = vector.shape_cast %96 : vector<1x32x64xf32> to vector<32x64xf32>
    %cst_32 = arith.constant dense<0.000000e+00> : vector<64x64xf32>
    %98 = tpu.matmul %95, %97, %cst_32 {dimension_numbers = #tpu.dot_dimension_numbers<[1], [0], [0], [1], [0, 0, 1, 1], [], []>} : vector<64x32xf32>, vector<32x64xf32>, vector<64x64xf32> -> vector<64x64xf32>
    %c0_33 = arith.constant 0 : index
    %c0_34 = arith.constant 0 : index
    %c0_35 = arith.constant 0 : index
    %99 = vector.load %arg7[%c0_33, %c0_34, %c0_35] : memref<2x1x64xf32, #tpu.memory_space<vmem>>, vector<1x1x64xf32>
    %100 = vector.shape_cast %99 : vector<1x1x64xf32> to vector<1x64xf32>
    %101 = vector.broadcast %100 : vector<1x64xf32> to vector<64x64xf32>
    %102 = arith.addf %98, %101 : vector<64x64xf32>
    %cst_36 = arith.constant 0.000000e+00 : f32
    %103 = vector.broadcast %cst_36 : f32 to vector<64x64xf32>
    %104 = arith.maximumf %102, %103 : vector<64x64xf32>
    %c0_37 = arith.constant 0 : index
    %c0_38 = arith.constant 0 : index
    %c0_39 = arith.constant 0 : index
    %105 = vector.load %arg8[%c0_37, %c0_38, %c0_39] : memref<2x64x32xf32, #tpu.memory_space<vmem>>, vector<1x64x32xf32>
    %106 = vector.shape_cast %105 : vector<1x64x32xf32> to vector<64x32xf32>
    %cst_40 = arith.constant dense<0.000000e+00> : vector<64x32xf32>
    %107 = tpu.matmul %104, %106, %cst_40 {dimension_numbers = #tpu.dot_dimension_numbers<[1], [0], [0], [1], [0, 0, 1, 1], [], []>} : vector<64x64xf32>, vector<64x32xf32>, vector<64x32xf32> -> vector<64x32xf32>
    %c0_41 = arith.constant 0 : index
    %c0_42 = arith.constant 0 : index
    %c0_43 = arith.constant 0 : index
    %108 = vector.load %arg9[%c0_41, %c0_42, %c0_43] : memref<2x1x32xf32, #tpu.memory_space<vmem>>, vector<1x1x32xf32>
    %109 = vector.shape_cast %108 : vector<1x1x32xf32> to vector<1x32xf32>
    %110 = vector.broadcast %109 : vector<1x32xf32> to vector<64x32xf32>
    %111 = arith.addf %107, %110 : vector<64x32xf32>
    %112 = arith.addf %95, %111 : vector<64x32xf32>
    %c0_44 = arith.constant 0 : index
    %c0_45 = arith.constant 0 : index
    %c0_46 = arith.constant 0 : index
    %113 = vector.load %arg12[%c0_44, %c0_45, %c0_46] : memref<2x1x32xf32, #tpu.memory_space<vmem>>, vector<1x1x32xf32>
    %114 = vector.shape_cast %113 : vector<1x1x32xf32> to vector<1x32xf32>
    %c0_47 = arith.constant 0 : index
    %c0_48 = arith.constant 0 : index
    %c0_49 = arith.constant 0 : index
    %115 = vector.load %arg13[%c0_47, %c0_48, %c0_49] : memref<2x1x32xf32, #tpu.memory_space<vmem>>, vector<1x1x32xf32>
    %116 = vector.shape_cast %115 : vector<1x1x32xf32> to vector<1x32xf32>
    %cst_50 = arith.constant dense<0.000000e+00> : vector<64xf32>
    %117 = vector.multi_reduction <add>, %112, %cst_50 [1] : vector<64x32xf32> to vector<64xf32>
    %118 = vector.shape_cast %117 : vector<64xf32> to vector<64x1xf32>
    %cst_51 = arith.constant 3.200000e+01 : f32
    %119 = vector.broadcast %cst_51 : f32 to vector<64x1xf32>
    %120 = arith.divf %118, %119 : vector<64x1xf32>
    %121 = vector.broadcast %120 : vector<64x1xf32> to vector<64x32xf32>
    %122 = arith.subf %112, %121 : vector<64x32xf32>
    %123 = arith.mulf %122, %122 : vector<64x32xf32>
    %cst_52 = arith.constant dense<0.000000e+00> : vector<64xf32>
    %124 = vector.multi_reduction <add>, %123, %cst_52 [1] : vector<64x32xf32> to vector<64xf32>
    %125 = vector.shape_cast %124 : vector<64xf32> to vector<64x1xf32>
    %cst_53 = arith.constant 3.200000e+01 : f32
    %126 = vector.broadcast %cst_53 : f32 to vector<64x1xf32>
    %127 = arith.divf %125, %126 : vector<64x1xf32>
    %128 = vector.broadcast %120 : vector<64x1xf32> to vector<64x32xf32>
    %129 = arith.subf %112, %128 : vector<64x32xf32>
    %cst_54 = arith.constant 9.99999974E-6 : f32
    %130 = vector.broadcast %cst_54 : f32 to vector<64x1xf32>
    %131 = arith.addf %127, %130 : vector<64x1xf32>
    %132 = math.rsqrt %131 : vector<64x1xf32>
    %133 = vector.broadcast %132 : vector<64x1xf32> to vector<64x32xf32>
    %134 = arith.mulf %129, %133 : vector<64x32xf32>
    %135 = vector.broadcast %114 : vector<1x32xf32> to vector<64x32xf32>
    %136 = arith.mulf %134, %135 : vector<64x32xf32>
    %137 = vector.broadcast %116 : vector<1x32xf32> to vector<64x32xf32>
    %138 = arith.addf %136, %137 : vector<64x32xf32>
    %c1 = arith.constant 1 : index
    %c0_55 = arith.constant 0 : index
    %c0_56 = arith.constant 0 : index
    %139 = vector.load %arg2[%c1, %c0_55, %c0_56] : memref<2x32x96xf32, #tpu.memory_space<vmem>>, vector<1x32x96xf32>
    %140 = vector.shape_cast %139 : vector<1x32x96xf32> to vector<32x96xf32>
    %c1_57 = arith.constant 1 : index
    %c0_58 = arith.constant 0 : index
    %c0_59 = arith.constant 0 : index
    %141 = vector.load %arg3[%c1_57, %c0_58, %c0_59] : memref<2x1x96xf32, #tpu.memory_space<vmem>>, vector<1x1x96xf32>
    %142 = vector.shape_cast %141 : vector<1x1x96xf32> to vector<1x96xf32>
    %c1_60 = arith.constant 1 : index
    %c0_61 = arith.constant 0 : index
    %c0_62 = arith.constant 0 : index
    %143 = vector.load %arg4[%c1_60, %c0_61, %c0_62] : memref<2x32x32xf32, #tpu.memory_space<vmem>>, vector<1x32x32xf32>
    %144 = vector.shape_cast %143 : vector<1x32x32xf32> to vector<32x32xf32>
    %c1_63 = arith.constant 1 : index
    %c0_64 = arith.constant 0 : index
    %c0_65 = arith.constant 0 : index
    %145 = vector.load %arg5[%c1_63, %c0_64, %c0_65] : memref<2x1x32xf32, #tpu.memory_space<vmem>>, vector<1x1x32xf32>
    %146 = vector.shape_cast %145 : vector<1x1x32xf32> to vector<1x32xf32>
    %cst_66 = arith.constant dense<0.000000e+00> : vector<64x96xf32>
    %147 = tpu.matmul %138, %140, %cst_66 {dimension_numbers = #tpu.dot_dimension_numbers<[1], [0], [0], [1], [0, 0, 1, 1], [], []>} : vector<64x32xf32>, vector<32x96xf32>, vector<64x96xf32> -> vector<64x96xf32>
    %148 = vector.broadcast %142 : vector<1x96xf32> to vector<64x96xf32>
    %149 = arith.addf %147, %148 : vector<64x96xf32>
    %150 = vector.extract_strided_slice %149 {offsets = [0, 0], sizes = [64, 8], strides = [1, 1]} : vector<64x96xf32> to vector<64x8xf32>
    %151 = vector.shape_cast %150 : vector<64x8xf32> to vector<8x8x8xf32>
    %152 = vector.extract_strided_slice %149 {offsets = [0, 8], sizes = [64, 8], strides = [1, 1]} : vector<64x96xf32> to vector<64x8xf32>
    %153 = vector.shape_cast %152 : vector<64x8xf32> to vector<8x8x8xf32>
    %154 = vector.extract_strided_slice %149 {offsets = [0, 16], sizes = [64, 8], strides = [1, 1]} : vector<64x96xf32> to vector<64x8xf32>
    %155 = vector.shape_cast %154 : vector<64x8xf32> to vector<8x8x8xf32>
    %156 = vector.extract_strided_slice %149 {offsets = [0, 24], sizes = [64, 8], strides = [1, 1]} : vector<64x96xf32> to vector<64x8xf32>
    %157 = vector.shape_cast %156 : vector<64x8xf32> to vector<8x8x8xf32>
    %158 = tpu.concatenate %151, %153, %155, %157 in 0 : vector<8x8x8xf32>, vector<8x8x8xf32>, vector<8x8x8xf32>, vector<8x8x8xf32> -> vector<32x8x8xf32>
    %159 = vector.extract_strided_slice %149 {offsets = [0, 32], sizes = [64, 8], strides = [1, 1]} : vector<64x96xf32> to vector<64x8xf32>
    %160 = vector.shape_cast %159 : vector<64x8xf32> to vector<8x8x8xf32>
    %161 = vector.extract_strided_slice %149 {offsets = [0, 40], sizes = [64, 8], strides = [1, 1]} : vector<64x96xf32> to vector<64x8xf32>
    %162 = vector.shape_cast %161 : vector<64x8xf32> to vector<8x8x8xf32>
    %163 = vector.extract_strided_slice %149 {offsets = [0, 48], sizes = [64, 8], strides = [1, 1]} : vector<64x96xf32> to vector<64x8xf32>
    %164 = vector.shape_cast %163 : vector<64x8xf32> to vector<8x8x8xf32>
    %165 = vector.extract_strided_slice %149 {offsets = [0, 56], sizes = [64, 8], strides = [1, 1]} : vector<64x96xf32> to vector<64x8xf32>
    %166 = vector.shape_cast %165 : vector<64x8xf32> to vector<8x8x8xf32>
    %167 = tpu.concatenate %160, %162, %164, %166 in 0 : vector<8x8x8xf32>, vector<8x8x8xf32>, vector<8x8x8xf32>, vector<8x8x8xf32> -> vector<32x8x8xf32>
    %168 = vector.extract_strided_slice %149 {offsets = [0, 64], sizes = [64, 8], strides = [1, 1]} : vector<64x96xf32> to vector<64x8xf32>
    %169 = vector.shape_cast %168 : vector<64x8xf32> to vector<8x8x8xf32>
    %170 = vector.extract_strided_slice %149 {offsets = [0, 72], sizes = [64, 8], strides = [1, 1]} : vector<64x96xf32> to vector<64x8xf32>
    %171 = vector.shape_cast %170 : vector<64x8xf32> to vector<8x8x8xf32>
    %172 = vector.extract_strided_slice %149 {offsets = [0, 80], sizes = [64, 8], strides = [1, 1]} : vector<64x96xf32> to vector<64x8xf32>
    %173 = vector.shape_cast %172 : vector<64x8xf32> to vector<8x8x8xf32>
    %174 = vector.extract_strided_slice %149 {offsets = [0, 88], sizes = [64, 8], strides = [1, 1]} : vector<64x96xf32> to vector<64x8xf32>
    %175 = vector.shape_cast %174 : vector<64x8xf32> to vector<8x8x8xf32>
    %176 = tpu.concatenate %169, %171, %173, %175 in 0 : vector<8x8x8xf32>, vector<8x8x8xf32>, vector<8x8x8xf32>, vector<8x8x8xf32> -> vector<32x8x8xf32>
    "tpu.trace_start"() <{level = 10 : i32, message = "bqd,bkd->bqk"}> : () -> ()
    %cst_67 = arith.constant dense<0.000000e+00> : vector<32x8x8xf32>
    %177 = tpu.matmul %158, %167, %cst_67 {dimension_numbers = #tpu.dot_dimension_numbers<[2], [2], [1], [1], [0, 0, 0, 1, 1, 1], [0], [0]>} : vector<32x8x8xf32>, vector<32x8x8xf32>, vector<32x8x8xf32> -> vector<32x8x8xf32>
    "tpu.trace_stop"() : () -> ()
    %cst_68 = arith.constant dense<0xFF800000> : vector<32x8xf32>
    %178 = vector.multi_reduction <maximumf>, %177, %cst_68 [2] : vector<32x8x8xf32> to vector<32x8xf32>
    %179 = vector.shape_cast %178 : vector<32x8xf32> to vector<32x8x1xf32>
    %180 = vector.broadcast %179 : vector<32x8x1xf32> to vector<32x8x8xf32>
    %181 = arith.subf %177, %180 : vector<32x8x8xf32>
    %182 = math.exp %181 : vector<32x8x8xf32>
    %cst_69 = arith.constant dense<0.000000e+00> : vector<32x8xf32>
    %183 = vector.multi_reduction <add>, %182, %cst_69 [2] : vector<32x8x8xf32> to vector<32x8xf32>
    %184 = vector.shape_cast %183 : vector<32x8xf32> to vector<32x8x1xf32>
    %185 = tpu.reciprocal %184 {approx = true} : vector<32x8x1xf32> -> vector<32x8x1xf32>
    %186 = vector.broadcast %185 : vector<32x8x1xf32> to vector<32x8x8xf32>
    %187 = arith.mulf %182, %186 : vector<32x8x8xf32>
    "tpu.trace_start"() <{level = 10 : i32, message = "bqk,bkd->bqd"}> : () -> ()
    %cst_70 = arith.constant dense<0.000000e+00> : vector<32x8x8xf32>
    %188 = tpu.matmul %187, %176, %cst_70 {dimension_numbers = #tpu.dot_dimension_numbers<[2], [1], [1], [2], [0, 0, 0, 1, 1, 2], [0], [0]>} : vector<32x8x8xf32>, vector<32x8x8xf32>, vector<32x8x8xf32> -> vector<32x8x8xf32>
    "tpu.trace_stop"() : () -> ()
    %189 = vector.extract_strided_slice %188 {offsets = [0, 0, 0], sizes = [8, 8, 8], strides = [1, 1, 1]} : vector<32x8x8xf32> to vector<8x8x8xf32>
    %190 = vector.extract_strided_slice %188 {offsets = [8, 0, 0], sizes = [8, 8, 8], strides = [1, 1, 1]} : vector<32x8x8xf32> to vector<8x8x8xf32>
    %191 = vector.extract_strided_slice %188 {offsets = [16, 0, 0], sizes = [8, 8, 8], strides = [1, 1, 1]} : vector<32x8x8xf32> to vector<8x8x8xf32>
    %192 = vector.extract_strided_slice %188 {offsets = [24, 0, 0], sizes = [8, 8, 8], strides = [1, 1, 1]} : vector<32x8x8xf32> to vector<8x8x8xf32>
    %193 = tpu.concatenate %189, %190, %191, %192 in 2 : vector<8x8x8xf32>, vector<8x8x8xf32>, vector<8x8x8xf32>, vector<8x8x8xf32> -> vector<8x8x32xf32>
    %194 = vector.shape_cast %193 : vector<8x8x32xf32> to vector<64x32xf32>
    %cst_71 = arith.constant dense<0.000000e+00> : vector<64x32xf32>
    %195 = tpu.matmul %194, %144, %cst_71 {dimension_numbers = #tpu.dot_dimension_numbers<[1], [0], [0], [1], [0, 0, 1, 1], [], []>} : vector<64x32xf32>, vector<32x32xf32>, vector<64x32xf32> -> vector<64x32xf32>
    %196 = vector.broadcast %146 : vector<1x32xf32> to vector<64x32xf32>
    %197 = arith.addf %195, %196 : vector<64x32xf32>
    %198 = arith.addf %138, %197 : vector<64x32xf32>
    %c1_72 = arith.constant 1 : index
    %c0_73 = arith.constant 0 : index
    %c0_74 = arith.constant 0 : index
    %199 = vector.load %arg10[%c1_72, %c0_73, %c0_74] : memref<2x1x32xf32, #tpu.memory_space<vmem>>, vector<1x1x32xf32>
    %200 = vector.shape_cast %199 : vector<1x1x32xf32> to vector<1x32xf32>
    %c1_75 = arith.constant 1 : index
    %c0_76 = arith.constant 0 : index
    %c0_77 = arith.constant 0 : index
    %201 = vector.load %arg11[%c1_75, %c0_76, %c0_77] : memref<2x1x32xf32, #tpu.memory_space<vmem>>, vector<1x1x32xf32>
    %202 = vector.shape_cast %201 : vector<1x1x32xf32> to vector<1x32xf32>
    %cst_78 = arith.constant dense<0.000000e+00> : vector<64xf32>
    %203 = vector.multi_reduction <add>, %198, %cst_78 [1] : vector<64x32xf32> to vector<64xf32>
    %204 = vector.shape_cast %203 : vector<64xf32> to vector<64x1xf32>
    %cst_79 = arith.constant 3.200000e+01 : f32
    %205 = vector.broadcast %cst_79 : f32 to vector<64x1xf32>
    %206 = arith.divf %204, %205 : vector<64x1xf32>
    %207 = vector.broadcast %206 : vector<64x1xf32> to vector<64x32xf32>
    %208 = arith.subf %198, %207 : vector<64x32xf32>
    %209 = arith.mulf %208, %208 : vector<64x32xf32>
    %cst_80 = arith.constant dense<0.000000e+00> : vector<64xf32>
    %210 = vector.multi_reduction <add>, %209, %cst_80 [1] : vector<64x32xf32> to vector<64xf32>
    %211 = vector.shape_cast %210 : vector<64xf32> to vector<64x1xf32>
    %cst_81 = arith.constant 3.200000e+01 : f32
    %212 = vector.broadcast %cst_81 : f32 to vector<64x1xf32>
    %213 = arith.divf %211, %212 : vector<64x1xf32>
    %214 = vector.broadcast %206 : vector<64x1xf32> to vector<64x32xf32>
    %215 = arith.subf %198, %214 : vector<64x32xf32>
    %cst_82 = arith.constant 9.99999974E-6 : f32
    %216 = vector.broadcast %cst_82 : f32 to vector<64x1xf32>
    %217 = arith.addf %213, %216 : vector<64x1xf32>
    %218 = math.rsqrt %217 : vector<64x1xf32>
    %219 = vector.broadcast %218 : vector<64x1xf32> to vector<64x32xf32>
    %220 = arith.mulf %215, %219 : vector<64x32xf32>
    %221 = vector.broadcast %200 : vector<1x32xf32> to vector<64x32xf32>
    %222 = arith.mulf %220, %221 : vector<64x32xf32>
    %223 = vector.broadcast %202 : vector<1x32xf32> to vector<64x32xf32>
    %224 = arith.addf %222, %223 : vector<64x32xf32>
    %c1_83 = arith.constant 1 : index
    %c0_84 = arith.constant 0 : index
    %c0_85 = arith.constant 0 : index
    %225 = vector.load %arg6[%c1_83, %c0_84, %c0_85] : memref<2x32x64xf32, #tpu.memory_space<vmem>>, vector<1x32x64xf32>
    %226 = vector.shape_cast %225 : vector<1x32x64xf32> to vector<32x64xf32>
    %cst_86 = arith.constant dense<0.000000e+00> : vector<64x64xf32>
    %227 = tpu.matmul %224, %226, %cst_86 {dimension_numbers = #tpu.dot_dimension_numbers<[1], [0], [0], [1], [0, 0, 1, 1], [], []>} : vector<64x32xf32>, vector<32x64xf32>, vector<64x64xf32> -> vector<64x64xf32>
    %c1_87 = arith.constant 1 : index
    %c0_88 = arith.constant 0 : index
    %c0_89 = arith.constant 0 : index
    %228 = vector.load %arg7[%c1_87, %c0_88, %c0_89] : memref<2x1x64xf32, #tpu.memory_space<vmem>>, vector<1x1x64xf32>
    %229 = vector.shape_cast %228 : vector<1x1x64xf32> to vector<1x64xf32>
    %230 = vector.broadcast %229 : vector<1x64xf32> to vector<64x64xf32>
    %231 = arith.addf %227, %230 : vector<64x64xf32>
    %cst_90 = arith.constant 0.000000e+00 : f32
    %232 = vector.broadcast %cst_90 : f32 to vector<64x64xf32>
    %233 = arith.maximumf %231, %232 : vector<64x64xf32>
    %c1_91 = arith.constant 1 : index
    %c0_92 = arith.constant 0 : index
    %c0_93 = arith.constant 0 : index
    %234 = vector.load %arg8[%c1_91, %c0_92, %c0_93] : memref<2x64x32xf32, #tpu.memory_space<vmem>>, vector<1x64x32xf32>
    %235 = vector.shape_cast %234 : vector<1x64x32xf32> to vector<64x32xf32>
    %cst_94 = arith.constant dense<0.000000e+00> : vector<64x32xf32>
    %236 = tpu.matmul %233, %235, %cst_94 {dimension_numbers = #tpu.dot_dimension_numbers<[1], [0], [0], [1], [0, 0, 1, 1], [], []>} : vector<64x64xf32>, vector<64x32xf32>, vector<64x32xf32> -> vector<64x32xf32>
    %c1_95 = arith.constant 1 : index
    %c0_96 = arith.constant 0 : index
    %c0_97 = arith.constant 0 : index
    %237 = vector.load %arg9[%c1_95, %c0_96, %c0_97] : memref<2x1x32xf32, #tpu.memory_space<vmem>>, vector<1x1x32xf32>
    %238 = vector.shape_cast %237 : vector<1x1x32xf32> to vector<1x32xf32>
    %239 = vector.broadcast %238 : vector<1x32xf32> to vector<64x32xf32>
    %240 = arith.addf %236, %239 : vector<64x32xf32>
    %241 = arith.addf %224, %240 : vector<64x32xf32>
    %c1_98 = arith.constant 1 : index
    %c0_99 = arith.constant 0 : index
    %c0_100 = arith.constant 0 : index
    %242 = vector.load %arg12[%c1_98, %c0_99, %c0_100] : memref<2x1x32xf32, #tpu.memory_space<vmem>>, vector<1x1x32xf32>
    %243 = vector.shape_cast %242 : vector<1x1x32xf32> to vector<1x32xf32>
    %c1_101 = arith.constant 1 : index
    %c0_102 = arith.constant 0 : index
    %c0_103 = arith.constant 0 : index
    %244 = vector.load %arg13[%c1_101, %c0_102, %c0_103] : memref<2x1x32xf32, #tpu.memory_space<vmem>>, vector<1x1x32xf32>
    %245 = vector.shape_cast %244 : vector<1x1x32xf32> to vector<1x32xf32>
    %cst_104 = arith.constant dense<0.000000e+00> : vector<64xf32>
    %246 = vector.multi_reduction <add>, %241, %cst_104 [1] : vector<64x32xf32> to vector<64xf32>
    %247 = vector.shape_cast %246 : vector<64xf32> to vector<64x1xf32>
    %cst_105 = arith.constant 3.200000e+01 : f32
    %248 = vector.broadcast %cst_105 : f32 to vector<64x1xf32>
    %249 = arith.divf %247, %248 : vector<64x1xf32>
    %250 = vector.broadcast %249 : vector<64x1xf32> to vector<64x32xf32>
    %251 = arith.subf %241, %250 : vector<64x32xf32>
    %252 = arith.mulf %251, %251 : vector<64x32xf32>
    %cst_106 = arith.constant dense<0.000000e+00> : vector<64xf32>
    %253 = vector.multi_reduction <add>, %252, %cst_106 [1] : vector<64x32xf32> to vector<64xf32>
    %254 = vector.shape_cast %253 : vector<64xf32> to vector<64x1xf32>
    %cst_107 = arith.constant 3.200000e+01 : f32
    %255 = vector.broadcast %cst_107 : f32 to vector<64x1xf32>
    %256 = arith.divf %254, %255 : vector<64x1xf32>
    %257 = vector.broadcast %249 : vector<64x1xf32> to vector<64x32xf32>
    %258 = arith.subf %241, %257 : vector<64x32xf32>
    %cst_108 = arith.constant 9.99999974E-6 : f32
    %259 = vector.broadcast %cst_108 : f32 to vector<64x1xf32>
    %260 = arith.addf %256, %259 : vector<64x1xf32>
    %261 = math.rsqrt %260 : vector<64x1xf32>
    %262 = vector.broadcast %261 : vector<64x1xf32> to vector<64x32xf32>
    %263 = arith.mulf %258, %262 : vector<64x32xf32>
    %264 = vector.broadcast %243 : vector<1x32xf32> to vector<64x32xf32>
    %265 = arith.mulf %263, %264 : vector<64x32xf32>
    %266 = vector.broadcast %245 : vector<1x32xf32> to vector<64x32xf32>
    %267 = arith.addf %265, %266 : vector<64x32xf32>
    %268 = vector.extract_strided_slice %267 {offsets = [0, 0], sizes = [8, 32], strides = [1, 1]} : vector<64x32xf32> to vector<8x32xf32>
    %269 = vector.extract_strided_slice %267 {offsets = [8, 0], sizes = [8, 32], strides = [1, 1]} : vector<64x32xf32> to vector<8x32xf32>
    %270 = vector.extract_strided_slice %267 {offsets = [16, 0], sizes = [8, 32], strides = [1, 1]} : vector<64x32xf32> to vector<8x32xf32>
    %271 = vector.extract_strided_slice %267 {offsets = [24, 0], sizes = [8, 32], strides = [1, 1]} : vector<64x32xf32> to vector<8x32xf32>
    %272 = vector.extract_strided_slice %267 {offsets = [32, 0], sizes = [8, 32], strides = [1, 1]} : vector<64x32xf32> to vector<8x32xf32>
    %273 = vector.extract_strided_slice %267 {offsets = [40, 0], sizes = [8, 32], strides = [1, 1]} : vector<64x32xf32> to vector<8x32xf32>
    %274 = vector.extract_strided_slice %267 {offsets = [48, 0], sizes = [8, 32], strides = [1, 1]} : vector<64x32xf32> to vector<8x32xf32>
    %275 = vector.extract_strided_slice %267 {offsets = [56, 0], sizes = [8, 32], strides = [1, 1]} : vector<64x32xf32> to vector<8x32xf32>
    %276 = tpu.concatenate %268, %269, %270, %271, %272, %273, %274, %275 in 1 : vector<8x32xf32>, vector<8x32xf32>, vector<8x32xf32>, vector<8x32xf32>, vector<8x32xf32>, vector<8x32xf32>, vector<8x32xf32>, vector<8x32xf32> -> vector<8x256xf32>
    %c0_109 = arith.constant 0 : index
    %c0_110 = arith.constant 0 : index
    %277 = vector.load %arg14[%c0_109, %c0_110] : memref<8x256xf32, #tpu.memory_space<vmem>>, vector<8x256xf32>
    tpu.vector_store %arg14[%c0_109, %c0_110], %276 {strides = array<i32>} : memref<8x256xf32, #tpu.memory_space<vmem>>, vector<8x256xf32>,
    return
  }
  func.func @transform_0(%arg0: i32) -> (i32, i32) {
    %c0_i32 = arith.constant 0 : i32
    %c0_i32_0 = arith.constant 0 : i32
    return %c0_i32, %arg0 : i32, i32
  }
  func.func @transform_1(%arg0: i32) -> (i32, i32, i32) {
    %c0_i32 = arith.constant 0 : i32
    %c0_i32_0 = arith.constant 0 : i32
    %c0_i32_1 = arith.constant 0 : i32
    %c0_i32_2 = arith.constant 0 : i32
    return %c0_i32, %c0_i32_0, %c0_i32_1 : i32, i32, i32
  }
  func.func @transform_2(%arg0: i32) -> (i32, i32, i32) {
    %c0_i32 = arith.constant 0 : i32
    %c0_i32_0 = arith.constant 0 : i32
    %c0_i32_1 = arith.constant 0 : i32
    %c0_i32_2 = arith.constant 0 : i32
    return %c0_i32, %c0_i32_0, %c0_i32_1 : i32, i32, i32
  }
  func.func @transform_3(%arg0: i32) -> (i32, i32, i32) {
    %c0_i32 = arith.constant 0 : i32
    %c0_i32_0 = arith.constant 0 : i32
    %c0_i32_1 = arith.constant 0 : i32
    %c0_i32_2 = arith.constant 0 : i32
    return %c0_i32, %c0_i32_0, %c0_i32_1 : i32, i32, i32
  }
  func.func @transform_4(%arg0: i32) -> (i32, i32, i32) {
    %c0_i32 = arith.constant 0 : i32
    %c0_i32_0 = arith.constant 0 : i32
    %c0_i32_1 = arith.constant 0 : i32
    %c0_i32_2 = arith.constant 0 : i32
    return %c0_i32, %c0_i32_0, %c0_i32_1 : i32, i32, i32
  }
  func.func @transform_5(%arg0: i32) -> (i32, i32, i32) {
    %c0_i32 = arith.constant 0 : i32
    %c0_i32_0 = arith.constant 0 : i32
    %c0_i32_1 = arith.constant 0 : i32
    %c0_i32_2 = arith.constant 0 : i32
    return %c0_i32, %c0_i32_0, %c0_i32_1 : i32, i32, i32
  }
  func.func @transform_6(%arg0: i32) -> (i32, i32, i32) {
    %c0_i32 = arith.constant 0 : i32
    %c0_i32_0 = arith.constant 0 : i32
    %c0_i32_1 = arith.constant 0 : i32
    %c0_i32_2 = arith.constant 0 : i32
    return %c0_i32, %c0_i32_0, %c0_i32_1 : i32, i32, i32
  }
  func.func @transform_7(%arg0: i32) -> (i32, i32, i32) {
    %c0_i32 = arith.constant 0 : i32
    %c0_i32_0 = arith.constant 0 : i32
    %c0_i32_1 = arith.constant 0 : i32
    %c0_i32_2 = arith.constant 0 : i32
    return %c0_i32, %c0_i32_0, %c0_i32_1 : i32, i32, i32
  }
  func.func @transform_8(%arg0: i32) -> (i32, i32, i32) {
    %c0_i32 = arith.constant 0 : i32
    %c0_i32_0 = arith.constant 0 : i32
    %c0_i32_1 = arith.constant 0 : i32
    %c0_i32_2 = arith.constant 0 : i32
    return %c0_i32, %c0_i32_0, %c0_i32_1 : i32, i32, i32
  }
  func.func @transform_9(%arg0: i32) -> (i32, i32, i32) {
    %c0_i32 = arith.constant 0 : i32
    %c0_i32_0 = arith.constant 0 : i32
    %c0_i32_1 = arith.constant 0 : i32
    %c0_i32_2 = arith.constant 0 : i32
    return %c0_i32, %c0_i32_0, %c0_i32_1 : i32, i32, i32
  }
  func.func @transform_10(%arg0: i32) -> (i32, i32, i32) {
    %c0_i32 = arith.constant 0 : i32
    %c0_i32_0 = arith.constant 0 : i32
    %c0_i32_1 = arith.constant 0 : i32
    %c0_i32_2 = arith.constant 0 : i32
    return %c0_i32, %c0_i32_0, %c0_i32_1 : i32, i32, i32
  }
  func.func @transform_11(%arg0: i32) -> (i32, i32, i32) {
    %c0_i32 = arith.constant 0 : i32
    %c0_i32_0 = arith.constant 0 : i32
    %c0_i32_1 = arith.constant 0 : i32
    %c0_i32_2 = arith.constant 0 : i32
    return %c0_i32, %c0_i32_0, %c0_i32_1 : i32, i32, i32
  }
  func.func @transform_12(%arg0: i32) -> (i32, i32, i32) {
    %c0_i32 = arith.constant 0 : i32
    %c0_i32_0 = arith.constant 0 : i32
    %c0_i32_1 = arith.constant 0 : i32
    %c0_i32_2 = arith.constant 0 : i32
    return %c0_i32, %c0_i32_0, %c0_i32_1 : i32, i32, i32
  }
  func.func @transform_13(%arg0: i32) -> (i32, i32) {
    %c0_i32 = arith.constant 0 : i32
    %c0_i32_0 = arith.constant 0 : i32
    return %c0_i32, %arg0 : i32, i32
  }
}

</mosaic_0001>

<bundles_post_ra>
// kernel: tpu_custom_call.1
= control target key start
LH: loop header
LB: loop body
LE: loop exit
PB: predicated region body
PF: predicated region fallthrough
CT: control target
= control target key end

     0   :  { %18 = vsyncpa [#allocation3], 0  ;;  %s17338_s0 = inlined_call_operand.hbm [shape: f32[8,256], index: 0, kind: input, shape index: {}]   ;;  %s17339_s1 = inlined_call_operand.vmem [shape: f32[2,32,96], index: 1, kind: input, shape index: {}]   ;;  %s17340_s2 = inlined_call_operand.vmem [shape: f32[2,1,96], index: 2, kind: input, shape index: {}]   ;;  %s17341_s3 = inlined_call_operand.vmem [shape: f32[2,32,32], index: 3, kind: input, shape index: {}]   ;;  %s17342_s4 = inlined_call_operand.vmem [shape: f32[2,1,32], index: 4, kind: input, shape index: {}]   ;;  %s17343_s5 = inlined_call_operand.vmem [shape: f32[2,32,64], index: 5, kind: input, shape index: {}]   ;;  %s17344_s6 = inlined_call_operand.vmem [shape: f32[2,1,64], index: 6, kind: input, shape index: {}]   ;;  %s17345_s7 = inlined_call_operand.vmem [shape: f32[2,64,32], index: 7, kind: input, shape index: {}]   ;;  %s17346_s8 = inlined_call_operand.vmem [shape: f32[2,1,32], index: 8, kind: input, shape index: {}]   ;;  %s17347_s9 = inlined_call_operand.vmem [shape: f32[2,1,32], index: 9, kind: input, shape index: {}]   ;;  %s17348_s10 = inlined_call_operand.vmem [shape: f32[2,1,32], index: 10, kind: input, shape index: {}]   ;;  %s17349_s11 = inlined_call_operand.vmem [shape: f32[2,1,32], index: 11, kind: input, shape index: {}]   ;;  %s17350_s12 = inlined_call_operand.vmem [shape: f32[2,1,32], index: 12, kind: input, shape index: {}]   ;;  %s17351_s13 = inlined_call_operand.hbm [shape: f32[8,256], index: 13, kind: output, shape index: {}]  }
   0x1   :  { %19 = vsyncpa [#allocation4], 0  ;;  %s14572_s25 = smov [#allocation2]   ;;  %s14524_s29 = scalar_lea.hbm %s17338_s0, 256 }
   0x2   :  { %s26_s26 = sshll.u32 %s14572_s25, 4  ;;  %p14525_p0 = scmp.ne.s32.totalorder %s17338_s0, %s14524_s29  ;;  %s27_s26 = int_to_ptr.vmem [resolvable:$true] %s26_s26 }
   0x3   :  { %p14528_p1 = scmp.lt.u32.totalorder %s14524_s29, %s17338_s0 }
   0x5   :  { %p14530_p2 = pnand %p14528_p1, %p14525_p0 }
   0x7   :  { %14533 = shalt.err (!%p14530_p2)
}
   0x8   :  { %s14534_s17 = scalar_lea.vmem %s27_s26, 256  ;;  %p14539_p4 = scmp.lt.s32.totalorder %s27_s26, %s27_s26 }
   0x9   :  { %p14535_p3 = scmp.ne.s32.totalorder %s27_s26, %s14534_s17  ;;  %p14540_p5 = scmp.lt.s32.totalorder %s14534_s17, %s14534_s17 }
   0xb   :  { %p14541_p6 = por %p14540_p5, %p14539_p4 }
   0xd   :  { %p14542_p7 = pnand %p14541_p6, %p14535_p3 }
   0xf   :  { %14545 = shalt.err (!%p14542_p7)
}
  0x10   :  { %29 = dma.hbm_to_vmem [thread:$0]  %s17338_s0, 256, %s27_s26, [#allocation3]  }
  0x11   :  { %14568 = dma.done.wait [#allocation3], 256  }
  0x12   :  { %14569 = vsyncadd [#allocation3], 4294967040  ;;  %vm95_vm0 = vcmask 261120   ;;  %v57_v0 = vld [vmem:[#allocation2] sm:$0xff]  ;;  %s14573_s22 = smov 96   ;;  %s17360_s23 = smov 32  }
  0x13   :  { %v79_v1 = vld [vmem:[%s17339_s1] sm:$0xff]  ;;  %60 = vrot.lane.b32.xlu0 %v57_v0, %s14573_s22  ;;  %66 = vrot.lane.b32.xlu1 %v57_v0, %s17360_s23  ;;  %v80_v2 = vld [vmem:[%s17339_s1 + $0x8] sm:$0xff]  ;;  %s14575_s29 = smov 64   ;;  %s14576_s15 = smov 120   ;;  %v17352_v31 = vmov 0.0   ;;  %vm14580_vm1 = vmmov 0  }
  0x14   :  { %v81_v3 = vld [vmem:[%s17339_s1 + $0x10] sm:$0xff]  ;;  %v58_v4 = vld [vmem:[#allocation2 + $0x8] sm:$0xff]  ;;  %v14109_v5 = vpack.c.bf16 %v80_v2, %v79_v1  ;;  %v82_v6 = vld [vmem:[%s17339_s1 + $0x18] sm:$0xff]  ;;  %13301 = vmatprep.mubr.msk.f32.mxu0 %vm95_vm0, %v57_v0  ;;  %s14577_s16 = smov 112   ;;  %13318 = vmatprep.subr.mxu1 %v17352_v31  ;;  %s14579_s17 = smov 104   ;;  %vm275_vm2 = vcmask 64512  }
  0x15   :  { %v14113_v7 = vpack.c.bf16 %v82_v6, %v81_v3  ;;  %v12633_v14 = vld [vmem:[%s17340_s2] ss:$0 sm:$0xff]  ;;  %13320 = vmatprep.mubr.msk.f32.mxu1 %vm14580_vm1, %v17352_v31  ;;  %s14581_s18 = smov 8   ;;  %s14582_s25 = smov 16   ;;  %vm5594_vm3 = vcmask 130048   ;;  %vm5603_vm4 = vcmask 195584  }
  0x16   :  { %14110 = vmatprep.subr.bf16.mxu0 %v14109_v5  ;;  %s14583_s30 = smov 24   ;;  %vm6053_vm5 = vcmask 523264   ;;  %s17451_s0 = smov 32   ;;  %vm12611_vm6 = vcmask 785408  }
  0x17   :  { %63 = vrot.lane.b32.xlu0 %v57_v0, %s14575_s29  ;;  %70 = vrot.lane.b32.xlu1 %v58_v4, %s14573_s22 }
  0x18   :  { %14112 = vmatpush3.bf16.msra.mxu0 %v14109_v5 }
  0x19   :  { %14114 = vmatprep.subr.bf16.mxu0 %v14113_v7 }
  0x1b   :  { %73 = vrot.lane.b32.xlu0 %v58_v4, %s14575_s29  ;;  %76 = vrot.lane.b32.xlu1 %v58_v4, %s17360_s23 }
  0x1c   :  { %14116 = vmatpush3.bf16.msra.mxu0 %v14113_v7 }
  0x1d   :  { %13313 = vmatprep.subr.mxu0 %v17352_v31 }
  0x85   :  { %v14686_v8 = vpop.permute.xlu0 %60  ;;  %v14688_v9 = vpop.permute.xlu1 %66 }
  0x86   :  { %17370 = vst [vmem:[#allocation8_spill] sm:$0xff] %v14686_v8  ;;  %17371 = vst [vmem:[#allocation9_spill] sm:$0xff] %v14688_v9  ;;  %13302 = vmatmul.mubr.msk.f32.vlgmr.msra.gmra.mrb[0].mxu0 %vm95_vm0, %v14686_v8 }
  0x89   :  { %v14692_v10 = vpop.permute.xlu0 %63  ;;  %v14696_v11 = vpop.permute.xlu1 %70 }
  0x8a   :  { %17372 = vst [vmem:[#allocation10_spill] sm:$0xff] %v14692_v10  ;;  %13304 = vmatprep.mubr.msk.f32.mxu0 %vm95_vm0, %v14692_v10  ;;  %17373 = vst [vmem:[#allocation11_spill] sm:$0xff] %v14696_v11 }
  0x8b   :  { %13305 = vmatmul.mubr.msk.f32.gmra.mrb[2].mxu0 %vm95_vm0, %v14688_v9 }
  0x8c   :  { %13307 = vmatprep.mubr.msk.f32.mxu0 %vm95_vm0, %v58_v4 }
  0x8d   :  { %v14701_v12 = vpop.permute.xlu0 %73  ;;  %v14705_v13 = vpop.permute.xlu1 %76 }
  0x8e   :  { %17374 = vst [vmem:[#allocation12_spill] sm:$0xff] %v14701_v12  ;;  %17375 = vst [vmem:[#allocation13_spill] sm:$0xff] %v14705_v13 }
  0x8f   :  { %13308 = vmatmul.mubr.msk.f32.gmra.mrb[4].mxu0 %vm95_vm0, %v14696_v11 }
  0x90   :  { %13310 = vmatprep.mubr.msk.f32.mxu0 %vm95_vm0, %v14701_v12 }
  0x93   :  { %13311 = vmatmul.mubr.msk.f32.gmra.mrb[6].mxu0 %vm95_vm0, %v14705_v13 }
  0x94   :  { %13315 = vmatprep.mubr.msk.f32.mxu0 %vm14580_vm1, %v17352_v31 }
 0x159   :  { %v13303_v15 = vpop.f32.mrb[0].mxu0 }
 0x15a   :  { %v14714_v16 = vadd.f32 %v13303_v15, %v12633_v14  ;;  %v178_v17 = vpop.f32.mrb[1].mxu0 }
 0x15b   :  { %v14716_v18 = vadd.f32 %v12633_v14, %v178_v17 }
 0x15c   :  { %227 = vrot.lane.b32.xlu1 %v14714_v16, %s14576_s15 }
 0x15d   :  { %225 = vrot.lane.b32.xlu0 %v14716_v18, %s14576_s15 }
 0x15e   :  { %v13306_v19 = vpop.f32.mrb[2].mxu0 }
 0x15f   :  { %v188_v20 = vpop.f32.mrb[3].mxu0  ;;  %v14724_v21 = vadd.f32 %v13306_v19, %v12633_v14 }
 0x160   :  { %243 = vrot.lane.b32.xlu1 %v14714_v16, %s14577_s16  ;;  %v14726_v22 = vadd.f32 %v12633_v14, %v188_v20 }
 0x161   :  { %241 = vrot.lane.b32.xlu0 %v14716_v18, %s14577_s16 }
 0x162   :  { %v13309_v23 = vpop.f32.mrb[4].mxu0 }
 0x163   :  { %v198_v24 = vpop.f32.mrb[5].mxu0  ;;  %v14732_v25 = vadd.f32 %v13309_v23, %v12633_v14 }
 0x164   :  { %231 = vrot.lane.b32.xlu1 %v14724_v21, %s14576_s15  ;;  %v14734_v26 = vadd.f32 %v12633_v14, %v198_v24 }
 0x165   :  { %229 = vrot.lane.b32.xlu0 %v14726_v22, %s14576_s15 }
 0x166   :  { %v13312_v27 = vpop.f32.mrb[6].mxu0 }
 0x167   :  { %v208_v28 = vpop.f32.mrb[7].mxu0  ;;  %v14740_v29 = vadd.f32 %v13312_v27, %v12633_v14 }
 0x168   :  { %235 = vrot.lane.b32.xlu1 %v14732_v25, %s14576_s15  ;;  %v14742_v30 = vadd.f32 %v12633_v14, %v208_v28 }
 0x169   :  { %233 = vrot.lane.b32.xlu0 %v14734_v26, %s14576_s15 }
 0x16c   :  { %239 = vrot.lane.b32.xlu1 %v14740_v29, %s14576_s15 }
 0x16d   :  { %237 = vrot.lane.b32.xlu0 %v14742_v30, %s14576_s15 }
 0x170   :  { %247 = vrot.lane.b32.xlu1 %v14724_v21, %s14577_s16 }
 0x171   :  { %245 = vrot.lane.b32.xlu0 %v14726_v22, %s14577_s16 }
 0x174   :  { %251 = vrot.lane.b32.xlu1 %v14732_v25, %s14577_s16 }
 0x175   :  { %249 = vrot.lane.b32.xlu0 %v14734_v26, %s14577_s16 }
 0x178   :  { %255 = vrot.lane.b32.xlu1 %v14740_v29, %s14577_s16 }
 0x179   :  { %257 = vrot.lane.b32.xlu0 %v14716_v18, %s14579_s17 }
 0x17c   :  { %259 = vrot.lane.b32.xlu1 %v14714_v16, %s14579_s17 }
 0x17d   :  { %253 = vrot.lane.b32.xlu0 %v14742_v30, %s14577_s16 }
 0x180   :  { %263 = vrot.lane.b32.xlu1 %v14724_v21, %s14579_s17 }
 0x181   :  { %261 = vrot.lane.b32.xlu0 %v14726_v22, %s14579_s17 }
 0x184   :  { %265 = vrot.lane.b32.xlu1 %v14734_v26, %s14579_s17 }
 0x185   :  { %350 = vrot.lane.b32.xlu0 %v14714_v16, %s14573_s22 }
 0x188   :  { %273 = vrot.lane.b32.xlu1 %v14716_v18, %s14573_s22 }
 0x189   :  { %267 = vrot.lane.b32.xlu0 %v14732_v25, %s14579_s17 }
 0x18c   :  { %269 = vrot.lane.b32.xlu1 %v14742_v30, %s14579_s17 }
 0x18d   :  { %426 = vrot.lane.b32.xlu0 %v14726_v22, %s14573_s22 }
 0x190   :  { %502 = vrot.lane.b32.xlu1 %v14724_v21, %s14573_s22 }
 0x191   :  { %271 = vrot.lane.b32.xlu0 %v14740_v29, %s14579_s17 }
 0x194   :  { %654 = vrot.lane.b32.xlu1 %v14732_v25, %s14573_s22 }
 0x195   :  { %578 = vrot.lane.b32.xlu0 %v14734_v26, %s14573_s22 }
 0x198   :  { %806 = vrot.lane.b32.xlu1 %v14740_v29, %s14573_s22 }
 0x199   :  { %730 = vrot.lane.b32.xlu0 %v14742_v30, %s14573_s22 }
 0x1ce   :  { %v14800_v32 = vpop.permute.xlu1 %227 }
 0x1cf   :  { %958 = vrot.lane.b32.xlu1 %v14800_v32, %s14573_s22  ;;  %v14804_v33 = vpop.permute.xlu0 %225 }
 0x1d0   :  { %882 = vrot.lane.b32.xlu0 %v14804_v33, %s14573_s22 }
 0x1d2   :  { %v14808_v34 = vpop.permute.xlu1 %243 }
 0x1d3   :  { %v14810_v35 = vpop.permute.xlu0 %241 }
 0x1d6   :  { %v14812_v36 = vpop.permute.xlu1 %231 }
 0x1d7   :  { %1110 = vrot.lane.b32.xlu1 %v14812_v36, %s14573_s22  ;;  %v14816_v37 = vpop.permute.xlu0 %229 }
 0x1d8   :  { %1034 = vrot.lane.b32.xlu0 %v14816_v37, %s14573_s22 }
 0x1da   :  { %v14820_v38 = vpop.permute.xlu1 %235 }
 0x1db   :  { %1262 = vrot.lane.b32.xlu1 %v14820_v38, %s14573_s22  ;;  %v14824_v39 = vpop.permute.xlu0 %233 }
 0x1dc   :  { %1186 = vrot.lane.b32.xlu0 %v14824_v39, %s14573_s22 }
 0x1de   :  { %v14828_v40 = vpop.permute.xlu1 %239 }
 0x1df   :  { %1414 = vrot.lane.b32.xlu1 %v14828_v40, %s14573_s22  ;;  %v14832_v41 = vpop.permute.xlu0 %237 }
 0x1e0   :  { %1338 = vrot.lane.b32.xlu0 %v14832_v41, %s14573_s22 }
 0x1e2   :  { %v14836_v42 = vpop.permute.xlu1 %247 }
 0x1e3   :  { %1566 = vrot.lane.b32.xlu1 %v14808_v34, %s14573_s22  ;;  %v14840_v43 = vpop.permute.xlu0 %245 }
 0x1e4   :  { %1490 = vrot.lane.b32.xlu0 %v14810_v35, %s14573_s22 }
 0x1e6   :  { %v14844_v44 = vpop.permute.xlu1 %251 }
 0x1e7   :  { %1718 = vrot.lane.b32.xlu1 %v14836_v42, %s14573_s22  ;;  %v14848_v45 = vpop.permute.xlu0 %249 }
 0x1e8   :  { %1642 = vrot.lane.b32.xlu0 %v14840_v43, %s14573_s22 }
 0x1ea   :  { %v14852_v46 = vpop.permute.xlu1 %255 }
 0x1eb   :  { %1870 = vrot.lane.b32.xlu1 %v14844_v44, %s14573_s22  ;;  %v14856_v47 = vpop.permute.xlu0 %257 }
 0x1ec   :  { %1794 = vrot.lane.b32.xlu0 %v14848_v45, %s14573_s22 }
 0x1ee   :  { %v14860_v48 = vpop.permute.xlu1 %259 }
 0x1ef   :  { %2022 = vrot.lane.b32.xlu1 %v14852_v46, %s14573_s22  ;;  %v14864_v49 = vpop.permute.xlu0 %253 }
 0x1f0   :  { %1946 = vrot.lane.b32.xlu0 %v14864_v49, %s14573_s22 }
 0x1f2   :  { %v14868_v50 = vpop.permute.xlu1 %263 }
 0x1f3   :  { %2174 = vrot.lane.b32.xlu1 %v14860_v48, %s14573_s22  ;;  %v14872_v51 = vpop.permute.xlu0 %261 }
 0x1f4   :  { %2098 = vrot.lane.b32.xlu0 %v14856_v47, %s14573_s22 }
 0x1f6   :  { %v14876_v52 = vpop.permute.xlu1 %265 }
 0x1f7   :  { %2326 = vrot.lane.b32.xlu1 %v14868_v50, %s14573_s22  ;;  %v351_v53 = vpop.permute.xlu0 %350 }
 0x1f8   :  { %2250 = vrot.lane.b32.xlu0 %v14872_v51, %s14573_s22  ;;  %13319 = vmatpush3.xpose.msk.msra.mxu1 %vm275_vm2, %v351_v53 }
 0x1f9   :  { %13323 = vmatprep.subr.mxu1 %v17352_v31 }
 0x1fa   :  { %v274_v54 = vpop.permute.xlu1 %273 }
 0x1fb   :  { %13314 = vmatpush3.xpose.msk.msra.mxu0 %vm275_vm2, %v274_v54  ;;  %13321 = vmatmul.mubr.msk.f32.vlgmr.msra.gmra.mrb[0].mxu1 %vm275_vm2, %v14714_v16  ;;  %v14887_v55 = vpop.permute.xlu0 %267 }
 0x1fc   :  { %2402 = vrot.lane.b32.xlu0 %v14876_v52, %s14573_s22  ;;  %2478 = vrot.lane.b32.xlu1 %v14887_v55, %s14573_s22 }
 0x1fd   :  { %13325 = vmatprep.mubr.msk.f32.mxu1 %vm14580_vm1, %v17352_v31  ;;  %13338 = vmatprep.subr.mxu0 %v17352_v31 }
 0x1fe   :  { %13316 = vmatmul.mubr.msk.f32.vlgmr.msra.gmra.mrb[8].mxu0 %vm275_vm2, %v14716_v18  ;;  %v14898_v56 = vpop.permute.xlu1 %269 }
 0x1ff   :  { %v427_v57 = vpop.permute.xlu0 %426  ;;  %13340 = vmatprep.mubr.msk.f32.mxu0 %vm14580_vm1, %v17352_v31 }
 0x200   :  { %2554 = vrot.lane.b32.xlu0 %v14898_v56, %s14573_s22  ;;  %13324 = vmatpush3.xpose.msk.msra.mxu1 %vm275_vm2, %v427_v57 }
 0x201   :  { %13328 = vmatprep.subr.mxu1 %v17352_v31 }
 0x202   :  { %v503_v58 = vpop.permute.xlu1 %502 }
 0x203   :  { %13326 = vmatmul.mubr.msk.f32.vlgmr.msra.gmra.mrb[2].mxu1 %vm275_vm2, %v14726_v22  ;;  %v14908_v59 = vpop.permute.xlu0 %271 }
 0x204   :  { %3134 = vrot.lane.b32.xlu0 %v14714_v16, %s14575_s29  ;;  %13329 = vmatpush3.xpose.msk.msra.mxu1 %vm275_vm2, %v503_v58 }
 0x205   :  { %2630 = vrot.lane.b32.xlu1 %v14908_v59, %s14573_s22  ;;  %13330 = vmatprep.mubr.msk.f32.mxu1 %vm14580_vm1, %v17352_v31 }
 0x206   :  { %v655_v60 = vpop.permute.xlu1 %654  ;;  %13333 = vmatprep.subr.mxu1 %v17352_v31 }
 0x207   :  { %13331 = vmatmul.mubr.msk.f32.vlgmr.msra.gmra.mrb[4].mxu1 %vm275_vm2, %v14724_v21  ;;  %13339 = vmatpush3.xpose.msk.msra.mxu0 %vm275_vm2, %v655_v60  ;;  %v579_v61 = vpop.permute.xlu0 %578 }
 0x208   :  { %3286 = vrot.lane.b32.xlu0 %v14724_v21, %s14575_s29  ;;  %13334 = vmatpush3.xpose.msk.msra.mxu1 %vm275_vm2, %v579_v61 }
 0x209   :  { %3058 = vrot.lane.b32.xlu1 %v14716_v18, %s14575_s29  ;;  %13348 = vmatprep.subr.mxu0 %v17352_v31 }
 0x20a   :  { %13341 = vmatmul.mubr.msk.f32.vlgmr.msra.gmra.mrb[10].mxu0 %vm275_vm2, %v14732_v25  ;;  %v807_v62 = vpop.permute.xlu1 %806  ;;  %13335 = vmatprep.mubr.msk.f32.mxu1 %vm14580_vm1, %v17352_v31 }
 0x20b   :  { %13336 = vmatmul.mubr.msk.f32.vlgmr.msra.gmra.mrb[6].mxu1 %vm275_vm2, %v14734_v26  ;;  %13343 = vmatprep.subr.mxu1 %v17352_v31  ;;  %v731_v63 = vpop.permute.xlu0 %730 }
 0x20c   :  { %13349 = vmatpush3.xpose.msk.msra.mxu0 %vm275_vm2, %v807_v62  ;;  %3438 = vrot.lane.b32.xlu0 %v14732_v25, %s14575_s29 }
 0x20d   :  { %3210 = vrot.lane.b32.xlu1 %v14726_v22, %s14575_s29  ;;  %13344 = vmatpush3.xpose.msk.msra.mxu1 %vm275_vm2, %v731_v63 }
 0x20e   :  { %13350 = vmatprep.mubr.msk.f32.mxu0 %vm14580_vm1, %v17352_v31  ;;  %13345 = vmatprep.mubr.msk.f32.mxu1 %vm14580_vm1, %v17352_v31 }
 0x20f   :  { %13351 = vmatmul.mubr.msk.f32.vlgmr.msra.gmra.mrb[12].mxu0 %vm275_vm2, %v14740_v29  ;;  %13358 = vmatprep.subr.mxu0 %v17352_v31 }
 0x210   :  { %13346 = vmatmul.mubr.msk.f32.vlgmr.msra.gmra.mrb[8].mxu1 %vm275_vm2, %v14742_v30  ;;  %3590 = vrot.lane.b32.xlu0 %v14740_v29, %s14575_s29 }
 0x211   :  { %3362 = vrot.lane.b32.xlu1 %v14734_v26, %s14575_s29  ;;  %13353 = vmatprep.subr.mxu1 %v17352_v31 }
 0x212   :  { %13360 = vmatprep.mubr.msk.f32.mxu0 %vm14580_vm1, %v17352_v31  ;;  %13355 = vmatprep.mubr.msk.f32.mxu1 %vm14580_vm1, %v17352_v31 }
 0x214   :  { %3742 = vrot.lane.b32.xlu0 %v14800_v32, %s14575_s29 }
 0x215   :  { %3514 = vrot.lane.b32.xlu1 %v14742_v30, %s14575_s29 }
 0x218   :  { %3894 = vrot.lane.b32.xlu0 %v14812_v36, %s14575_s29 }
 0x219   :  { %3666 = vrot.lane.b32.xlu1 %v14804_v33, %s14575_s29 }
 0x21c   :  { %4046 = vrot.lane.b32.xlu0 %v14820_v38, %s14575_s29 }
 0x21d   :  { %3818 = vrot.lane.b32.xlu1 %v14816_v37, %s14575_s29 }
 0x220   :  { %4198 = vrot.lane.b32.xlu0 %v14828_v40, %s14575_s29 }
 0x221   :  { %3970 = vrot.lane.b32.xlu1 %v14824_v39, %s14575_s29 }
 0x224   :  { %4350 = vrot.lane.b32.xlu0 %v14808_v34, %s14575_s29 }
 0x225   :  { %4274 = vrot.lane.b32.xlu1 %v14810_v35, %s14575_s29 }
 0x228   :  { %4502 = vrot.lane.b32.xlu0 %v14836_v42, %s14575_s29 }
 0x229   :  { %4426 = vrot.lane.b32.xlu1 %v14840_v43, %s14575_s29 }
 0x22c   :  { %4882 = vrot.lane.b32.xlu0 %v14856_v47, %s14575_s29 }
 0x22d   :  { %4578 = vrot.lane.b32.xlu1 %v14848_v45, %s14575_s29 }
 0x230   :  { %5034 = vrot.lane.b32.xlu0 %v14872_v51, %s14575_s29 }
 0x231   :  { %4654 = vrot.lane.b32.xlu1 %v14844_v44, %s14575_s29 }
 0x234   :  { %4730 = vrot.lane.b32.xlu0 %v14864_v49, %s14575_s29 }
 0x235   :  { %4806 = vrot.lane.b32.xlu1 %v14852_v46, %s14575_s29 }
 0x239   :  { %4958 = vrot.lane.b32.xlu1 %v14860_v48, %s14575_s29 }
 0x23d   :  { %5110 = vrot.lane.b32.xlu1 %v14868_v50, %s14575_s29 }
 0x241   :  { %4122 = vrot.lane.b32.xlu1 %v14832_v41, %s14575_s29  ;;  %v959_v0 = vpop.permute.xlu1 %958 }
 0x242   :  { %13359 = vmatpush3.xpose.msk.msra.mxu0 %vm275_vm2, %v959_v0  ;;  %v883_v1 = vpop.permute.xlu0 %882 }
 0x243   :  { %13354 = vmatpush3.xpose.msk.msra.mxu1 %vm275_vm2, %v883_v1  ;;  %13368 = vmatprep.subr.mxu0 %v17352_v31 }
 0x244   :  { %13363 = vmatprep.subr.mxu1 %v17352_v31 }
 0x245   :  { %13361 = vmatmul.mubr.msk.f32.vlgmr.msra.gmra.mrb[14].mxu0 %vm275_vm2, %v14800_v32 }
 0x246   :  { %13356 = vmatmul.mubr.msk.f32.vlgmr.msra.gmra.mrb[10].mxu1 %vm275_vm2, %v14804_v33  ;;  %13370 = vmatprep.mubr.msk.f32.mxu0 %vm14580_vm1, %v17352_v31 }
 0x247   :  { %13365 = vmatprep.mubr.msk.f32.mxu1 %vm14580_vm1, %v17352_v31 }
 0x249   :  { %v1111_v2 = vpop.permute.xlu1 %1110 }
 0x24a   :  { %13369 = vmatpush3.xpose.msk.msra.mxu0 %vm275_vm2, %v1111_v2  ;;  %v1035_v3 = vpop.permute.xlu0 %1034 }
 0x24b   :  { %13364 = vmatpush3.xpose.msk.msra.mxu1 %vm275_vm2, %v1035_v3  ;;  %13378 = vmatprep.subr.mxu0 %v17352_v31 }
 0x24c   :  { %13373 = vmatprep.subr.mxu1 %v17352_v31 }
 0x24d   :  { %13371 = vmatmul.mubr.msk.f32.vlgmr.msra.gmra.mrb[16].mxu0 %vm275_vm2, %v14812_v36  ;;  %v1263_v4 = vpop.permute.xlu1 %1262 }
 0x24e   :  { %13366 = vmatmul.mubr.msk.f32.vlgmr.msra.gmra.mrb[12].mxu1 %vm275_vm2, %v14816_v37  ;;  %13379 = vmatpush3.xpose.msk.msra.mxu0 %vm275_vm2, %v1263_v4  ;;  %v1187_v5 = vpop.permute.xlu0 %1186 }
 0x24f   :  { %13374 = vmatpush3.xpose.msk.msra.mxu1 %vm275_vm2, %v1187_v5  ;;  %13380 = vmatprep.mubr.msk.f32.mxu0 %vm14580_vm1, %v17352_v31 }
 0x250   :  { %13388 = vmatprep.subr.mxu0 %v17352_v31  ;;  %13375 = vmatprep.mubr.msk.f32.mxu1 %vm14580_vm1, %v17352_v31 }
 0x251   :  { %13381 = vmatmul.mubr.msk.f32.vlgmr.msra.gmra.mrb[18].mxu0 %vm275_vm2, %v14820_v38  ;;  %v1415_v6 = vpop.permute.xlu1 %1414  ;;  %13383 = vmatprep.subr.mxu1 %v17352_v31 }
 0x252   :  { %13376 = vmatmul.mubr.msk.f32.vlgmr.msra.gmra.mrb[14].mxu1 %vm275_vm2, %v14824_v39  ;;  %13389 = vmatpush3.xpose.msk.msra.mxu0 %vm275_vm2, %v1415_v6  ;;  %v1339_v7 = vpop.permute.xlu0 %1338 }
 0x253   :  { %13384 = vmatpush3.xpose.msk.msra.mxu1 %vm275_vm2, %v1339_v7  ;;  %13390 = vmatprep.mubr.msk.f32.mxu0 %vm14580_vm1, %v17352_v31 }
 0x254   :  { %13398 = vmatprep.subr.mxu0 %v17352_v31  ;;  %13385 = vmatprep.mubr.msk.f32.mxu1 %vm14580_vm1, %v17352_v31 }
 0x255   :  { %13391 = vmatmul.mubr.msk.f32.vlgmr.msra.gmra.mrb[20].mxu0 %vm275_vm2, %v14828_v40  ;;  %v1567_v14 = vpop.permute.xlu1 %1566  ;;  %13393 = vmatprep.subr.mxu1 %v17352_v31 }
 0x256   :  { %13386 = vmatmul.mubr.msk.f32.vlgmr.msra.gmra.mrb[16].mxu1 %vm275_vm2, %v14832_v41  ;;  %13399 = vmatpush3.xpose.msk.msra.mxu0 %vm275_vm2, %v1567_v14  ;;  %v1491_v15 = vpop.permute.xlu0 %1490 }
 0x257   :  { %13394 = vmatpush3.xpose.msk.msra.mxu1 %vm275_vm2, %v1491_v15  ;;  %13400 = vmatprep.mubr.msk.f32.mxu0 %vm14580_vm1, %v17352_v31 }
 0x258   :  { %13408 = vmatprep.subr.mxu0 %v17352_v31  ;;  %13395 = vmatprep.mubr.msk.f32.mxu1 %vm14580_vm1, %v17352_v31 }
 0x259   :  { %13401 = vmatmul.mubr.msk.f32.vlgmr.msra.gmra.mrb[22].mxu0 %vm275_vm2, %v14808_v34  ;;  %v1719_v16 = vpop.permute.xlu1 %1718  ;;  %13403 = vmatprep.subr.mxu1 %v17352_v31 }
 0x25a   :  { %13396 = vmatmul.mubr.msk.f32.vlgmr.msra.gmra.mrb[18].mxu1 %vm275_vm2, %v14810_v35  ;;  %13409 = vmatpush3.xpose.msk.msra.mxu0 %vm275_vm2, %v1719_v16  ;;  %v1643_v17 = vpop.permute.xlu0 %1642 }
 0x25b   :  { %13404 = vmatpush3.xpose.msk.msra.mxu1 %vm275_vm2, %v1643_v17  ;;  %13410 = vmatprep.mubr.msk.f32.mxu0 %vm14580_vm1, %v17352_v31 }
 0x25c   :  { %13418 = vmatprep.subr.mxu0 %v17352_v31  ;;  %13405 = vmatprep.mubr.msk.f32.mxu1 %vm14580_vm1, %v17352_v31 }
 0x25d   :  { %13411 = vmatmul.mubr.msk.f32.vlgmr.msra.gmra.mrb[24].mxu0 %vm275_vm2, %v14836_v42  ;;  %v1871_v18 = vpop.permute.xlu1 %1870  ;;  %13413 = vmatprep.subr.mxu1 %v17352_v31 }
 0x25e   :  { %13406 = vmatmul.mubr.msk.f32.vlgmr.msra.gmra.mrb[20].mxu1 %vm275_vm2, %v14840_v43  ;;  %13419 = vmatpush3.xpose.msk.msra.mxu0 %vm275_vm2, %v1871_v18  ;;  %v1795_v19 = vpop.permute.xlu0 %1794 }
 0x25f   :  { %13414 = vmatpush3.xpose.msk.msra.mxu1 %vm275_vm2, %v1795_v19  ;;  %13420 = vmatprep.mubr.msk.f32.mxu0 %vm14580_vm1, %v17352_v31 }
 0x260   :  { %13428 = vmatprep.subr.mxu0 %v17352_v31  ;;  %13415 = vmatprep.mubr.msk.f32.mxu1 %vm14580_vm1, %v17352_v31 }
 0x261   :  { %13421 = vmatmul.mubr.msk.f32.vlgmr.msra.gmra.mrb[26].mxu0 %vm275_vm2, %v14844_v44  ;;  %v2023_v20 = vpop.permute.xlu1 %2022  ;;  %13423 = vmatprep.subr.mxu1 %v17352_v31 }
 0x262   :  { %13416 = vmatmul.mubr.msk.f32.vlgmr.msra.gmra.mrb[22].mxu1 %vm275_vm2, %v14848_v45  ;;  %13429 = vmatpush3.xpose.msk.msra.mxu0 %vm275_vm2, %v2023_v20  ;;  %v1947_v21 = vpop.permute.xlu0 %1946 }
 0x263   :  { %13424 = vmatpush3.xpose.msk.msra.mxu1 %vm275_vm2, %v1947_v21  ;;  %13430 = vmatprep.mubr.msk.f32.mxu0 %vm14580_vm1, %v17352_v31 }
 0x264   :  { %13438 = vmatprep.subr.mxu0 %v17352_v31  ;;  %13425 = vmatprep.mubr.msk.f32.mxu1 %vm14580_vm1, %v17352_v31 }
 0x265   :  { %13431 = vmatmul.mubr.msk.f32.vlgmr.msra.gmra.mrb[28].mxu0 %vm275_vm2, %v14852_v46  ;;  %v2175_v22 = vpop.permute.xlu1 %2174  ;;  %13433 = vmatprep.subr.mxu1 %v17352_v31 }
 0x266   :  { %13426 = vmatmul.mubr.msk.f32.vlgmr.msra.gmra.mrb[24].mxu1 %vm275_vm2, %v14864_v49  ;;  %13439 = vmatpush3.xpose.msk.msra.mxu0 %vm275_vm2, %v2175_v22  ;;  %v2099_v23 = vpop.permute.xlu0 %2098 }
 0x267   :  { %13434 = vmatpush3.xpose.msk.msra.mxu1 %vm275_vm2, %v2099_v23  ;;  %13440 = vmatprep.mubr.msk.f32.mxu0 %vm14580_vm1, %v17352_v31 }
 0x268   :  { %13448 = vmatprep.subr.mxu0 %v17352_v31  ;;  %13435 = vmatprep.mubr.msk.f32.mxu1 %vm14580_vm1, %v17352_v31 }
 0x269   :  { %13441 = vmatmul.mubr.msk.f32.vlgmr.msra.gmra.mrb[30].mxu0 %vm275_vm2, %v14860_v48  ;;  %v2327_v24 = vpop.permute.xlu1 %2326  ;;  %13443 = vmatprep.subr.mxu1 %v17352_v31 }
 0x26a   :  { %13436 = vmatmul.mubr.msk.f32.vlgmr.msra.gmra.mrb[26].mxu1 %vm275_vm2, %v14856_v47  ;;  %13449 = vmatpush3.xpose.msk.msra.mxu0 %vm275_vm2, %v2327_v24  ;;  %v2251_v25 = vpop.permute.xlu0 %2250 }
 0x26b   :  { %13444 = vmatpush3.xpose.msk.msra.mxu1 %vm275_vm2, %v2251_v25  ;;  %13450 = vmatprep.mubr.msk.f32.mxu0 %vm14580_vm1, %v17352_v31 }
 0x26c   :  { %13445 = vmatprep.mubr.msk.f32.mxu1 %vm14580_vm1, %v17352_v31  ;;  %13458 = vmatprep.subr.mxu0 %v17352_v31 }
 0x26d   :  { %13451 = vmatmul.mubr.msk.f32.vlgmr.msra.gmra.mrb[32].mxu0 %vm275_vm2, %v14868_v50  ;;  %13453 = vmatprep.subr.mxu1 %v17352_v31 }
 0x26e   :  { %v2479_v26 = vpop.permute.xlu1 %2478  ;;  %13446 = vmatmul.mubr.msk.f32.vlgmr.msra.gmra.mrb[28].mxu1 %vm275_vm2, %v14872_v51  ;;  %v2403_v27 = vpop.permute.xlu0 %2402  ;;  %13460 = vmatprep.mubr.msk.f32.mxu0 %vm14580_vm1, %v17352_v31 }
 0x26f   :  { %13454 = vmatpush3.xpose.msk.msra.mxu1 %vm275_vm2, %v2403_v27  ;;  %13459 = vmatpush3.xpose.msk.msra.mxu0 %vm275_vm2, %v2479_v26 }
 0x270   :  { %13455 = vmatprep.mubr.msk.f32.mxu1 %vm14580_vm1, %v17352_v31  ;;  %13463 = vmatprep.subr.mxu1 %v17352_v31 }
 0x271   :  { %13468 = vmatprep.subr.mxu0 %v17352_v31 }
 0x272   :  { %13456 = vmatmul.mubr.msk.f32.vlgmr.msra.gmra.mrb[30].mxu1 %vm275_vm2, %v14876_v52  ;;  %13461 = vmatmul.mubr.msk.f32.vlgmr.msra.gmra.mrb[34].mxu0 %vm275_vm2, %v14887_v55  ;;  %v2555_v28 = vpop.permute.xlu0 %2554 }
 0x273   :  { %13464 = vmatpush3.xpose.msk.msra.mxu1 %vm275_vm2, %v2555_v28  ;;  %13465 = vmatprep.mubr.msk.f32.mxu1 %vm14580_vm1, %v17352_v31 }
 0x274   :  { %13470 = vmatprep.mubr.msk.f32.mxu0 %vm14580_vm1, %v17352_v31  ;;  %13473 = vmatprep.subr.mxu1 %v17352_v31 }
 0x276   :  { %13466 = vmatmul.mubr.msk.f32.vlgmr.msra.gmra.mrb[32].mxu1 %vm275_vm2, %v14898_v56  ;;  %v3135_v30 = vpop.permute.xlu0 %3134 }
 0x277   :  { %v2631_v29 = vpop.permute.xlu1 %2630  ;;  %13475 = vmatprep.mubr.msk.f32.mxu1 %vm14580_vm1, %v17352_v31 }
 0x278   :  { %13469 = vmatpush3.xpose.msk.msra.mxu0 %vm275_vm2, %v2631_v29 }
 0x279   :  { %13478 = vmatprep.subr.mxu0 %v17352_v31 }
 0x27a   :  { %v15190_v4 = vpop.permute.xlu0 %3286 }
 0x27b   :  { %13471 = vmatmul.mubr.msk.f32.vlgmr.msra.gmra.mrb[36].mxu0 %vm275_vm2, %v14908_v59  ;;  %v3059_v32 = vpop.permute.xlu1 %3058 }
 0x27c   :  { %13474 = vmatpush3.msra.mxu1 %v3059_v32  ;;  %13479 = vmatpush3.msra.mxu0 %v3135_v30 }
 0x27d   :  { %13480 = vmatprep.mubr.msk.f32.mxu0 %vm14580_vm1, %v17352_v31  ;;  %13488 = vmatprep.subr.mxu0 %v17352_v31 }
 0x27e   :  { %13483 = vmatprep.subr.mxu1 %v17352_v31  ;;  %v15196_v14 = vpop.permute.xlu0 %3438 }
 0x27f   :  { %v15178_v61 = vpop.permute.xlu1 %3210 }
 0x282   :  { %v15214_v26 = vpop.permute.xlu0 %3590 }
 0x283   :  { %v15180_v62 = vpop.permute.xlu1 %3362 }
 0x287   :  { %v15182_v63 = vpop.permute.xlu1 %3514 }
 0x28b   :  { %v15194_v7 = vpop.permute.xlu1 %3666 }
 0x28f   :  { %v15204_v19 = vpop.permute.xlu1 %3818 }
 0x293   :  { %v15218_v29 = vpop.permute.xlu1 %3970 }
 0x2ce   :  { %v15146_v33 = vpop.f32.mrb[0].mxu1 }
 0x2cf   :  { %v13322_v34 = vpop.f32.mrb[1].mxu1  ;;  %v2709_v35 = vsel %vm275_vm2, %v15146_v33, -inf }
 0x2d0   :  { %2710 = vmax.xlane.f32.xlu1 %v2709_v35 }
 0x2d1   :  { %v15150_v36 = vpop.f32.mrb[8].mxu0 }
 0x2d2   :  { %v13317_v37 = vpop.f32.mrb[9].mxu0  ;;  %v2706_v38 = vsel %vm275_vm2, %v15150_v36, -inf }
 0x2d3   :  { %2707 = vmax.xlane.f32.xlu0 %v2706_v38 }
 0x2d6   :  { %v15154_v39 = vpop.f32.mrb[2].mxu1 }
 0x2d7   :  { %v13327_v40 = vpop.f32.mrb[3].mxu1  ;;  %v2712_v41 = vsel %vm275_vm2, %v15154_v39, -inf }
 0x2d8   :  { %2713 = vmax.xlane.f32.xlu0 %v2712_v41  ;;  %v15228_v40 = vpop.permute.xlu0 %3742 }
 0x2da   :  { %v15158_v42 = vpop.f32.mrb[4].mxu1 }
 0x2db   :  { %v13332_v43 = vpop.f32.mrb[5].mxu1  ;;  %v2715_v51 = vsel %vm275_vm2, %v15158_v42, -inf }
 0x2dd   :  { %v15160_v44 = vpop.f32.mrb[10].mxu0 }
 0x2de   :  { %v15162_v45 = vpop.f32.mrb[6].mxu1  ;;  %v13342_v46 = vpop.f32.mrb[11].mxu0  ;;  %v2721_v47 = vsel %vm275_vm2, %v15160_v44, -inf }
 0x2df   :  { %2722 = vmax.xlane.f32.xlu0 %v2721_v47  ;;  %v13337_v48 = vpop.f32.mrb[7].mxu1  ;;  %v2718_v49 = vsel %vm275_vm2, %v15162_v45, -inf }
 0x2e0   :  { %2719 = vmax.xlane.f32.xlu1 %v2718_v49  ;;  %v15236_v48 = vpop.permute.xlu1 %4274 }
 0x2e1   :  { %17376 = vst [vmem:[#allocation14_spill] sm:$0xff] %v15236_v48 }
 0x2e2   :  { %v15168_v50 = vpop.f32.mrb[12].mxu0 }
 0x2e3   :  { %v15172_v53 = vpop.f32.mrb[8].mxu1  ;;  %v13352_v54 = vpop.f32.mrb[13].mxu0  ;;  %2716 = vmax.xlane.f32.xlu0 %v2715_v51  ;;  %v2727_v60 = vsel %vm275_vm2, %v15168_v50, -inf }
 0x2e4   :  { %v13347_v57 = vpop.f32.mrb[9].mxu1  ;;  %v2724_v58 = vsel %vm275_vm2, %v15172_v53, -inf }
 0x2e5   :  { %2725 = vmax.xlane.f32.xlu1 %v2724_v58 }
 0x2e7   :  { %2728 = vmax.xlane.f32.xlu0 %v2727_v60 }
 0x318   :  { %v15184_v0 = vpop.f32.mrb[14].mxu0 }
 0x319   :  { %v15186_v1 = vpop.f32.mrb[10].mxu1  ;;  %v13362_v2 = vpop.f32.mrb[15].mxu0  ;;  %v2733_v3 = vsel %vm275_vm2, %v15184_v0, -inf }
 0x31a   :  { %2734 = vmax.xlane.f32.xlu0 %v2733_v3  ;;  %v13357_v5 = vpop.f32.mrb[11].mxu1  ;;  %v2730_v6 = vsel %vm275_vm2, %v15186_v1, -inf  ;;  %v15246_v2 = vpop.permute.xlu0 %3894 }
 0x31b   :  { %2731 = vmax.xlane.f32.xlu1 %v2730_v6  ;;  %v15250_v6 = vpop.permute.xlu1 %4426 }
 0x31c   :  { %17377 = vst [vmem:[#allocation15_spill] sm:$0xff] %v15250_v6 }
 0x320   :  { %v15198_v15 = vpop.f32.mrb[16].mxu0 }
 0x321   :  { %v15200_v16 = vpop.f32.mrb[12].mxu1  ;;  %v13372_v17 = vpop.f32.mrb[17].mxu0  ;;  %v2739_v18 = vsel %vm275_vm2, %v15198_v15, -inf }
 0x322   :  { %2740 = vmax.xlane.f32.xlu0 %v2739_v18  ;;  %v13367_v20 = vpop.f32.mrb[13].mxu1  ;;  %v2736_v21 = vsel %vm275_vm2, %v15200_v16, -inf }
 0x323   :  { %2737 = vmax.xlane.f32.xlu1 %v2736_v21 }
 0x324   :  { %v15208_v22 = vpop.f32.mrb[18].mxu0 }
 0x325   :  { %v15210_v23 = vpop.f32.mrb[14].mxu1  ;;  %v13382_v24 = vpop.f32.mrb[19].mxu0  ;;  %v2745_v25 = vsel %vm275_vm2, %v15208_v22, -inf }
 0x326   :  { %2746 = vmax.xlane.f32.xlu0 %v2745_v25  ;;  %v13377_v27 = vpop.f32.mrb[15].mxu1  ;;  %v2742_v28 = vsel %vm275_vm2, %v15210_v23, -inf }
 0x327   :  { %2743 = vmax.xlane.f32.xlu1 %v2742_v28  ;;  %v15260_v27 = vpop.permute.xlu0 %4046 }
 0x328   :  { %v15220_v30 = vpop.f32.mrb[20].mxu0 }
 0x329   :  { %v15222_v32 = vpop.f32.mrb[16].mxu1  ;;  %v13392_v34 = vpop.f32.mrb[21].mxu0  ;;  %v2751_v35 = vsel %vm275_vm2, %v15220_v30, -inf }
 0x32a   :  { %2752 = vmax.xlane.f32.xlu0 %v2751_v35  ;;  %v13387_v37 = vpop.f32.mrb[17].mxu1  ;;  %v2748_v38 = vsel %vm275_vm2, %v15222_v32, -inf }
 0x32b   :  { %2749 = vmax.xlane.f32.xlu1 %v2748_v38  ;;  %v15268_v38 = vpop.permute.xlu1 %4578 }
 0x32c   :  { %v15230_v41 = vpop.f32.mrb[22].mxu0  ;;  %17378 = vst [vmem:[#allocation16_spill] sm:$0xff] %v15268_v38 }
 0x32d   :  { %v15232_v43 = vpop.f32.mrb[18].mxu1  ;;  %v13402_v46 = vpop.f32.mrb[23].mxu0  ;;  %v2757_v47 = vsel %vm275_vm2, %v15230_v41, -inf }
 0x32e   :  { %2758 = vmax.xlane.f32.xlu0 %v2757_v47  ;;  %v13397_v49 = vpop.f32.mrb[19].mxu1  ;;  %v2754_v51 = vsel %vm275_vm2, %v15232_v43, -inf }
 0x32f   :  { %2755 = vmax.xlane.f32.xlu1 %v2754_v51 }
 0x330   :  { %v15240_v54 = vpop.f32.mrb[24].mxu0 }
 0x331   :  { %v15242_v57 = vpop.f32.mrb[20].mxu1  ;;  %v13412_v58 = vpop.f32.mrb[25].mxu0  ;;  %v2763_v60 = vsel %vm275_vm2, %v15240_v54, -inf }
 0x332   :  { %2764 = vmax.xlane.f32.xlu0 %v2763_v60  ;;  %v13407_v3 = vpop.f32.mrb[21].mxu1  ;;  %v2760_v5 = vsel %vm275_vm2, %v15242_v57, -inf }
 0x333   :  { %2761 = vmax.xlane.f32.xlu1 %v2760_v5  ;;  %v15278_v3 = vpop.permute.xlu0 %4198 }
 0x334   :  { %v15252_v17 = vpop.f32.mrb[26].mxu0 }
 0x335   :  { %v15254_v18 = vpop.f32.mrb[22].mxu1  ;;  %v13422_v20 = vpop.f32.mrb[27].mxu0  ;;  %v2769_v21 = vsel %vm275_vm2, %v15252_v17, -inf }
 0x336   :  { %2770 = vmax.xlane.f32.xlu0 %v2769_v21  ;;  %v13417_v24 = vpop.f32.mrb[23].mxu1  ;;  %v2766_v25 = vsel %vm275_vm2, %v15254_v18, -inf  ;;  %v15282_v21 = vpop.permute.xlu1 %4654 }
 0x337   :  { %2767 = vmax.xlane.f32.xlu1 %v2766_v25  ;;  %17379 = vst [vmem:[#allocation17_spill] sm:$0xff] %v15282_v21 }
 0x338   :  { %v15262_v28 = vpop.f32.mrb[28].mxu0 }
 0x339   :  { %v15264_v34 = vpop.f32.mrb[24].mxu1  ;;  %v13432_v35 = vpop.f32.mrb[29].mxu0  ;;  %v2775_v37 = vsel %vm275_vm2, %v15262_v28, -inf }
 0x33a   :  { %2776 = vmax.xlane.f32.xlu0 %v2775_v37  ;;  %v13427_v46 = vpop.f32.mrb[25].mxu1  ;;  %v2772_v47 = vsel %vm275_vm2, %v15264_v34, -inf }
 0x33b   :  { %2773 = vmax.xlane.f32.xlu1 %v2772_v47 }
 0x33c   :  { %v15272_v49 = vpop.f32.mrb[30].mxu0 }
 0x33d   :  { %v15274_v51 = vpop.f32.mrb[26].mxu1  ;;  %v13442_v58 = vpop.f32.mrb[31].mxu0  ;;  %v2781_v60 = vsel %vm275_vm2, %v15272_v49, -inf }
 0x33e   :  { %2782 = vmax.xlane.f32.xlu0 %v2781_v60  ;;  %v13437_v5 = vpop.f32.mrb[27].mxu1  ;;  %v2778_v20 = vsel %vm275_vm2, %v15274_v51, -inf  ;;  %v15292_v58 = vpop.permute.xlu0 %4350 }
 0x33f   :  { %2779 = vmax.xlane.f32.xlu1 %v2778_v20  ;;  %17380 = vst [vmem:[#allocation18_spill] sm:$0xff] %v15292_v58 }
 0x340   :  { %v15284_v24 = vpop.f32.mrb[32].mxu0 }
 0x341   :  { %v15286_v25 = vpop.f32.mrb[28].mxu1  ;;  %v13452_v35 = vpop.f32.mrb[33].mxu0  ;;  %v2787_v37 = vsel %vm275_vm2, %v15284_v24, -inf }
 0x342   :  { %2788 = vmax.xlane.f32.xlu0 %v2787_v37  ;;  %v13447_v46 = vpop.f32.mrb[29].mxu1  ;;  %v2784_v47 = vsel %vm275_vm2, %v15286_v25, -inf  ;;  %v15302_v37 = vpop.permute.xlu1 %4806 }
 0x343   :  { %2785 = vmax.xlane.f32.xlu1 %v2784_v47  ;;  %17381 = vst [vmem:[#allocation19_spill] sm:$0xff] %v15302_v37  ;;  %v15306_v47 = vpop.permute.xlu0 %4502 }
 0x344   :  { %17382 = vst [vmem:[#allocation20_spill] sm:$0xff] %v15306_v47 }
 0x345   :  { %v15294_v60 = vpop.f32.mrb[30].mxu1  ;;  %v15296_v5 = vpop.f32.mrb[34].mxu0 }
 0x346   :  { %v13457_v20 = vpop.f32.mrb[31].mxu1  ;;  %v13462_v31 = vpop.f32.mrb[35].mxu0  ;;  %v2793_v35 = vsel %vm275_vm2, %v15296_v5, -inf  ;;  %v2790_v12 = vsel %vm275_vm2, %v15294_v60, -inf }
 0x347   :  { %2794 = vmax.xlane.f32.xlu0 %v2793_v35  ;;  %2791 = vmax.xlane.f32.xlu1 %v2790_v12  ;;  %v15308_v11 = vpop.permute.xlu1 %4958  ;;  %v15312_v20 = vpop.permute.xlu0 %4882 }
 0x348   :  { %17383 = vst [vmem:[#allocation21_spill] sm:$0xff] %v15308_v11  ;;  %17384 = vst [vmem:[#allocation22_spill] sm:$0xff] %v15312_v20 }
 0x349   :  { %v15304_v46 = vpop.f32.mrb[32].mxu1 }
 0x34a   :  { %v13467_v13 = vpop.f32.mrb[33].mxu1 }
 0x34b   :  { %v15314_v10 = vpop.permute.xlu1 %5110  ;;  %v15316_v8 = vpop.permute.xlu0 %5034 }
 0x34c   :  { %17385 = vst [vmem:[#allocation23_spill] sm:$0xff] %v15314_v10  ;;  %17386 = vst [vmem:[#allocation24_spill] sm:$0xff] %v15316_v8 }
 0x34e   :  { %v15310_v9 = vpop.f32.mrb[36].mxu0 }
 0x34f   :  { %v13472_v31 = vpop.f32.mrb[37].mxu0  ;;  %v15318_v38 = vpop.permute.xlu1 %4122 }
 0x350   :  { %v15320_v35 = vpop.permute.xlu0 %4730 }
 0x351   :  { %17387 = vst [vmem:[#allocation25_spill] sm:$0xff] %v15320_v35 }
 0x35d   :  { %v2711_v12 = vpop.xlane.xlu1 %2710 }
 0x35e   :  { %v2803_v37 = vsub.f32 %v15146_v33, %v2711_v12  ;;  %v2799_v33 = vsel %vm275_vm2, %v15310_v9, -inf }
 0x360   :  { %v2836_v21 = vmul.f32 1.442695, %v2803_v37  ;;  %v2708_v13 = vpop.xlane.xlu0 %2707 }
 0x361   :  { %v2802_v11 = vsub.f32 %v15150_v36, %v2708_v13 }
 0x362   :  { %14202 = vpow2.f32 %v2836_v21 }
 0x363   :  { %v2834_v6 = vmul.f32 1.442695, %v2802_v11  ;;  %v2796_v11 = vsel %vm275_vm2, %v15304_v46, -inf }
 0x365   :  { %14204 = vpow2.f32 %v2834_v6  ;;  %v2714_v36 = vpop.xlane.xlu0 %2713 }
 0x36c   :  { %v15324_v31 = vpop.eup %14202 }
 0x36d   :  { %v2901_v10 = vsel %vm275_vm2, %v15324_v31, 0.0  ;;  %v2720_v37 = vpop.xlane.xlu1 %2719 }
 0x36e   :  { %2902 = vadd.xlane.f32.xlu0 %v2901_v10  ;;  %v2723_v10 = vpop.xlane.xlu0 %2722 }
 0x36f   :  { %v15328_v8 = vpop.eup %14204  ;;  %v2807_v21 = vsub.f32 %v15160_v44, %v2723_v10 }
 0x370   :  { %v2898_v20 = vsel %vm275_vm2, %v15328_v8, 0.0 }
 0x371   :  { %2899 = vadd.xlane.f32.xlu1 %v2898_v20  ;;  %v2804_v20 = vsub.f32 %v15154_v39, %v2714_v36  ;;  %v2844_v12 = vmul.f32 1.442695, %v2807_v21 }
 0x372   :  { %2800 = vmax.xlane.f32.xlu0 %v2799_v33  ;;  %v2717_v6 = vpop.xlane.xlu0 %2716 }
 0x373   :  { %v2805_v13 = vsub.f32 %v15158_v42, %v2717_v6  ;;  %v2838_v35 = vmul.f32 1.442695, %v2804_v20  ;;  %14206 = vpow2.f32 %v2844_v12 }
 0x375   :  { %2797 = vmax.xlane.f32.xlu1 %v2796_v11  ;;  %v2806_v11 = vsub.f32 %v15162_v45, %v2720_v37  ;;  %v2840_v47 = vmul.f32 1.442695, %v2805_v13  ;;  %14208 = vpow2.f32 %v2838_v35 }
 0x376   :  { %v2729_v33 = vpop.xlane.xlu0 %2728 }
 0x377   :  { %v2809_v48 = vsub.f32 %v15168_v50, %v2729_v33  ;;  %14210 = vpow2.f32 %v2840_v47 }
 0x379   :  { %v2848_v44 = vmul.f32 1.442695, %v2809_v48 }
 0x37d   :  { %v15346_v36 = vpop.eup %14206 }
 0x37e   :  { %v2913_v45 = vsel %vm275_vm2, %v15346_v36, 0.0 }
 0x37f   :  { %v15348_v42 = vpop.eup %14208 }
 0x381   :  { %v15352_v10 = vpop.eup %14210 }
 0x382   :  { %v2907_v21 = vsel %vm275_vm2, %v15352_v10, 0.0 }
 0x386   :  { %5262 = vrot.lane.b32.xlu1 %v14887_v55, %s14575_s29  ;;  %v2726_v55 = vpop.xlane.xlu1 %2725 }
 0x387   :  { %v2808_v58 = vsub.f32 %v15172_v53, %v2726_v55 }
 0x388   :  { %5186 = vrot.lane.b32.xlu0 %v14876_v52, %s14575_s29  ;;  %v2842_v52 = vmul.f32 1.442695, %v2806_v11 }
 0x389   :  { %v2846_v39 = vmul.f32 1.442695, %v2808_v58  ;;  %v2904_v58 = vsel %vm275_vm2, %v15348_v42, 0.0 }
 0x38a   :  { %14212 = vpow2.f32 %v2842_v52 }
 0x38b   :  { %14214 = vpow2.f32 %v2848_v44 }
 0x38c   :  { %14216 = vpow2.f32 %v2846_v39 }
 0x394   :  { %v15358_v47 = vpop.eup %14212 }
 0x395   :  { %v15362_v37 = vpop.eup %14214 }
 0x396   :  { %v2919_v12 = vsel %vm275_vm2, %v15362_v37, 0.0 }
 0x3a7   :  { %2914 = vadd.xlane.f32.xlu0 %v2913_v45  ;;  %v2735_v50 = vpop.xlane.xlu0 %2734 }
 0x3a8   :  { %v2811_v35 = vsub.f32 %v15184_v0, %v2735_v50  ;;  %v2732_v53 = vpop.xlane.xlu1 %2731  ;;  %v2910_v0 = vsel %vm275_vm2, %v15358_v47, 0.0 }
 0x3a9   :  { %v2810_v48 = vsub.f32 %v15186_v1, %v2732_v53  ;;  %v15366_v1 = vpop.eup %14216 }
 0x3aa   :  { %v2852_v6 = vmul.f32 1.442695, %v2811_v35  ;;  %2905 = vadd.xlane.f32.xlu1 %v2904_v58  ;;  %v2916_v52 = vsel %vm275_vm2, %v15366_v1, 0.0 }
 0x3ab   :  { %v2850_v20 = vmul.f32 1.442695, %v2810_v48  ;;  %2908 = vadd.xlane.f32.xlu0 %v2907_v21 }
 0x3ac   :  { %14218 = vpow2.f32 %v2852_v6 }
 0x3ad   :  { %14220 = vpow2.f32 %v2850_v20 }
 0x3ae   :  { %2911 = vadd.xlane.f32.xlu1 %v2910_v0 }
 0x3af   :  { %2920 = vadd.xlane.f32.xlu0 %v2919_v12  ;;  %v2741_v13 = vpop.xlane.xlu0 %2740 }
 0x3b0   :  { %v2813_v33 = vsub.f32 %v15198_v15, %v2741_v13  ;;  %v2738_v11 = vpop.xlane.xlu1 %2737 }
 0x3b1   :  { %v2812_v55 = vsub.f32 %v15200_v16, %v2738_v11 }
 0x3b2   :  { %v2856_v44 = vmul.f32 1.442695, %v2813_v33  ;;  %2917 = vadd.xlane.f32.xlu1 %v2916_v52 }
 0x3b3   :  { %v2854_v39 = vmul.f32 1.442695, %v2812_v55  ;;  %v2747_v45 = vpop.xlane.xlu0 %2746 }
 0x3b4   :  { %14222 = vpow2.f32 %v2856_v44  ;;  %v2815_v50 = vsub.f32 %v15208_v22, %v2747_v45  ;;  %v2744_v35 = vpop.xlane.xlu1 %2743 }
 0x3b5   :  { %14224 = vpow2.f32 %v2854_v39  ;;  %v2814_v53 = vsub.f32 %v15210_v23, %v2744_v35 }
 0x3b6   :  { %v15376_v48 = vpop.eup %14218  ;;  %v2860_v15 = vmul.f32 1.442695, %v2815_v50 }
 0x3b7   :  { %v15378_v58 = vpop.eup %14220  ;;  %v2858_v16 = vmul.f32 1.442695, %v2814_v53  ;;  %v2753_v6 = vpop.xlane.xlu0 %2752  ;;  %v2925_v21 = vsel %vm275_vm2, %v15376_v48, 0.0 }
 0x3b8   :  { %14226 = vpow2.f32 %v2860_v15  ;;  %v2817_v20 = vsub.f32 %v15220_v30, %v2753_v6  ;;  %v2750_v0 = vpop.xlane.xlu1 %2749  ;;  %2926 = vadd.xlane.f32.xlu0 %v2925_v21  ;;  %v2922_v22 = vsel %vm275_vm2, %v15378_v58, 0.0 }
 0x3b9   :  { %14228 = vpow2.f32 %v2858_v16  ;;  %v2816_v23 = vsub.f32 %v15222_v32, %v2750_v0  ;;  %2923 = vadd.xlane.f32.xlu1 %v2922_v22 }
 0x3ba   :  { %v2864_v12 = vmul.f32 1.442695, %v2817_v20 }
 0x3bb   :  { %v2862_v13 = vmul.f32 1.442695, %v2816_v23  ;;  %v2759_v33 = vpop.xlane.xlu0 %2758 }
 0x3bc   :  { %14230 = vpow2.f32 %v2864_v12  ;;  %v2819_v11 = vsub.f32 %v15230_v41, %v2759_v33  ;;  %v2756_v55 = vpop.xlane.xlu1 %2755 }
 0x3bd   :  { %14232 = vpow2.f32 %v2862_v13  ;;  %v2818_v52 = vsub.f32 %v15232_v43, %v2756_v55 }
 0x3be   :  { %v15388_v30 = vpop.eup %14222  ;;  %v2868_v44 = vmul.f32 1.442695, %v2819_v11 }
 0x3bf   :  { %v15390_v39 = vpop.eup %14224  ;;  %v2866_v45 = vmul.f32 1.442695, %v2818_v52  ;;  %v2765_v50 = vpop.xlane.xlu0 %2764  ;;  %v2931_v32 = vsel %vm275_vm2, %v15388_v30, 0.0 }
 0x3c0   :  { %14234 = vpow2.f32 %v2868_v44  ;;  %v2821_v35 = vsub.f32 %v15240_v54, %v2765_v50  ;;  %v2762_v53 = vpop.xlane.xlu1 %2761  ;;  %2932 = vadd.xlane.f32.xlu0 %v2931_v32  ;;  %v2928_v41 = vsel %vm275_vm2, %v15390_v39, 0.0 }
 0x3c1   :  { %14236 = vpow2.f32 %v2866_v45  ;;  %v2820_v43 = vsub.f32 %v15242_v57, %v2762_v53  ;;  %2929 = vadd.xlane.f32.xlu1 %v2928_v41 }
 0x3c2   :  { %v15398_v15 = vpop.eup %14226  ;;  %v2872_v16 = vmul.f32 1.442695, %v2821_v35 }
 0x3c3   :  { %v15400_v6 = vpop.eup %14228  ;;  %v2870_v21 = vmul.f32 1.442695, %v2820_v43  ;;  %v2771_v20 = vpop.xlane.xlu0 %2770  ;;  %v2937_v0 = vsel %vm275_vm2, %v15398_v15, 0.0 }
 0x3c4   :  { %14238 = vpow2.f32 %v2872_v16  ;;  %v2823_v54 = vsub.f32 %v15252_v17, %v2771_v20  ;;  %v2768_v22 = vpop.xlane.xlu1 %2767  ;;  %2938 = vadd.xlane.f32.xlu0 %v2937_v0  ;;  %v2934_v23 = vsel %vm275_vm2, %v15400_v6, 0.0 }
 0x3c5   :  { %14240 = vpow2.f32 %v2870_v21  ;;  %v2822_v57 = vsub.f32 %v15254_v18, %v2768_v22  ;;  %2935 = vadd.xlane.f32.xlu1 %v2934_v23 }
 0x3c6   :  { %v15408_v12 = vpop.eup %14230  ;;  %v2876_v13 = vmul.f32 1.442695, %v2823_v54 }
 0x3c7   :  { %v15410_v33 = vpop.eup %14232  ;;  %v2874_v11 = vmul.f32 1.442695, %v2822_v57  ;;  %v2777_v55 = vpop.xlane.xlu0 %2776  ;;  %v2943_v52 = vsel %vm275_vm2, %v15408_v12, 0.0 }
 0x3c8   :  { %14242 = vpow2.f32 %v2876_v13  ;;  %v2825_v17 = vsub.f32 %v15262_v28, %v2777_v55  ;;  %v2774_v44 = vpop.xlane.xlu1 %2773  ;;  %2944 = vadd.xlane.f32.xlu0 %v2943_v52  ;;  %v2940_v45 = vsel %vm275_vm2, %v15410_v33, 0.0 }
 0x3c9   :  { %14244 = vpow2.f32 %v2874_v11  ;;  %v2824_v18 = vsub.f32 %v15264_v34, %v2774_v44  ;;  %2941 = vadd.xlane.f32.xlu1 %v2940_v45 }
 0x3ca   :  { %v15418_v50 = vpop.eup %14234  ;;  %v2880_v32 = vmul.f32 1.442695, %v2825_v17 }
 0x3cb   :  { %v15420_v35 = vpop.eup %14236  ;;  %v2878_v53 = vmul.f32 1.442695, %v2824_v18  ;;  %v2783_v41 = vpop.xlane.xlu0 %2782  ;;  %v2949_v43 = vsel %vm275_vm2, %v15418_v50, 0.0 }
 0x3cc   :  { %14246 = vpow2.f32 %v2880_v32  ;;  %v2827_v28 = vsub.f32 %v15272_v49, %v2783_v41  ;;  %v2780_v16 = vpop.xlane.xlu1 %2779  ;;  %2950 = vadd.xlane.f32.xlu0 %v2949_v43  ;;  %v2946_v21 = vsel %vm275_vm2, %v15420_v35, 0.0 }
 0x3cd   :  { %14248 = vpow2.f32 %v2878_v53  ;;  %v2826_v34 = vsub.f32 %v15274_v51, %v2780_v16  ;;  %2947 = vadd.xlane.f32.xlu1 %v2946_v21 }
 0x3ce   :  { %v15428_v20 = vpop.eup %14238  ;;  %v2884_v0 = vmul.f32 1.442695, %v2827_v28 }
 0x3cf   :  { %v15430_v54 = vpop.eup %14240  ;;  %v2882_v22 = vmul.f32 1.442695, %v2826_v34  ;;  %v2789_v23 = vpop.xlane.xlu0 %2788  ;;  %v2955_v57 = vsel %vm275_vm2, %v15428_v20, 0.0 }
 0x3d0   :  { %14250 = vpow2.f32 %v2884_v0  ;;  %v2829_v49 = vsub.f32 %v15284_v24, %v2789_v23  ;;  %v2786_v13 = vpop.xlane.xlu1 %2785  ;;  %2956 = vadd.xlane.f32.xlu0 %v2955_v57  ;;  %v2952_v11 = vsel %vm275_vm2, %v15430_v54, 0.0 }
 0x3d1   :  { %14252 = vpow2.f32 %v2882_v22  ;;  %v2828_v51 = vsub.f32 %v15286_v25, %v2786_v13  ;;  %2953 = vadd.xlane.f32.xlu1 %v2952_v11 }
 0x3d2   :  { %v15438_v55 = vpop.eup %14242  ;;  %v2888_v52 = vmul.f32 1.442695, %v2829_v49 }
 0x3d3   :  { %v15440_v17 = vpop.eup %14244  ;;  %v2886_v44 = vmul.f32 1.442695, %v2828_v51  ;;  %v2961_v45 = vsel %vm275_vm2, %v15438_v55, 0.0 }
 0x3d4   :  { %14254 = vpow2.f32 %v2888_v52  ;;  %v2792_v24 = vpop.xlane.xlu1 %2791  ;;  %2962 = vadd.xlane.f32.xlu0 %v2961_v45  ;;  %v2795_v18 = vpop.xlane.xlu0 %2794  ;;  %v2958_v32 = vsel %vm275_vm2, %v15440_v17, 0.0 }
 0x3d5   :  { %14256 = vpow2.f32 %v2886_v44  ;;  %v2830_v25 = vsub.f32 %v15294_v60, %v2792_v24  ;;  %v2831_v53 = vsub.f32 %v15296_v5, %v2795_v18  ;;  %2959 = vadd.xlane.f32.xlu1 %v2958_v32 }
 0x3d6   :  { %v15448_v41 = vpop.eup %14246 }
 0x3d7   :  { %v15450_v43 = vpop.eup %14248  ;;  %v2890_v28 = vmul.f32 1.442695, %v2830_v25  ;;  %v2892_v16 = vmul.f32 1.442695, %v2831_v53  ;;  %v2967_v21 = vsel %vm275_vm2, %v15448_v41, 0.0 }
 0x3d8   :  { %2968 = vadd.xlane.f32.xlu0 %v2967_v21  ;;  %v2964_v34 = vsel %vm275_vm2, %v15450_v43, 0.0 }
 0x3d9   :  { %14258 = vpow2.f32 %v2890_v28  ;;  %2965 = vadd.xlane.f32.xlu1 %v2964_v34 }
 0x3da   :  { %v15456_v0 = vpop.eup %14250  ;;  %14260 = vpow2.f32 %v2892_v16 }
 0x3db   :  { %v15458_v60 = vpop.eup %14252  ;;  %v2973_v5 = vsel %vm275_vm2, %v15456_v0, 0.0 }
 0x3dc   :  { %2974 = vadd.xlane.f32.xlu0 %v2973_v5  ;;  %v2970_v22 = vsel %vm275_vm2, %v15458_v60, 0.0 }
 0x3dd   :  { %2971 = vadd.xlane.f32.xlu1 %v2970_v22 }
 0x3de   :  { %v15464_v23 = vpop.eup %14254 }
 0x3df   :  { %v15466_v57 = vpop.eup %14256  ;;  %v2979_v49 = vsel %vm275_vm2, %v15464_v23, 0.0 }
 0x3e0   :  { %2980 = vadd.xlane.f32.xlu0 %v2979_v49  ;;  %v2976_v13 = vsel %vm275_vm2, %v15466_v57, 0.0  ;;  %v17388_v49 = vmov 0.0  }
 0x3e1   :  { %2977 = vadd.xlane.f32.xlu1 %v2976_v13 }
 0x3e3   :  { %v15472_v11 = vpop.eup %14258 }
 0x3e4   :  { %v15474_v51 = vpop.eup %14260  ;;  %v2982_v52 = vsel %vm275_vm2, %v15472_v11, 0.0 }
 0x3e5   :  { %2983 = vadd.xlane.f32.xlu1 %v2982_v52  ;;  %v2985_v44 = vsel %vm275_vm2, %v15474_v51, 0.0 }
 0x3e6   :  { %2986 = vadd.xlane.f32.xlu0 %v2985_v44 }
 0x3fb   :  { %v2903_v45 = vpop.xlane.xlu0 %2902 }
 0x3fc   :  { %14262 = vrcp.f32 %v2903_v45 }
 0x3fe   :  { %v2900_v24 = vpop.xlane.xlu1 %2899 }
 0x3ff   :  { %14264 = vrcp.f32 %v2900_v24  ;;  %v2801_v18 = vpop.xlane.xlu0 %2800 }
 0x400   :  { %v2833_v32 = vsub.f32 %v15310_v9, %v2801_v18 }
 0x402   :  { %v2896_v25 = vmul.f32 1.442695, %v2833_v32  ;;  %v2798_v53 = vpop.xlane.xlu1 %2797 }
 0x403   :  { %v2832_v28 = vsub.f32 %v15304_v46, %v2798_v53 }
 0x404   :  { %14266 = vpow2.f32 %v2896_v25 }
 0x405   :  { %v2894_v16 = vmul.f32 1.442695, %v2832_v28 }
 0x406   :  { %v14263_v21 = vpop.eup %14262 }
 0x407   :  { %14268 = vpow2.f32 %v2894_v16  ;;  %v3027_v34 = vmul.f32 %v14263_v21, %v15324_v31  ;;  %v15508_v31 = vpop.permute.xlu1 %5262 }
 0x409   :  { %v14265_v5 = vpop.eup %14264  ;;  %13481 = vmatmul.mubr.msk.f32.vlgmr.msra.gmra.mrb[38].mxu0 %vm275_vm2, %v3027_v34 }
 0x40a   :  { %13489 = vmatpush3.msra.mxu0 %v15190_v4  ;;  %v3026_v22 = vmul.f32 %v14265_v5, %v15328_v8  ;;  %13490 = vmatprep.mubr.msk.f32.mxu0 %vm14580_vm1, %v17388_v49 }
 0x40b   :  { %13498 = vmatprep.subr.mxu0 %v17388_v49 }
 0x40c   :  { %13476 = vmatmul.mubr.msk.f32.vlgmr.msra.gmra.mrb[34].mxu1 %vm275_vm2, %v3026_v22 }
 0x40d   :  { %13484 = vmatpush3.msra.mxu1 %v15178_v61  ;;  %13485 = vmatprep.mubr.msk.f32.mxu1 %vm14580_vm1, %v17388_v49  ;;  %v15506_v61 = vpop.permute.xlu0 %5186 }
 0x40e   :  { %v15493_v9 = vpop.eup %14266  ;;  %13493 = vmatprep.subr.mxu1 %v17388_v49 }
 0x40f   :  { %v2991_v4 = vsel %vm275_vm2, %v15493_v9, 0.0 }
 0x410   :  { %2992 = vadd.xlane.f32.xlu0 %v2991_v4 }
 0x411   :  { %v15498_v8 = vpop.eup %14268 }
 0x412   :  { %v2988_v46 = vsel %vm275_vm2, %v15498_v8, 0.0 }
 0x413   :  { %2989 = vadd.xlane.f32.xlu1 %v2988_v46 }
 0x424   :  { %5414 = vrot.lane.b32.xlu1 %v14908_v59, %s14575_s29 }
 0x426   :  { %5338 = vrot.lane.b32.xlu0 %v14898_v56, %s14575_s29 }
 0x434   :  { %v2915_v13 = vpop.xlane.xlu0 %2914 }
 0x437   :  { %v2906_v52 = vpop.xlane.xlu1 %2905 }
 0x438   :  { %14270 = vrcp.f32 %v2906_v52  ;;  %v2909_v44 = vpop.xlane.xlu0 %2908 }
 0x439   :  { %14272 = vrcp.f32 %v2909_v44 }
 0x43a   :  { %14274 = vrcp.f32 %v2915_v13 }
 0x43b   :  { %v2912_v45 = vpop.xlane.xlu1 %2911 }
 0x43c   :  { %14276 = vrcp.f32 %v2912_v45  ;;  %v2921_v24 = vpop.xlane.xlu0 %2920 }
 0x43d   :  { %14278 = vrcp.f32 %v2921_v24 }
 0x43f   :  { %v2918_v18 = vpop.xlane.xlu1 %2917 }
 0x440   :  { %14280 = vrcp.f32 %v2918_v18 }
 0x442   :  { %v14271_v59 = vpop.eup %14270 }
 0x443   :  { %v14273_v32 = vpop.eup %14272  ;;  %v3028_v56 = vmul.f32 %v14271_v59, %v15348_v42  ;;  %v17389_v59 = vld [vmem:[#allocation18_spill] sm:$0xff] }
 0x444   :  { %v3029_v25 = vmul.f32 %v14273_v32, %v15352_v10  ;;  %v14275_v53 = vpop.eup %14274  ;;  %v17390_v32 = vld [vmem:[#allocation14_spill] sm:$0xff] }
 0x445   :  { %13486 = vmatmul.mubr.msk.f32.vlgmr.msra.gmra.mrb[36].mxu1 %vm275_vm2, %v3028_v56  ;;  %v2927_v28 = vpop.xlane.xlu0 %2926  ;;  %v3031_v10 = vmul.f32 %v14275_v53, %v15346_v36 }
 0x446   :  { %v14277_v16 = vpop.eup %14276  ;;  %13494 = vmatpush3.msra.mxu1 %v15180_v62  ;;  %14282 = vrcp.f32 %v2927_v28  ;;  %v2924_v21 = vpop.xlane.xlu1 %2923  ;;  %13491 = vmatmul.mubr.msk.f32.vlgmr.msra.gmra.mrb[40].mxu0 %vm275_vm2, %v3029_v25 }
 0x447   :  { %14284 = vrcp.f32 %v2924_v21  ;;  %13499 = vmatpush3.msra.mxu0 %v15196_v14  ;;  %13495 = vmatprep.mubr.msk.f32.mxu1 %vm14580_vm1, %v17388_v49  ;;  %v3030_v42 = vmul.f32 %v14277_v16, %v15358_v47  ;;  %v14279_v62 = vpop.eup %14278  ;;  %v17391_v16 = vld [vmem:[#allocation20_spill] sm:$0xff]  ;;  %v17392_v21 = vld [vmem:[#allocation15_spill] sm:$0xff] }
 0x448   :  { %13503 = vmatprep.subr.mxu1 %v17388_v49  ;;  %13500 = vmatprep.mubr.msk.f32.mxu0 %vm14580_vm1, %v17388_v49  ;;  %v3033_v36 = vmul.f32 %v14279_v62, %v15362_v37 }
 0x449   :  { %13496 = vmatmul.mubr.msk.f32.vlgmr.msra.gmra.mrb[38].mxu1 %vm275_vm2, %v3030_v42  ;;  %13508 = vmatprep.subr.mxu0 %v17388_v49 }
 0x44a   :  { %v14281_v34 = vpop.eup %14280  ;;  %13504 = vmatpush3.msra.mxu1 %v15182_v63  ;;  %13501 = vmatmul.mubr.msk.f32.vlgmr.msra.gmra.mrb[42].mxu0 %vm275_vm2, %v3031_v10 }
 0x44b   :  { %13509 = vmatpush3.msra.mxu0 %v15214_v26  ;;  %13505 = vmatprep.mubr.msk.f32.mxu1 %vm14580_vm1, %v17388_v49  ;;  %v3032_v14 = vmul.f32 %v14281_v34, %v15366_v1 }
 0x44c   :  { %13513 = vmatprep.subr.mxu1 %v17388_v49  ;;  %13510 = vmatprep.mubr.msk.f32.mxu0 %vm14580_vm1, %v17388_v49 }
 0x44d   :  { %13506 = vmatmul.mubr.msk.f32.vlgmr.msra.gmra.mrb[40].mxu1 %vm275_vm2, %v3032_v14  ;;  %13518 = vmatprep.subr.mxu0 %v17388_v49  ;;  %v2933_v63 = vpop.xlane.xlu0 %2932  ;;  %v17393_v14 = vld [vmem:[#allocation17_spill] sm:$0xff] }
 0x44e   :  { %13514 = vmatpush3.msra.mxu1 %v15194_v7  ;;  %14286 = vrcp.f32 %v2933_v63  ;;  %v2930_v26 = vpop.xlane.xlu1 %2929  ;;  %13511 = vmatmul.mubr.msk.f32.vlgmr.msra.gmra.mrb[44].mxu0 %vm275_vm2, %v3033_v36  ;;  %v17394_v36 = vld [vmem:[#allocation16_spill] sm:$0xff] }
 0x44f   :  { %14288 = vrcp.f32 %v2930_v26  ;;  %13519 = vmatpush3.msra.mxu0 %v15228_v40  ;;  %13520 = vmatprep.mubr.msk.f32.mxu0 %vm14580_vm1, %v17388_v49 }
 0x450   :  { %v14283_v47 = vpop.eup %14282  ;;  %13528 = vmatprep.subr.mxu0 %v17388_v49  ;;  %13515 = vmatprep.mubr.msk.f32.mxu1 %vm14580_vm1, %v17388_v49 }
 0x451   :  { %v14285_v37 = vpop.eup %14284  ;;  %v2939_v1 = vpop.xlane.xlu0 %2938  ;;  %v3035_v7 = vmul.f32 %v14283_v47, %v15376_v48  ;;  %13523 = vmatprep.subr.mxu1 %v17388_v49 }
 0x452   :  { %14290 = vrcp.f32 %v2939_v1  ;;  %v2936_v5 = vpop.xlane.xlu1 %2935  ;;  %v3034_v22 = vmul.f32 %v14285_v37, %v15378_v58  ;;  %v17395_v1 = vld [vmem:[#allocation19_spill] sm:$0xff] }
 0x453   :  { %14292 = vrcp.f32 %v2936_v5  ;;  %13521 = vmatmul.mubr.msk.f32.vlgmr.msra.gmra.mrb[46].mxu0 %vm275_vm2, %v3035_v7  ;;  %v17396_v7 = vld [vmem:[#allocation25_spill] sm:$0xff] }
 0x454   :  { %13529 = vmatpush3.msra.mxu0 %v15246_v2  ;;  %13516 = vmatmul.mubr.msk.f32.vlgmr.msra.gmra.mrb[42].mxu1 %vm275_vm2, %v3034_v22 }
 0x455   :  { %13524 = vmatpush3.msra.mxu1 %v15204_v19  ;;  %v2945_v40 = vpop.xlane.xlu0 %2944  ;;  %13530 = vmatprep.mubr.msk.f32.mxu0 %vm14580_vm1, %v17388_v49 }
 0x456   :  { %14294 = vrcp.f32 %v2945_v40  ;;  %v2942_v48 = vpop.xlane.xlu1 %2941  ;;  %13538 = vmatprep.subr.mxu0 %v17388_v49  ;;  %13525 = vmatprep.mubr.msk.f32.mxu1 %vm14580_vm1, %v17388_v49 }
 0x457   :  { %14296 = vrcp.f32 %v2942_v48  ;;  %13533 = vmatprep.subr.mxu1 %v17388_v49 }
 0x458   :  { %v14287_v58 = vpop.eup %14286 }
 0x459   :  { %v14289_v2 = vpop.eup %14288  ;;  %v2951_v4 = vpop.xlane.xlu0 %2950  ;;  %v3037_v46 = vmul.f32 %v14287_v58, %v15388_v30  ;;  %v17397_v58 = vld [vmem:[#allocation21_spill] sm:$0xff] }
 0x45a   :  { %14298 = vrcp.f32 %v2951_v4  ;;  %v2948_v19 = vpop.xlane.xlu1 %2947  ;;  %v3036_v13 = vmul.f32 %v14289_v2, %v15390_v39  ;;  %v17398_v2 = vld [vmem:[#allocation22_spill] sm:$0xff] }
 0x45b   :  { %14300 = vrcp.f32 %v2948_v19  ;;  %13531 = vmatmul.mubr.msk.f32.vlgmr.msra.gmra.mrb[48].mxu0 %vm275_vm2, %v3037_v46  ;;  %v17399_v19 = vld [vmem:[#allocation23_spill] sm:$0xff] }
 0x45c   :  { %v14291_v52 = vpop.eup %14290  ;;  %13539 = vmatpush3.msra.mxu0 %v15260_v27  ;;  %13526 = vmatmul.mubr.msk.f32.vlgmr.msra.gmra.mrb[44].mxu1 %vm275_vm2, %v3036_v13 }
 0x45d   :  { %v14293_v44 = vpop.eup %14292  ;;  %13534 = vmatpush3.msra.mxu1 %v15218_v29  ;;  %v2957_v45 = vpop.xlane.xlu0 %2956  ;;  %13540 = vmatprep.mubr.msk.f32.mxu0 %vm14580_vm1, %v17388_v49  ;;  %v3039_v30 = vmul.f32 %v14291_v52, %v15398_v15  ;;  %v17400_v52 = vld [vmem:[#allocation24_spill] sm:$0xff] }
 0x45e   :  { %14302 = vrcp.f32 %v2957_v45  ;;  %v2954_v24 = vpop.xlane.xlu1 %2953  ;;  %13548 = vmatprep.subr.mxu0 %v17388_v49  ;;  %13535 = vmatprep.mubr.msk.f32.mxu1 %vm14580_vm1, %v17388_v49  ;;  %v3038_v27 = vmul.f32 %v14293_v44, %v15400_v6 }
 0x45f   :  { %14304 = vrcp.f32 %v2954_v24  ;;  %13541 = vmatmul.mubr.msk.f32.vlgmr.msra.gmra.mrb[50].mxu0 %vm275_vm2, %v3039_v30  ;;  %13543 = vmatprep.subr.mxu1 %v17388_v49 }
 0x460   :  { %v14295_v29 = vpop.eup %14294  ;;  %13549 = vmatpush3.msra.mxu0 %v15278_v3  ;;  %13536 = vmatmul.mubr.msk.f32.vlgmr.msra.gmra.mrb[46].mxu1 %vm275_vm2, %v3038_v27 }
 0x461   :  { %v14297_v39 = vpop.eup %14296  ;;  %13544 = vmatpush3.msra.mxu1 %v15318_v38  ;;  %v2963_v15 = vpop.xlane.xlu0 %2962  ;;  %13550 = vmatprep.mubr.msk.f32.mxu0 %vm14580_vm1, %v17388_v49  ;;  %v3041_v18 = vmul.f32 %v14295_v29, %v15408_v12 }
 0x462   :  { %14306 = vrcp.f32 %v2963_v15  ;;  %v2960_v6 = vpop.xlane.xlu1 %2959  ;;  %13558 = vmatprep.subr.mxu0 %v17388_v49  ;;  %13545 = vmatprep.mubr.msk.f32.mxu1 %vm14580_vm1, %v17388_v49  ;;  %v3040_v3 = vmul.f32 %v14297_v39, %v15410_v33 }
 0x463   :  { %14308 = vrcp.f32 %v2960_v6  ;;  %13551 = vmatmul.mubr.msk.f32.vlgmr.msra.gmra.mrb[52].mxu0 %vm275_vm2, %v3041_v18  ;;  %13553 = vmatprep.subr.mxu1 %v17388_v49 }
 0x464   :  { %v14299_v38 = vpop.eup %14298  ;;  %13559 = vmatpush3.msra.mxu0 %v17389_v59  ;;  %13546 = vmatmul.mubr.msk.f32.vlgmr.msra.gmra.mrb[48].mxu1 %vm275_vm2, %v3040_v3 }
 0x465   :  { %v14301_v12 = vpop.eup %14300  ;;  %13554 = vmatpush3.msra.mxu1 %v17390_v32  ;;  %v2969_v56 = vpop.xlane.xlu0 %2968  ;;  %13560 = vmatprep.mubr.msk.f32.mxu0 %vm14580_vm1, %v17388_v49  ;;  %v3043_v25 = vmul.f32 %v14299_v38, %v15418_v50 }
 0x466   :  { %14310 = vrcp.f32 %v2969_v56  ;;  %v2966_v33 = vpop.xlane.xlu1 %2965  ;;  %13568 = vmatprep.subr.mxu0 %v17388_v49  ;;  %13555 = vmatprep.mubr.msk.f32.mxu1 %vm14580_vm1, %v17388_v49  ;;  %v3042_v53 = vmul.f32 %v14301_v12, %v15420_v35 }
 0x467   :  { %14312 = vrcp.f32 %v2966_v33  ;;  %13561 = vmatmul.mubr.msk.f32.vlgmr.msra.gmra.mrb[54].mxu0 %vm275_vm2, %v3043_v25  ;;  %13563 = vmatprep.subr.mxu1 %v17388_v49 }
 0x468   :  { %v14303_v28 = vpop.eup %14302  ;;  %13569 = vmatpush3.msra.mxu0 %v17391_v16  ;;  %13556 = vmatmul.mubr.msk.f32.vlgmr.msra.gmra.mrb[50].mxu1 %vm275_vm2, %v3042_v53 }
 0x469   :  { %v14305_v50 = vpop.eup %14304  ;;  %13564 = vmatpush3.msra.mxu1 %v17392_v21  ;;  %v2975_v42 = vpop.xlane.xlu0 %2974  ;;  %13570 = vmatprep.mubr.msk.f32.mxu0 %vm14580_vm1, %v17388_v49  ;;  %v3045_v10 = vmul.f32 %v14303_v28, %v15428_v20 }
 0x46a   :  { %14314 = vrcp.f32 %v2975_v42  ;;  %v2972_v35 = vpop.xlane.xlu1 %2971  ;;  %13578 = vmatprep.subr.mxu0 %v17388_v49  ;;  %13565 = vmatprep.mubr.msk.f32.mxu1 %vm14580_vm1, %v17388_v49  ;;  %v3044_v62 = vmul.f32 %v14305_v50, %v15430_v54 }
 0x46b   :  { %14316 = vrcp.f32 %v2972_v35  ;;  %13571 = vmatmul.mubr.msk.f32.vlgmr.msra.gmra.mrb[56].mxu0 %vm275_vm2, %v3045_v10  ;;  %13573 = vmatprep.subr.mxu1 %v17388_v49 }
 0x46c   :  { %v14307_v34 = vpop.eup %14306  ;;  %13579 = vmatpush3.msra.mxu0 %v17393_v14  ;;  %13566 = vmatmul.mubr.msk.f32.vlgmr.msra.gmra.mrb[52].mxu1 %vm275_vm2, %v3044_v62 }
 0x46d   :  { %v14309_v20 = vpop.eup %14308  ;;  %13574 = vmatpush3.msra.mxu1 %v17394_v36  ;;  %v2981_v63 = vpop.xlane.xlu0 %2980  ;;  %13580 = vmatprep.mubr.msk.f32.mxu0 %vm14580_vm1, %v17388_v49  ;;  %v3047_v26 = vmul.f32 %v14307_v34, %v15438_v55 }
 0x46e   :  { %14318 = vrcp.f32 %v2981_v63  ;;  %v2978_v54 = vpop.xlane.xlu1 %2977  ;;  %13588 = vmatprep.subr.mxu0 %v17388_v49  ;;  %13575 = vmatprep.mubr.msk.f32.mxu1 %vm14580_vm1, %v17388_v49  ;;  %v3046_v47 = vmul.f32 %v14309_v20, %v15440_v17 }
 0x46f   :  { %14320 = vrcp.f32 %v2978_v54  ;;  %13581 = vmatmul.mubr.msk.f32.vlgmr.msra.gmra.mrb[58].mxu0 %vm275_vm2, %v3047_v26  ;;  %13583 = vmatprep.subr.mxu1 %v17388_v49 }
 0x470   :  { %v14311_v37 = vpop.eup %14310  ;;  %13589 = vmatpush3.msra.mxu0 %v17395_v1  ;;  %13576 = vmatmul.mubr.msk.f32.vlgmr.msra.gmra.mrb[54].mxu1 %vm275_vm2, %v3046_v47  ;;  %v85_v1 = vld [vmem:[%s17341_s3 + $0x8] sm:$0xff] }
 0x471   :  { %v14313_v55 = vpop.eup %14312  ;;  %13584 = vmatpush3.msra.mxu1 %v17396_v7  ;;  %13590 = vmatprep.mubr.msk.f32.mxu0 %vm14580_vm1, %v17388_v49  ;;  %v3049_v5 = vmul.f32 %v14311_v37, %v15448_v41  ;;  %v84_v37 = vld [vmem:[%s17341_s3] sm:$0xff] }
 0x472   :  { %v2984_v22 = vpop.xlane.xlu1 %2983  ;;  %13598 = vmatprep.subr.mxu0 %v17388_v49  ;;  %13585 = vmatprep.mubr.msk.f32.mxu1 %vm14580_vm1, %v17388_v49  ;;  %v3048_v17 = vmul.f32 %v14313_v55, %v15450_v43  ;;  %v14117_v7 = vpack.c.bf16 %v85_v1, %v84_v37 }
 0x473   :  { %14322 = vrcp.f32 %v2984_v22  ;;  %v2987_v40 = vpop.xlane.xlu0 %2986  ;;  %13591 = vmatmul.mubr.msk.f32.vlgmr.msra.gmra.mrb[60].mxu0 %vm275_vm2, %v3049_v5  ;;  %13593 = vmatprep.subr.mxu1 %v17388_v49 }
 0x474   :  { %v14315_v48 = vpop.eup %14314  ;;  %14324 = vrcp.f32 %v2987_v40  ;;  %13599 = vmatpush3.msra.mxu0 %v17397_v58  ;;  %13586 = vmatmul.mubr.msk.f32.vlgmr.msra.gmra.mrb[56].mxu1 %vm275_vm2, %v3048_v17  ;;  %v86_v40 = vld [vmem:[%s17341_s3 + $0x10] sm:$0xff] }
 0x475   :  { %v14317_v41 = vpop.eup %14316  ;;  %13594 = vmatpush3.msra.mxu1 %v17398_v2  ;;  %13600 = vmatprep.mubr.msk.f32.mxu0 %vm14580_vm1, %v17388_v49  ;;  %v3051_v43 = vmul.f32 %v14315_v48, %v15456_v0  ;;  %v87_v48 = vld [vmem:[%s17341_s3 + $0x18] sm:$0xff] }
 0x476   :  { %13608 = vmatprep.subr.mxu0 %v17388_v49  ;;  %13595 = vmatprep.mubr.msk.f32.mxu1 %vm14580_vm1, %v17388_v49  ;;  %v3050_v4 = vmul.f32 %v14317_v41, %v15458_v60  ;;  %v14121_v41 = vpack.c.bf16 %v87_v48, %v86_v40 }
 0x477   :  { %13601 = vmatmul.mubr.msk.f32.vlgmr.msra.gmra.mrb[62].mxu0 %vm275_vm2, %v3051_v43  ;;  %13603 = vmatprep.subr.mxu1 %v17388_v49 }
 0x478   :  { %v14319_v46 = vpop.eup %14318  ;;  %13609 = vmatpush3.msra.mxu0 %v17399_v19  ;;  %13596 = vmatmul.mubr.msk.f32.vlgmr.msra.gmra.mrb[58].mxu1 %vm275_vm2, %v3050_v4 }
 0x479   :  { %v14321_v13 = vpop.eup %14320  ;;  %13604 = vmatpush3.msra.mxu1 %v17400_v52  ;;  %13610 = vmatprep.mubr.msk.f32.mxu0 %vm14580_vm1, %v17388_v49  ;;  %v3053_v0 = vmul.f32 %v14319_v46, %v15464_v23 }
 0x47a   :  { %13618 = vmatprep.subr.mxu0 %v17388_v49  ;;  %13605 = vmatprep.mubr.msk.f32.mxu1 %vm14580_vm1, %v17388_v49  ;;  %v3052_v60 = vmul.f32 %v14321_v13, %v15466_v57 }
 0x47b   :  { %13611 = vmatmul.mubr.msk.f32.vlgmr.msra.gmra.mrb[64].mxu0 %vm275_vm2, %v3053_v0  ;;  %13613 = vmatprep.subr.mxu1 %v17388_v49 }
 0x47c   :  { %13619 = vmatpush3.msra.mxu0 %v15508_v31  ;;  %13606 = vmatmul.mubr.msk.f32.vlgmr.msra.gmra.mrb[60].mxu1 %vm275_vm2, %v3052_v60 }
 0x47d   :  { %v14323_v44 = vpop.eup %14322  ;;  %13614 = vmatpush3.msra.mxu1 %v15506_v61  ;;  %13615 = vmatprep.mubr.msk.f32.mxu1 %vm14580_vm1, %v17388_v49 }
 0x47e   :  { %v14325_v23 = vpop.eup %14324  ;;  %13620 = vmatprep.mubr.msk.f32.mxu0 %vm14580_vm1, %v17388_v49  ;;  %v3054_v57 = vmul.f32 %v14323_v44, %v15472_v11  ;;  %13623 = vmatprep.subr.mxu1 %v17388_v49 }
 0x47f   :  { %v3055_v45 = vmul.f32 %v14325_v23, %v15474_v51  ;;  %13628 = vmatprep.subr.mxu0 %v17388_v49 }
 0x480   :  { %13616 = vmatmul.mubr.msk.f32.vlgmr.msra.gmra.mrb[62].mxu1 %vm275_vm2, %v3054_v57 }
 0x481   :  { %13621 = vmatmul.mubr.msk.f32.vlgmr.msra.gmra.mrb[66].mxu0 %vm275_vm2, %v3055_v45  ;;  %13625 = vmatprep.mubr.msk.f32.mxu1 %vm14580_vm1, %v17388_v49 }
 0x482   :  { %13630 = vmatprep.mubr.msk.f32.mxu0 %vm14580_vm1, %v17388_v49 }
 0x49d   :  { %v2993_v61 = vpop.xlane.xlu0 %2992 }
 0x49e   :  { %14326 = vrcp.f32 %v2993_v61 }
 0x4a0   :  { %v2990_v31 = vpop.xlane.xlu1 %2989 }
 0x4a1   :  { %14328 = vrcp.f32 %v2990_v31  ;;  %v5339_v11 = vpop.permute.xlu0 %5338 }
 0x4a2   :  { %13624 = vmatpush3.msra.mxu1 %v5339_v11 }
 0x4a3   :  { %14118 = vmatprep.subr.bf16.mxu1 %v14117_v7 }
 0x4a4   :  { %v5415_v30 = vpop.permute.xlu1 %5414 }
 0x4a5   :  { %13629 = vmatpush3.msra.mxu0 %v5415_v30 }
 0x4a8   :  { %v14327_v51 = vpop.eup %14326 }
 0x4a9   :  { %v3057_v24 = vmul.f32 %v14327_v51, %v15493_v9 }
 0x4ab   :  { %v14329_v27 = vpop.eup %14328  ;;  %13631 = vmatmul.mubr.msk.f32.vlgmr.msra.gmra.mrb[68].mxu0 %vm275_vm2, %v3057_v24 }
 0x4ac   :  { %v3056_v29 = vmul.f32 %v14329_v27, %v15498_v8 }
 0x4ae   :  { %13626 = vmatmul.mubr.msk.f32.vlgmr.msra.gmra.mrb[64].mxu1 %vm275_vm2, %v3056_v29 }
 0x4af   :  { %14120 = vmatpush3.bf16.msra.mxu1 %v14117_v7 }
 0x4b0   :  { %14122 = vmatprep.subr.bf16.mxu1 %v14121_v41 }
 0x4b3   :  { %14124 = vmatpush3.bf16.msra.mxu1 %v14121_v41 }
 0x4dc   :  { %v15678_v39 = vpop.f32.mrb[38].mxu0 }
 0x4dd   :  { %v13482_v15 = vpop.f32.mrb[39].mxu0 }
 0x4df   :  { %v15680_v18 = vpop.f32.mrb[34].mxu1 }
 0x4e0   :  { %v13477_v6 = vpop.f32.mrb[35].mxu1 }
 0x518   :  { %v15682_v3 = vpop.f32.mrb[36].mxu1 }
 0x519   :  { %v13487_v38 = vpop.f32.mrb[37].mxu1  ;;  %v15684_v59 = vpop.f32.mrb[40].mxu0 }
 0x51a   :  { %v13492_v12 = vpop.f32.mrb[41].mxu0 }
 0x51c   :  { %v15686_v9 = vpop.f32.mrb[38].mxu1 }
 0x51d   :  { %v13497_v32 = vpop.f32.mrb[39].mxu1  ;;  %v15688_v56 = vpop.f32.mrb[42].mxu0 }
 0x51e   :  { %v13502_v8 = vpop.f32.mrb[43].mxu0 }
 0x520   :  { %v15690_v25 = vpop.f32.mrb[40].mxu1 }
 0x521   :  { %v13507_v33 = vpop.f32.mrb[41].mxu1  ;;  %v15692_v53 = vpop.f32.mrb[44].mxu0 }
 0x522   :  { %v13512_v28 = vpop.f32.mrb[45].mxu0 }
 0x526   :  { %v3814_v16 = vpop.f32.mrb[46].mxu0 }
 0x527   :  { %v3738_v50 = vpop.f32.mrb[42].mxu1  ;;  %5500 = vrot.lane.b32.xlu1 %v3814_v16, %s14581_s18  ;;  %v13522_v21 = vpop.f32.mrb[47].mxu0 }
 0x528   :  { %v13517_v42 = vpop.f32.mrb[43].mxu1  ;;  %5498 = vrot.lane.b32.xlu0 %v3738_v50, %s14581_s18 }
 0x52e   :  { %v3966_v10 = vpop.f32.mrb[48].mxu0 }
 0x52f   :  { %v3890_v35 = vpop.f32.mrb[44].mxu1  ;;  %5504 = vrot.lane.b32.xlu1 %v3966_v10, %s14581_s18  ;;  %v13532_v62 = vpop.f32.mrb[49].mxu0 }
 0x530   :  { %v13527_v34 = vpop.f32.mrb[45].mxu1  ;;  %5502 = vrot.lane.b32.xlu0 %v3890_v35, %s14581_s18 }
 0x532   :  { %v4118_v14 = vpop.f32.mrb[50].mxu0 }
 0x533   :  { %v4042_v20 = vpop.f32.mrb[46].mxu1  ;;  %5508 = vrot.lane.b32.xlu1 %v4118_v14, %s14581_s18  ;;  %v13542_v36 = vpop.f32.mrb[51].mxu0 }
 0x534   :  { %v13537_v63 = vpop.f32.mrb[47].mxu1  ;;  %5506 = vrot.lane.b32.xlu0 %v4042_v20, %s14581_s18 }
 0x536   :  { %v4270_v26 = vpop.f32.mrb[52].mxu0 }
 0x537   :  { %v4194_v54 = vpop.f32.mrb[48].mxu1  ;;  %5512 = vrot.lane.b32.xlu1 %v4270_v26, %s14581_s18  ;;  %v13552_v47 = vpop.f32.mrb[53].mxu0 }
 0x538   :  { %v13547_v55 = vpop.f32.mrb[49].mxu1  ;;  %5510 = vrot.lane.b32.xlu0 %v4194_v54, %s14581_s18 }
 0x53a   :  { %v4422_v5 = vpop.f32.mrb[54].mxu0 }
 0x53b   :  { %v4346_v22 = vpop.f32.mrb[50].mxu1  ;;  %5532 = vrot.lane.b32.xlu1 %v4422_v5, %s14582_s25  ;;  %v13562_v17 = vpop.f32.mrb[55].mxu0 }
 0x53c   :  { %v13557_v58 = vpop.f32.mrb[51].mxu1  ;;  %5530 = vrot.lane.b32.xlu0 %v4346_v22, %s14582_s25 }
 0x53e   :  { %v4574_v2 = vpop.f32.mrb[56].mxu0 }
 0x53f   :  { %v4498_v43 = vpop.f32.mrb[52].mxu1  ;;  %5536 = vrot.lane.b32.xlu1 %v4574_v2, %s14582_s25  ;;  %v13572_v4 = vpop.f32.mrb[57].mxu0 }
 0x540   :  { %v13567_v46 = vpop.f32.mrb[53].mxu1  ;;  %5534 = vrot.lane.b32.xlu0 %v4498_v43, %s14582_s25 }
 0x542   :  { %v4726_v19 = vpop.f32.mrb[58].mxu0 }
 0x543   :  { %v4650_v13 = vpop.f32.mrb[54].mxu1  ;;  %5540 = vrot.lane.b32.xlu1 %v4726_v19, %s14582_s25  ;;  %v13582_v52 = vpop.f32.mrb[59].mxu0 }
 0x544   :  { %v13577_v0 = vpop.f32.mrb[55].mxu1  ;;  %5538 = vrot.lane.b32.xlu0 %v4650_v13, %s14582_s25 }
 0x546   :  { %v4878_v60 = vpop.f32.mrb[60].mxu0 }
 0x547   :  { %v4802_v44 = vpop.f32.mrb[56].mxu1  ;;  %5544 = vrot.lane.b32.xlu1 %v4878_v60, %s14582_s25  ;;  %v13592_v23 = vpop.f32.mrb[61].mxu0 }
 0x548   :  { %v13587_v57 = vpop.f32.mrb[57].mxu1  ;;  %5542 = vrot.lane.b32.xlu0 %v4802_v44, %s14582_s25 }
 0x54a   :  { %v5030_v45 = vpop.f32.mrb[62].mxu0 }
 0x54b   :  { %v4954_v61 = vpop.f32.mrb[58].mxu1  ;;  %5564 = vrot.lane.b32.xlu1 %v5030_v45, %s14583_s30  ;;  %v13602_v31 = vpop.f32.mrb[63].mxu0 }
 0x54c   :  { %v13597_v11 = vpop.f32.mrb[59].mxu1  ;;  %5562 = vrot.lane.b32.xlu0 %v4954_v61, %s14583_s30 }
 0x54e   :  { %v5182_v30 = vpop.f32.mrb[64].mxu0 }
 0x54f   :  { %v5106_v51 = vpop.f32.mrb[60].mxu1  ;;  %5568 = vrot.lane.b32.xlu1 %v5182_v30, %s14583_s30  ;;  %v13612_v24 = vpop.f32.mrb[65].mxu0 }
 0x550   :  { %v13607_v27 = vpop.f32.mrb[61].mxu1  ;;  %5566 = vrot.lane.b32.xlu0 %v5106_v51, %s14583_s30  ;;  %v17401_v24 = vld [vmem:[#allocation8_spill] sm:$0xff] }
 0x553   :  { %v5258_v29 = vpop.f32.mrb[62].mxu1 }
 0x554   :  { %v5334_v15 = vpop.f32.mrb[66].mxu0  ;;  %5570 = vrot.lane.b32.xlu0 %v5258_v29, %s14583_s30  ;;  %v13617_v6 = vpop.f32.mrb[63].mxu1  ;;  %v14522_v29 = vld [vmem:[#allocation2] sm:$0xff] }
 0x555   :  { %5572 = vrot.lane.b32.xlu1 %v5334_v15, %s14583_s30  ;;  %v13622_v38 = vpop.f32.mrb[67].mxu0 }
 0x57e   :  { %v5486_v12 = vpop.f32.mrb[68].mxu0 }
 0x57f   :  { %5576 = vrot.lane.b32.xlu1 %v5486_v12, %s14583_s30  ;;  %v13632_v32 = vpop.f32.mrb[69].mxu0 }
 0x581   :  { %v5410_v8 = vpop.f32.mrb[64].mxu1 }
 0x582   :  { %5574 = vrot.lane.b32.xlu0 %v5410_v8, %s14583_s30  ;;  %v13627_v33 = vpop.f32.mrb[65].mxu1 }
 0x599   :  { %v5501_v28 = vpop.permute.xlu1 %5500 }
 0x59a   :  { %v5499_v16 = vpop.permute.xlu0 %5498  ;;  %v5587_v55 = vsel %vm275_vm2, %v15678_v39, %v5501_v28  ;;  %v17402_v28 = vld [vmem:[#allocation10_spill] sm:$0xff] }
 0x59b   :  { %v5586_v37 = vsel %vm275_vm2, %v15680_v18, %v5499_v16 }
 0x5a1   :  { %v5505_v50 = vpop.permute.xlu1 %5504 }
 0x5a2   :  { %v5503_v21 = vpop.permute.xlu0 %5502  ;;  %v5589_v39 = vsel %vm275_vm2, %v15684_v59, %v5505_v50 }
 0x5a3   :  { %v5588_v48 = vsel %vm275_vm2, %v15682_v3, %v5503_v21 }
 0x5a5   :  { %v5509_v42 = vpop.permute.xlu1 %5508 }
 0x5a6   :  { %v5507_v10 = vpop.permute.xlu0 %5506  ;;  %v5591_v46 = vsel %vm275_vm2, %v15688_v56, %v5509_v42  ;;  %v17403_v42 = vld [vmem:[#allocation9_spill] sm:$0xff] }
 0x5a7   :  { %v5590_v3 = vsel %vm275_vm2, %v15686_v9, %v5507_v10 }
 0x5a9   :  { %v5513_v35 = vpop.permute.xlu1 %5512 }
 0x5aa   :  { %v5511_v62 = vpop.permute.xlu0 %5510  ;;  %v5593_v56 = vsel %vm275_vm2, %v15692_v53, %v5513_v35 }
 0x5ab   :  { %v5592_v9 = vsel %vm275_vm2, %v15690_v25, %v5511_v62  ;;  %v12738_v25 = vld [vmem:[%s17342_s4] ss:$0 sm:$0xff] }
 0x5ad   :  { %v5533_v34 = vpop.permute.xlu1 %5532 }
 0x5ae   :  { %v5531_v14 = vpop.permute.xlu0 %5530  ;;  %v5596_v22 = vsel %vm5594_vm3, %v5587_v55, %v5533_v34 }
 0x5af   :  { %v5595_v7 = vsel %vm5594_vm3, %v5586_v37, %v5531_v14  ;;  %v14523_v14 = vld [vmem:[#allocation2 + $0x8] sm:$0xff] }
 0x5b1   :  { %v5537_v20 = vpop.permute.xlu1 %5536 }
 0x5b2   :  { %v5535_v36 = vpop.permute.xlu0 %5534  ;;  %v5598_v2 = vsel %vm5594_vm3, %v5589_v39, %v5537_v20 }
 0x5b3   :  { %v5597_v18 = vsel %vm5594_vm3, %v5588_v48, %v5535_v36  ;;  %v17404_v36 = vld [vmem:[#allocation11_spill] sm:$0xff] }
 0x5b5   :  { %v5541_v63 = vpop.permute.xlu1 %5540 }
 0x5b6   :  { %v5539_v26 = vpop.permute.xlu0 %5538  ;;  %v5600_v13 = vsel %vm5594_vm3, %v5591_v46, %v5541_v63 }
 0x5b7   :  { %v5599_v59 = vsel %vm5594_vm3, %v5590_v3, %v5539_v26 }
 0x5b9   :  { %v5545_v54 = vpop.permute.xlu1 %5544 }
 0x5ba   :  { %v5543_v47 = vpop.permute.xlu0 %5542  ;;  %v5602_v45 = vsel %vm5594_vm3, %v5593_v56, %v5545_v54 }
 0x5bb   :  { %v5601_v23 = vsel %vm5594_vm3, %v5592_v9, %v5543_v47 }
 0x5bd   :  { %v5565_v1 = vpop.permute.xlu1 %5564 }
 0x5be   :  { %v5563_v5 = vpop.permute.xlu0 %5562  ;;  %v5605_v40 = vsel %vm5603_vm4, %v5596_v22, %v5565_v1 }
 0x5bf   :  { %v5604_v17 = vsel %vm5603_vm4, %v5595_v7, %v5563_v5  ;;  %v17405_v5 = vld [vmem:[#allocation13_spill] sm:$0xff] }
 0x5c0   :  { %13641 = vmatprep.mubr.msk.f32.mxu1 %vm95_vm0, %v5604_v17  ;;  %v17406_v17 = vld [vmem:[#allocation12_spill] sm:$0xff] }
 0x5c1   :  { %v5569_v58 = vpop.permute.xlu1 %5568  ;;  %13642 = vmatmul.mubr.msk.f32.vlgmr.msra.gmra.mrb[66].mxu1 %vm95_vm0, %v5605_v40 }
 0x5c2   :  { %v5567_v41 = vpop.permute.xlu0 %5566  ;;  %v5607_v4 = vsel %vm5603_vm4, %v5598_v2, %v5569_v58 }
 0x5c3   :  { %v5606_v43 = vsel %vm5603_vm4, %v5597_v18, %v5567_v41 }
 0x5c4   :  { %13644 = vmatprep.mubr.msk.f32.mxu1 %vm95_vm0, %v5606_v43 }
 0x5c5   :  { %13645 = vmatmul.mubr.msk.f32.gmra.mrb[68].mxu1 %vm95_vm0, %v5607_v4 }
 0x5c6   :  { %v5571_v19 = vpop.permute.xlu0 %5570 }
 0x5c7   :  { %v5573_v52 = vpop.permute.xlu1 %5572  ;;  %v5608_v0 = vsel %vm5603_vm4, %v5599_v59, %v5571_v19 }
 0x5c8   :  { %v5609_v60 = vsel %vm5603_vm4, %v5600_v13, %v5573_v52  ;;  %13647 = vmatprep.mubr.msk.f32.mxu1 %vm95_vm0, %v5608_v0 }
 0x5c9   :  { %13648 = vmatmul.mubr.msk.f32.gmra.mrb[70].mxu1 %vm95_vm0, %v5609_v60 }
 0x5f1   :  { %v5577_v44 = vpop.permute.xlu1 %5576 }
 0x5f2   :  { %v5611_v31 = vsel %vm5603_vm4, %v5602_v45, %v5577_v44 }
 0x5f4   :  { %v5575_v57 = vpop.permute.xlu0 %5574 }
 0x5f5   :  { %v5610_v61 = vsel %vm5603_vm4, %v5601_v23, %v5575_v57 }
 0x5f6   :  { %13650 = vmatprep.mubr.msk.f32.mxu1 %vm95_vm0, %v5610_v61 }
 0x5f7   :  { %13651 = vmatmul.mubr.msk.f32.gmra.mrb[72].mxu1 %vm95_vm0, %v5611_v31 }
 0x694   :  { %v13643_v11 = vpop.f32.mrb[66].mxu1 }
 0x695   :  { %v5714_v30 = vadd.f32 %v13643_v11, %v12738_v25  ;;  %v5708_v53 = vpop.f32.mrb[67].mxu1 }
 0x696   :  { %v5709_v51 = vadd.f32 %v12738_v25, %v5708_v53 }
 0x697   :  { %v5748_v27 = vadd.f32 %v5714_v30, %v17401_v24 }
 0x698   :  { %v5747_v15 = vadd.f32 %v14522_v29, %v5709_v51  ;;  %v13646_v6 = vpop.f32.mrb[68].mxu1 }
 0x699   :  { %v5718_v38 = vpop.f32.mrb[69].mxu1  ;;  %v5760_v12 = vsel %vm95_vm0, %v5748_v27, 0.0  ;;  %v5724_v32 = vadd.f32 %v13646_v6, %v12738_v25  ;;  %v5891_v6 = vld [vmem:[%s17343_s5 + $0x8] sm:$0xff] }
 0x69a   :  { %v5719_v8 = vadd.f32 %v12738_v25, %v5718_v38  ;;  %5761 = vadd.xlane.f32.xlu1 %v5760_v12  ;;  %v5757_v33 = vsel %vm95_vm0, %v5747_v15, 0.0  ;;  %v5892_v12 = vld [vmem:[%s17343_s5 + $0x10] sm:$0xff] }
 0x69b   :  { %5758 = vadd.xlane.f32.xlu0 %v5757_v33  ;;  %v5750_v10 = vadd.f32 %v5724_v32, %v17403_v42  ;;  %v5893_v32 = vld [vmem:[%s17343_s5 + $0x18] sm:$0xff] }
 0x69c   :  { %v5749_v16 = vadd.f32 %v5719_v8, %v17402_v28  ;;  %v13649_v50 = vpop.f32.mrb[70].mxu1  ;;  %v14129_v8 = vpack.c.bf16 %v5893_v32, %v5892_v12 }
 0x69d   :  { %v5728_v21 = vpop.f32.mrb[71].mxu1  ;;  %v5734_v35 = vadd.f32 %v13649_v50, %v12738_v25  ;;  %v5766_v26 = vsel %vm95_vm0, %v5750_v10, 0.0 }
 0x69e   :  { %v5729_v62 = vadd.f32 %v12738_v25, %v5728_v21  ;;  %v5763_v34 = vsel %vm95_vm0, %v5749_v16, 0.0 }
 0x69f   :  { %5764 = vadd.xlane.f32.xlu0 %v5763_v34  ;;  %v5752_v63 = vadd.f32 %v5734_v35, %v17404_v36  ;;  %v6040_v36 = vld [vmem:[%s17345_s7 + $0x10] sm:$0xff] }
 0x6a0   :  { %v5751_v20 = vadd.f32 %v14523_v14, %v5729_v62  ;;  %v6038_v14 = vld [vmem:[%s17345_s7] sm:$0xff] }
 0x6a1   :  { %v5772_v47 = vsel %vm95_vm0, %v5752_v63, 0.0 }
 0x6a2   :  { %v5769_v54 = vsel %vm95_vm0, %v5751_v20, 0.0 }
 0x6a3   :  { %5767 = vadd.xlane.f32.xlu0 %v5766_v26  ;;  %5770 = vadd.xlane.f32.xlu1 %v5769_v54  ;;  %v6041_v26 = vld [vmem:[%s17345_s7 + $0x18] sm:$0xff] }
 0x6a4   :  { %v14137_v54 = vpack.c.bf16 %v6041_v26, %v6040_v36 }
 0x6a7   :  { %5773 = vadd.xlane.f32.xlu0 %v5772_v47  ;;  %v6042_v47 = vld [vmem:[%s17345_s7 + $0x20] sm:$0xff] }
 0x6ca   :  { %v13652_v37 = vpop.f32.mrb[72].mxu1 }
 0x6cb   :  { %v5744_v1 = vadd.f32 %v13652_v37, %v12738_v25  ;;  %v5738_v55 = vpop.f32.mrb[73].mxu1  ;;  %v6043_v37 = vld [vmem:[%s17345_s7 + $0x28] sm:$0xff] }
 0x6cc   :  { %v5739_v7 = vadd.f32 %v12738_v25, %v5738_v55 }
 0x6cd   :  { %v5754_v22 = vadd.f32 %v5744_v1, %v17405_v5  ;;  %v14141_v1 = vpack.c.bf16 %v6043_v37, %v6042_v47  ;;  %v6044_v47 = vld [vmem:[%s17345_s7 + $0x30] sm:$0xff]  ;;  %v12749_v37 = vld [vmem:[%s17344_s6] ss:$0 sm:$0xff] }
 0x6ce   :  { %v5753_v40 = vadd.f32 %v5739_v7, %v17406_v17 }
 0x6cf   :  { %v5778_v48 = vsel %vm95_vm0, %v5754_v22, 0.0 }
 0x6d0   :  { %5779 = vadd.xlane.f32.xlu0 %v5778_v48  ;;  %v5775_v58 = vsel %vm95_vm0, %v5753_v40, 0.0 }
 0x6d1   :  { %5776 = vadd.xlane.f32.xlu1 %v5775_v58 }
 0x727   :  { %v5762_v39 = vpop.xlane.xlu1 %5761 }
 0x728   :  { %v5783_v18 = vmul.f32 0.03125, %v5762_v39  ;;  %v5759_v41 = vpop.xlane.xlu0 %5758 }
 0x729   :  { %v5782_v2 = vmul.f32 0.03125, %v5759_v41 }
 0x72a   :  { %v15787_v43 = vsub.f32 %v5748_v27, %v5783_v18 }
 0x72b   :  { %v15789_v4 = vsub.f32 %v5747_v15, %v5782_v2  ;;  %v5890_v15 = vld [vmem:[%s17343_s5] sm:$0xff] }
 0x72c   :  { %v5765_v3 = vpop.xlane.xlu0 %5764  ;;  %v5799_v46 = vmul.f32 %v15787_v43, %v15787_v43  ;;  %v14125_v38 = vpack.c.bf16 %v5891_v6, %v5890_v15 }
 0x72d   :  { %v5784_v59 = vmul.f32 0.03125, %v5765_v3  ;;  %v5798_v19 = vmul.f32 %v15789_v4, %v15789_v4 }
 0x72e   :  { %v5809_v13 = vsel %vm95_vm0, %v5799_v46, 0.0  ;;  %14126 = vmatprep.subr.bf16.mxu0 %v14125_v38 }
 0x72f   :  { %v15796_v52 = vsub.f32 %v5749_v16, %v5784_v59  ;;  %5810 = vadd.xlane.f32.xlu0 %v5809_v13  ;;  %v5806_v0 = vsel %vm95_vm0, %v5798_v19, 0.0  ;;  %14128 = vmatpush3.bf16.msra.mxu0 %v14125_v38 }
 0x730   :  { %v5771_v60 = vpop.xlane.xlu1 %5770  ;;  %5807 = vadd.xlane.f32.xlu1 %v5806_v0  ;;  %v5768_v9 = vpop.xlane.xlu0 %5767  ;;  %14130 = vmatprep.subr.bf16.mxu0 %v14129_v8 }
 0x731   :  { %v5786_v44 = vmul.f32 0.03125, %v5771_v60  ;;  %v5785_v56 = vmul.f32 0.03125, %v5768_v9  ;;  %v5800_v23 = vmul.f32 %v15796_v52, %v15796_v52  ;;  %v12747_v60 = vld [vmem:[%s17347_s9] ss:$0 sm:$0xff] }
 0x733   :  { %v15801_v57 = vsub.f32 %v5751_v20, %v5786_v44  ;;  %v15803_v45 = vsub.f32 %v5750_v10, %v5785_v56  ;;  %v5812_v61 = vsel %vm95_vm0, %v5800_v23, 0.0  ;;  %14132 = vmatpush3.bf16.msra.mxu0 %v14129_v8  ;;  %v6039_v20 = vld [vmem:[%s17345_s7 + $0x8] sm:$0xff] }
 0x734   :  { %5813 = vadd.xlane.f32.xlu1 %v5812_v61  ;;  %v5774_v31 = vpop.xlane.xlu0 %5773  ;;  %v12748_v61 = vld [vmem:[%s17348_s10] ss:$0 sm:$0xff] }
 0x735   :  { %v5787_v25 = vmul.f32 0.03125, %v5774_v31  ;;  %v5802_v11 = vmul.f32 %v15801_v57, %v15801_v57  ;;  %v5801_v30 = vmul.f32 %v15803_v45, %v15803_v45 }
 0x737   :  { %v15810_v53 = vsub.f32 %v5752_v63, %v5787_v25  ;;  %v5818_v51 = vsel %vm95_vm0, %v5802_v11, 0.0  ;;  %v5815_v24 = vsel %vm95_vm0, %v5801_v30, 0.0  ;;  %v14133_v63 = vpack.c.bf16 %v6039_v20, %v6038_v14 }
 0x738   :  { %5819 = vadd.xlane.f32.xlu1 %v5818_v51  ;;  %5816 = vadd.xlane.f32.xlu0 %v5815_v24 }
 0x739   :  { %v5803_v27 = vmul.f32 %v15810_v53, %v15810_v53  ;;  %14134 = vmatprep.subr.bf16.mxu1 %v14133_v63 }
 0x73a   :  { %14136 = vmatpush3.bf16.msra.mxu1 %v14133_v63 }
 0x73b   :  { %v5821_v29 = vsel %vm95_vm0, %v5803_v27, 0.0  ;;  %14138 = vmatprep.subr.bf16.mxu1 %v14137_v54 }
 0x73c   :  { %5822 = vadd.xlane.f32.xlu0 %v5821_v29 }
 0x73e   :  { %14140 = vmatpush3.bf16.msra.mxu1 %v14137_v54 }
 0x73f   :  { %14142 = vmatprep.subr.bf16.mxu1 %v14141_v1 }
 0x742   :  { %14144 = vmatpush3.bf16.msra.mxu1 %v14141_v1 }
 0x75d   :  { %v5780_v33 = vpop.xlane.xlu0 %5779 }
 0x75e   :  { %v5789_v28 = vmul.f32 0.03125, %v5780_v33  ;;  %v5777_v16 = vpop.xlane.xlu1 %5776 }
 0x75f   :  { %v5788_v50 = vmul.f32 0.03125, %v5777_v16 }
 0x760   :  { %v15829_v21 = vsub.f32 %v5754_v22, %v5789_v28 }
 0x761   :  { %v15831_v42 = vsub.f32 %v5753_v40, %v5788_v50 }
 0x762   :  { %v5805_v10 = vmul.f32 %v15829_v21, %v15829_v21 }
 0x763   :  { %v5804_v35 = vmul.f32 %v15831_v42, %v15831_v42 }
 0x764   :  { %v5827_v62 = vsel %vm95_vm0, %v5805_v10, 0.0 }
 0x765   :  { %5828 = vadd.xlane.f32.xlu0 %v5827_v62  ;;  %v5824_v34 = vsel %vm95_vm0, %v5804_v35, 0.0 }
 0x766   :  { %5825 = vadd.xlane.f32.xlu1 %v5824_v34 }
 0x7bc   :  { %v5811_v55 = vpop.xlane.xlu0 %5810 }
 0x7bd   :  { %v5831_v7 = vmul.f32 0.03125, %v5811_v55  ;;  %v5808_v5 = vpop.xlane.xlu1 %5807 }
 0x7be   :  { %v5830_v22 = vmul.f32 0.03125, %v5808_v5 }
 0x7bf   :  { %v5839_v17 = vadd.f32 1e-05, %v5831_v7 }
 0x7c0   :  { %v5838_v40 = vadd.f32 1e-05, %v5830_v22 }
 0x7c1   :  { %14330 = vrsqrt.f32 %v5839_v17  ;;  %v5814_v48 = vpop.xlane.xlu1 %5813 }
 0x7c2   :  { %14332 = vrsqrt.f32 %v5838_v40  ;;  %v5832_v58 = vmul.f32 0.03125, %v5814_v48 }
 0x7c4   :  { %v5840_v39 = vadd.f32 1e-05, %v5832_v58 }
 0x7c5   :  { %v5820_v18 = vpop.xlane.xlu1 %5819  ;;  %v5817_v41 = vpop.xlane.xlu0 %5816 }
 0x7c6   :  { %14334 = vrsqrt.f32 %v5840_v39  ;;  %v5834_v2 = vmul.f32 0.03125, %v5820_v18  ;;  %v5833_v3 = vmul.f32 0.03125, %v5817_v41 }
 0x7c8   :  { %v5842_v46 = vadd.f32 1e-05, %v5834_v2  ;;  %v5841_v59 = vadd.f32 1e-05, %v5833_v3 }
 0x7c9   :  { %v5823_v19 = vpop.xlane.xlu0 %5822 }
 0x7ca   :  { %14336 = vrsqrt.f32 %v5842_v46  ;;  %v5835_v13 = vmul.f32 0.03125, %v5823_v19 }
 0x7cb   :  { %v14331_v0 = vpop.eup %14330  ;;  %14338 = vrsqrt.f32 %v5841_v59 }
 0x7cc   :  { %v14333_v9 = vpop.eup %14332  ;;  %v5855_v44 = vmul.f32 %v14331_v0, %v15787_v43  ;;  %v5843_v56 = vadd.f32 1e-05, %v5835_v13 }
 0x7cd   :  { %v5854_v23 = vmul.f32 %v14333_v9, %v15789_v4 }
 0x7ce   :  { %14340 = vrsqrt.f32 %v5843_v56  ;;  %v5869_v31 = vmul.f32 %v12747_v60, %v5855_v44 }
 0x7cf   :  { %v5868_v25 = vmul.f32 %v12747_v60, %v5854_v23 }
 0x7d0   :  { %v14335_v11 = vpop.eup %14334  ;;  %v15868_v24 = vadd.f32 %v12748_v61, %v5869_v31 }
 0x7d1   :  { %v15865_v30 = vadd.f32 %v12748_v61, %v5868_v25  ;;  %v5856_v51 = vmul.f32 %v14335_v11, %v15796_v52 }
 0x7d3   :  { %13661 = vmatprep.mubr.msk.f32.mxu0 %vm95_vm0, %v15865_v30  ;;  %v5870_v43 = vmul.f32 %v12747_v60, %v5856_v51 }
 0x7d4   :  { %v14337_v27 = vpop.eup %14336  ;;  %13662 = vmatmul.mubr.msk.f32.vlgmr.msra.gmra.mrb[70].mxu0 %vm95_vm0, %v15868_v24 }
 0x7d5   :  { %v14339_v4 = vpop.eup %14338  ;;  %v15874_v29 = vadd.f32 %v12748_v61, %v5870_v43  ;;  %v5858_v15 = vmul.f32 %v14337_v27, %v15801_v57 }
 0x7d6   :  { %v5857_v6 = vmul.f32 %v14339_v4, %v15803_v45 }
 0x7d7   :  { %13664 = vmatprep.mubr.msk.f32.mxu0 %vm95_vm0, %v15874_v29  ;;  %v5872_v52 = vmul.f32 %v12747_v60, %v5858_v15 }
 0x7d8   :  { %v14341_v38 = vpop.eup %14340  ;;  %v5871_v12 = vmul.f32 %v12747_v60, %v5857_v6 }
 0x7d9   :  { %v15880_v32 = vadd.f32 %v12748_v61, %v5872_v52  ;;  %v5859_v8 = vmul.f32 %v14341_v38, %v15810_v53 }
 0x7da   :  { %v15883_v33 = vadd.f32 %v12748_v61, %v5871_v12 }
 0x7db   :  { %v5873_v28 = vmul.f32 %v12747_v60, %v5859_v8 }
 0x7dc   :  { %13665 = vmatmul.mubr.msk.f32.gmra.mrb[72].mxu0 %vm95_vm0, %v15883_v33 }
 0x7dd   :  { %13667 = vmatprep.mubr.msk.f32.mxu0 %vm95_vm0, %v15880_v32  ;;  %v15889_v57 = vadd.f32 %v12748_v61, %v5873_v28 }
 0x7e0   :  { %13668 = vmatmul.mubr.msk.f32.gmra.mrb[74].mxu0 %vm95_vm0, %v15889_v57 }
 0x7f2   :  { %v5829_v45 = vpop.xlane.xlu0 %5828 }
 0x7f3   :  { %v5837_v16 = vmul.f32 0.03125, %v5829_v45  ;;  %v5826_v50 = vpop.xlane.xlu1 %5825 }
 0x7f4   :  { %v5836_v10 = vmul.f32 0.03125, %v5826_v50 }
 0x7f5   :  { %v5845_v35 = vadd.f32 1e-05, %v5837_v16 }
 0x7f6   :  { %v5844_v53 = vadd.f32 1e-05, %v5836_v10 }
 0x7f7   :  { %14342 = vrsqrt.f32 %v5845_v35 }
 0x7f8   :  { %14344 = vrsqrt.f32 %v5844_v53 }
 0x801   :  { %v14343_v62 = vpop.eup %14342 }
 0x802   :  { %v14345_v34 = vpop.eup %14344  ;;  %v5861_v14 = vmul.f32 %v14343_v62, %v15829_v21  ;;  %v6045_v21 = vld [vmem:[%s17345_s7 + $0x38] sm:$0xff] }
 0x803   :  { %v5860_v20 = vmul.f32 %v14345_v34, %v15831_v42  ;;  %v14145_v42 = vpack.c.bf16 %v6045_v21, %v6044_v47 }
 0x804   :  { %v5875_v36 = vmul.f32 %v12747_v60, %v5861_v14 }
 0x805   :  { %v5874_v63 = vmul.f32 %v12747_v60, %v5860_v20  ;;  %14146 = vmatprep.subr.bf16.mxu1 %v14145_v42 }
 0x806   :  { %v15897_v54 = vadd.f32 %v12748_v61, %v5875_v36  ;;  %14148 = vmatpush3.bf16.msra.mxu1 %v14145_v42 }
 0x807   :  { %v15895_v26 = vadd.f32 %v12748_v61, %v5874_v63  ;;  %13721 = vmatprep.subr.mxu1 %v17388_v49  ;;  %v12758_v61 = vld [vmem:[%s17346_s8] ss:$0 sm:$0xff] }
 0x809   :  { %13670 = vmatprep.mubr.msk.f32.mxu0 %vm95_vm0, %v15895_v26 }
 0x80a   :  { %13671 = vmatmul.mubr.msk.f32.gmra.mrb[76].mxu0 %vm95_vm0, %v15897_v54 }
 0x8a7   :  { %v13663_v1 = vpop.f32.mrb[70].mxu0 }
 0x8a8   :  { %v5997_v55 = vadd.f32 %v13663_v1, %v12749_v37  ;;  %v5991_v7 = vpop.f32.mrb[71].mxu0 }
 0x8a9   :  { %v5992_v5 = vadd.f32 %v12749_v37, %v5991_v7 }
 0x8aa   :  { %v6031_v17 = vmax.f32 %v5997_v55, 0.0 }
 0x8ab   :  { %v6030_v22 = vmax.f32 %v5992_v5, 0.0 }
 0x8ad   :  { %13689 = vmatprep.mubr.msk.f32.mxu1 %vm6053_vm5, %v6030_v22 }
 0x8ae   :  { %13690 = vmatmul.mubr.msk.f32.vlgmr.msra.gmra.mrb[74].mxu1 %vm6053_vm5, %v6031_v17 }
 0x8af   :  { %v13666_v40 = vpop.f32.mrb[72].mxu0 }
 0x8b0   :  { %v6007_v48 = vadd.f32 %v13666_v40, %v12749_v37  ;;  %v6001_v58 = vpop.f32.mrb[73].mxu0 }
 0x8b1   :  { %v6002_v39 = vadd.f32 %v12749_v37, %v6001_v58 }
 0x8b2   :  { %v6033_v2 = vmax.f32 %v6007_v48, 0.0 }
 0x8b3   :  { %v6032_v18 = vmax.f32 %v6002_v39, 0.0  ;;  %v13669_v41 = vpop.f32.mrb[74].mxu0 }
 0x8b4   :  { %v6017_v3 = vadd.f32 %v13669_v41, %v12749_v37  ;;  %v6011_v46 = vpop.f32.mrb[75].mxu0 }
 0x8b5   :  { %v6012_v59 = vadd.f32 %v12749_v37, %v6011_v46  ;;  %13692 = vmatprep.mubr.msk.f32.mxu1 %vm6053_vm5, %v6032_v18 }
 0x8b6   :  { %13693 = vmatmul.mubr.msk.f32.gmra.mrb[76].mxu1 %vm6053_vm5, %v6033_v2  ;;  %v6035_v13 = vmax.f32 %v6017_v3, 0.0 }
 0x8b7   :  { %v6034_v19 = vmax.f32 %v6012_v59, 0.0 }
 0x8b9   :  { %13695 = vmatprep.mubr.msk.f32.mxu1 %vm6053_vm5, %v6034_v19 }
 0x8ba   :  { %13696 = vmatmul.mubr.msk.f32.gmra.mrb[78].mxu1 %vm6053_vm5, %v6035_v13 }
 0x8dd   :  { %v13672_v0 = vpop.f32.mrb[76].mxu0 }
 0x8de   :  { %v6027_v60 = vadd.f32 %v13672_v0, %v12749_v37  ;;  %v6021_v9 = vpop.f32.mrb[77].mxu0 }
 0x8df   :  { %v6022_v44 = vadd.f32 %v12749_v37, %v6021_v9 }
 0x8e0   :  { %v6037_v23 = vmax.f32 %v6027_v60, 0.0 }
 0x8e1   :  { %v6036_v56 = vmax.f32 %v6022_v44, 0.0 }
 0x8e3   :  { %13698 = vmatprep.mubr.msk.f32.mxu1 %vm6053_vm5, %v6036_v56 }
 0x8e4   :  { %13699 = vmatmul.mubr.msk.f32.gmra.mrb[80].mxu1 %vm6053_vm5, %v6037_v23 }
 0x8e5   :  { %13723 = vmatprep.mubr.msk.f32.mxu1 %vm14580_vm1, %v17388_v49 }
 0x981   :  { %v13691_v31 = vpop.f32.mrb[74].mxu1 }
 0x982   :  { %v6150_v25 = vadd.f32 %v13691_v31, %v12758_v61  ;;  %v6144_v11 = vpop.f32.mrb[75].mxu1  ;;  %v12770_v31 = vld [vmem:[%s17339_s1 + $0x28] sm:$0xff] }
 0x983   :  { %v6145_v51 = vadd.f32 %v12758_v61, %v6144_v11  ;;  %v12771_v11 = vld [vmem:[%s17339_s1 + $0x30] sm:$0xff] }
 0x984   :  { %v6184_v43 = vadd.f32 %v6150_v25, %v15868_v24 }
 0x985   :  { %v6183_v27 = vadd.f32 %v6145_v51, %v15865_v30  ;;  %v12772_v51 = vld [vmem:[%s17339_s1 + $0x38] sm:$0xff] }
 0x986   :  { %v6196_v4 = vsel %vm95_vm0, %v6184_v43, 0.0 }
 0x987   :  { %6197 = vadd.xlane.f32.xlu0 %v6196_v4  ;;  %v6193_v15 = vsel %vm95_vm0, %v6183_v27, 0.0 }
 0x988   :  { %6194 = vadd.xlane.f32.xlu1 %v6193_v15 }
 0x989   :  { %v13694_v6 = vpop.f32.mrb[76].mxu1 }
 0x98a   :  { %v6160_v52 = vadd.f32 %v13694_v6, %v12758_v61  ;;  %v6154_v38 = vpop.f32.mrb[77].mxu1 }
 0x98b   :  { %v6155_v12 = vadd.f32 %v12758_v61, %v6154_v38 }
 0x98c   :  { %v6186_v8 = vadd.f32 %v6160_v52, %v15883_v33 }
 0x98d   :  { %v6185_v28 = vadd.f32 %v6155_v12, %v15874_v29  ;;  %v13697_v45 = vpop.f32.mrb[78].mxu1 }
 0x98e   :  { %v6170_v16 = vadd.f32 %v13697_v45, %v12758_v61  ;;  %v6164_v50 = vpop.f32.mrb[79].mxu1  ;;  %v6202_v24 = vsel %vm95_vm0, %v6186_v8, 0.0 }
 0x98f   :  { %v6165_v30 = vadd.f32 %v12758_v61, %v6164_v50  ;;  %6203 = vadd.xlane.f32.xlu0 %v6202_v24  ;;  %v6199_v10 = vsel %vm95_vm0, %v6185_v28, 0.0 }
 0x990   :  { %v6188_v35 = vadd.f32 %v6170_v16, %v15889_v57  ;;  %6200 = vadd.xlane.f32.xlu1 %v6199_v10 }
 0x991   :  { %v6187_v53 = vadd.f32 %v6165_v30, %v15880_v32 }
 0x992   :  { %v6208_v62 = vsel %vm95_vm0, %v6188_v35, 0.0 }
 0x993   :  { %6209 = vadd.xlane.f32.xlu0 %v6208_v62  ;;  %v6205_v33 = vsel %vm95_vm0, %v6187_v53, 0.0 }
 0x994   :  { %6206 = vadd.xlane.f32.xlu1 %v6205_v33 }
 0x9b7   :  { %v13700_v29 = vpop.f32.mrb[80].mxu1 }
 0x9b8   :  { %v6180_v34 = vadd.f32 %v13700_v29, %v12758_v61  ;;  %v6174_v14 = vpop.f32.mrb[81].mxu1 }
 0x9b9   :  { %v6175_v20 = vadd.f32 %v12758_v61, %v6174_v14  ;;  %v12769_v61 = vld [vmem:[%s17339_s1 + $0x20] sm:$0xff] }
 0x9ba   :  { %v6190_v36 = vadd.f32 %v6180_v34, %v15897_v54  ;;  %v14149_v25 = vpack.c.bf16 %v12770_v31, %v12769_v61 }
 0x9bb   :  { %v6189_v63 = vadd.f32 %v6175_v20, %v15895_v26 }
 0x9bc   :  { %v6214_v47 = vsel %vm95_vm0, %v6190_v36, 0.0  ;;  %14150 = vmatprep.subr.bf16.mxu0 %v14149_v25 }
 0x9bd   :  { %6215 = vadd.xlane.f32.xlu0 %v6214_v47  ;;  %v6211_v57 = vsel %vm95_vm0, %v6189_v63, 0.0  ;;  %14152 = vmatpush3.bf16.msra.mxu0 %v14149_v25 }
 0x9be   :  { %6212 = vadd.xlane.f32.xlu1 %v6211_v57 }
 0xa14   :  { %v6198_v32 = vpop.xlane.xlu0 %6197 }
 0xa15   :  { %v6218_v21 = vmul.f32 0.03125, %v6198_v32  ;;  %v6195_v42 = vpop.xlane.xlu1 %6194  ;;  %v12767_v32 = vld [vmem:[%s17349_s11] ss:$0 sm:$0xff] }
 0xa16   :  { %v6217_v37 = vmul.f32 0.03125, %v6195_v42 }
 0xa17   :  { %v15942_v1 = vsub.f32 %v6184_v43, %v6218_v21  ;;  %v14153_v43 = vpack.c.bf16 %v12772_v51, %v12771_v11 }
 0xa18   :  { %v15944_v55 = vsub.f32 %v6183_v27, %v6217_v37 }
 0xa19   :  { %v6234_v7 = vmul.f32 %v15942_v1, %v15942_v1  ;;  %14154 = vmatprep.subr.bf16.mxu0 %v14153_v43 }
 0xa1a   :  { %v6233_v26 = vmul.f32 %v15944_v55, %v15944_v55  ;;  %14156 = vmatpush3.bf16.msra.mxu0 %v14153_v43 }
 0xa1b   :  { %v6244_v54 = vsel %vm95_vm0, %v6234_v7, 0.0  ;;  %13726 = vmatprep.subr.mxu0 %v17388_v49 }
 0xa1c   :  { %v6204_v5 = vpop.xlane.xlu0 %6203  ;;  %6245 = vadd.xlane.f32.xlu0 %v6244_v54  ;;  %v6241_v22 = vsel %vm95_vm0, %v6233_v26, 0.0 }
 0xa1d   :  { %v6220_v17 = vmul.f32 0.03125, %v6204_v5  ;;  %v6201_v40 = vpop.xlane.xlu1 %6200  ;;  %6242 = vadd.xlane.f32.xlu1 %v6241_v22  ;;  %v12768_v5 = vld [vmem:[%s17350_s12] ss:$0 sm:$0xff] }
 0xa1e   :  { %v6219_v48 = vmul.f32 0.03125, %v6201_v40 }
 0xa1f   :  { %v15952_v58 = vsub.f32 %v6186_v8, %v6220_v17 }
 0xa20   :  { %v15954_v39 = vsub.f32 %v6185_v28, %v6219_v48  ;;  %v6210_v18 = vpop.xlane.xlu0 %6209 }
 0xa21   :  { %v6222_v41 = vmul.f32 0.03125, %v6210_v18  ;;  %v6207_v2 = vpop.xlane.xlu1 %6206  ;;  %v6236_v3 = vmul.f32 %v15952_v58, %v15952_v58 }
 0xa22   :  { %v6221_v46 = vmul.f32 0.03125, %v6207_v2  ;;  %v6235_v59 = vmul.f32 %v15954_v39, %v15954_v39 }
 0xa23   :  { %v15960_v19 = vsub.f32 %v6188_v35, %v6222_v41  ;;  %v6250_v13 = vsel %vm95_vm0, %v6236_v3, 0.0 }
 0xa24   :  { %v15963_v0 = vsub.f32 %v6187_v53, %v6221_v46  ;;  %6251 = vadd.xlane.f32.xlu0 %v6250_v13  ;;  %v6247_v60 = vsel %vm95_vm0, %v6235_v59, 0.0 }
 0xa25   :  { %6248 = vadd.xlane.f32.xlu1 %v6247_v60  ;;  %v6238_v9 = vmul.f32 %v15960_v19, %v15960_v19 }
 0xa26   :  { %v6237_v44 = vmul.f32 %v15963_v0, %v15963_v0 }
 0xa27   :  { %v6256_v56 = vsel %vm95_vm0, %v6238_v9, 0.0 }
 0xa28   :  { %6257 = vadd.xlane.f32.xlu0 %v6256_v56  ;;  %v6253_v23 = vsel %vm95_vm0, %v6237_v44, 0.0 }
 0xa29   :  { %6254 = vadd.xlane.f32.xlu1 %v6253_v23 }
 0xa4a   :  { %v6216_v27 = vpop.xlane.xlu0 %6215 }
 0xa4b   :  { %v6224_v4 = vmul.f32 0.03125, %v6216_v27  ;;  %v6213_v15 = vpop.xlane.xlu1 %6212 }
 0xa4c   :  { %v6223_v6 = vmul.f32 0.03125, %v6213_v15 }
 0xa4d   :  { %v15985_v52 = vsub.f32 %v6190_v36, %v6224_v4 }
 0xa4e   :  { %v15987_v38 = vsub.f32 %v6189_v63, %v6223_v6 }
 0xa4f   :  { %v6240_v12 = vmul.f32 %v15985_v52, %v15985_v52 }
 0xa50   :  { %v6239_v8 = vmul.f32 %v15987_v38, %v15987_v38 }
 0xa51   :  { %v6262_v28 = vsel %vm95_vm0, %v6240_v12, 0.0 }
 0xa52   :  { %6263 = vadd.xlane.f32.xlu0 %v6262_v28  ;;  %v6259_v45 = vsel %vm95_vm0, %v6239_v8, 0.0 }
 0xa53   :  { %6260 = vadd.xlane.f32.xlu1 %v6259_v45 }
 0xaa9   :  { %v6246_v16 = vpop.xlane.xlu0 %6245 }
 0xaaa   :  { %v6266_v50 = vmul.f32 0.03125, %v6246_v16  ;;  %v6243_v24 = vpop.xlane.xlu1 %6242 }
 0xaab   :  { %v6265_v30 = vmul.f32 0.03125, %v6243_v24 }
 0xaac   :  { %v6274_v10 = vadd.f32 1e-05, %v6266_v50 }
 0xaad   :  { %v6273_v35 = vadd.f32 1e-05, %v6265_v30 }
 0xaae   :  { %14346 = vrsqrt.f32 %v6274_v10 }
 0xaaf   :  { %14348 = vrsqrt.f32 %v6273_v35 }
 0xab1   :  { %v6252_v53 = vpop.xlane.xlu0 %6251 }
 0xab2   :  { %v6268_v62 = vmul.f32 0.03125, %v6252_v53  ;;  %v6249_v33 = vpop.xlane.xlu1 %6248 }
 0xab3   :  { %v6267_v29 = vmul.f32 0.03125, %v6249_v33 }
 0xab4   :  { %v6276_v34 = vadd.f32 1e-05, %v6268_v62 }
 0xab5   :  { %v6275_v14 = vadd.f32 1e-05, %v6267_v29  ;;  %v6258_v20 = vpop.xlane.xlu0 %6257 }
 0xab6   :  { %14350 = vrsqrt.f32 %v6276_v34  ;;  %v6270_v36 = vmul.f32 0.03125, %v6258_v20  ;;  %v6255_v63 = vpop.xlane.xlu1 %6254 }
 0xab7   :  { %14352 = vrsqrt.f32 %v6275_v14  ;;  %v6269_v47 = vmul.f32 0.03125, %v6255_v63 }
 0xab8   :  { %v14347_v57 = vpop.eup %14346  ;;  %v6278_v21 = vadd.f32 1e-05, %v6270_v36 }
 0xab9   :  { %v14349_v42 = vpop.eup %14348  ;;  %v6290_v37 = vmul.f32 %v14347_v57, %v15942_v1  ;;  %v6277_v7 = vadd.f32 1e-05, %v6269_v47 }
 0xaba   :  { %14354 = vrsqrt.f32 %v6278_v21  ;;  %v6289_v26 = vmul.f32 %v14349_v42, %v15944_v55 }
 0xabb   :  { %v6304_v54 = vmul.f32 %v12767_v32, %v6290_v37  ;;  %14356 = vrsqrt.f32 %v6277_v7 }
 0xabc   :  { %v6303_v22 = vmul.f32 %v12767_v32, %v6289_v26 }
 0xabd   :  { %v16005_v40 = vadd.f32 %v12768_v5, %v6304_v54 }
 0xabe   :  { %v16003_v17 = vadd.f32 %v12768_v5, %v6303_v22 }
 0xabf   :  { %17408 = vst [vmem:[#allocation14_spill] sm:$0xff] %v16005_v40 }
 0xac0   :  { %17407 = vst [vmem:[#allocation18_spill] sm:$0xff] %v16003_v17  ;;  %v14351_v48 = vpop.eup %14350  ;;  %13709 = vmatprep.mubr.msk.f32.mxu0 %vm95_vm0, %v16003_v17 }
 0xac1   :  { %v14353_v1 = vpop.eup %14352  ;;  %13710 = vmatmul.mubr.msk.f32.vlgmr.msra.gmra.mrb[78].mxu0 %vm95_vm0, %v16005_v40  ;;  %v6292_v55 = vmul.f32 %v14351_v48, %v15952_v58 }
 0xac2   :  { %v6291_v18 = vmul.f32 %v14353_v1, %v15954_v39 }
 0xac3   :  { %v6306_v41 = vmul.f32 %v12767_v32, %v6292_v55 }
 0xac4   :  { %v14355_v2 = vpop.eup %14354  ;;  %v6305_v3 = vmul.f32 %v12767_v32, %v6291_v18 }
 0xac5   :  { %v14357_v46 = vpop.eup %14356  ;;  %v6294_v59 = vmul.f32 %v14355_v2, %v15960_v19  ;;  %v16017_v9 = vadd.f32 %v12768_v5, %v6306_v41 }
 0xac6   :  { %v16014_v13 = vadd.f32 %v12768_v5, %v6305_v3  ;;  %v6293_v60 = vmul.f32 %v14357_v46, %v15963_v0 }
 0xac7   :  { %17410 = vst [vmem:[#allocation15_spill] sm:$0xff] %v16017_v9  ;;  %v6308_v44 = vmul.f32 %v12767_v32, %v6294_v59 }
 0xac8   :  { %17409 = vst [vmem:[#allocation20_spill] sm:$0xff] %v16014_v13  ;;  %13712 = vmatprep.mubr.msk.f32.mxu0 %vm95_vm0, %v16014_v13  ;;  %v6307_v56 = vmul.f32 %v12767_v32, %v6293_v60 }
 0xac9   :  { %13713 = vmatmul.mubr.msk.f32.gmra.mrb[80].mxu0 %vm95_vm0, %v16017_v9  ;;  %v16025_v39 = vadd.f32 %v12768_v5, %v6308_v44 }
 0xaca   :  { %v16023_v58 = vadd.f32 %v12768_v5, %v6307_v56 }
 0xacb   :  { %17412 = vst [vmem:[#allocation16_spill] sm:$0xff] %v16025_v39 }
 0xacc   :  { %17411 = vst [vmem:[#allocation17_spill] sm:$0xff] %v16023_v58  ;;  %13715 = vmatprep.mubr.msk.f32.mxu0 %vm95_vm0, %v16023_v58 }
 0xacd   :  { %13716 = vmatmul.mubr.msk.f32.gmra.mrb[82].mxu0 %vm95_vm0, %v16025_v39 }
 0xadf   :  { %v6264_v19 = vpop.xlane.xlu0 %6263 }
 0xae0   :  { %v6272_v0 = vmul.f32 0.03125, %v6264_v19  ;;  %v6261_v23 = vpop.xlane.xlu1 %6260 }
 0xae1   :  { %v6271_v61 = vmul.f32 0.03125, %v6261_v23 }
 0xae2   :  { %v6280_v31 = vadd.f32 1e-05, %v6272_v0 }
 0xae3   :  { %v6279_v25 = vadd.f32 1e-05, %v6271_v61 }
 0xae4   :  { %14358 = vrsqrt.f32 %v6280_v31 }
 0xae5   :  { %14360 = vrsqrt.f32 %v6279_v25 }
 0xaee   :  { %v14359_v11 = vpop.eup %14358 }
 0xaef   :  { %v14361_v51 = vpop.eup %14360  ;;  %v6296_v43 = vmul.f32 %v14359_v11, %v15985_v52  ;;  %v12779_v52 = vld [vmem:[%s17340_s2 + $0x1] ss:$0 sm:$0xff] }
 0xaf0   :  { %v6295_v27 = vmul.f32 %v14361_v51, %v15987_v38 }
 0xaf1   :  { %v6310_v4 = vmul.f32 %v12767_v32, %v6296_v43 }
 0xaf2   :  { %v6309_v15 = vmul.f32 %v12767_v32, %v6295_v27 }
 0xaf3   :  { %v16035_v12 = vadd.f32 %v12768_v5, %v6310_v4 }
 0xaf4   :  { %v16033_v6 = vadd.f32 %v12768_v5, %v6309_v15 }
 0xaf5   :  { %17414 = vst [vmem:[#allocation25_spill] sm:$0xff] %v16035_v12 }
 0xaf6   :  { %17413 = vst [vmem:[#allocation19_spill] sm:$0xff] %v16033_v6  ;;  %13718 = vmatprep.mubr.msk.f32.mxu0 %vm95_vm0, %v16033_v6 }
 0xaf7   :  { %13719 = vmatmul.mubr.msk.f32.gmra.mrb[84].mxu0 %vm95_vm0, %v16035_v12 }
 0xaf8   :  { %13728 = vmatprep.mubr.msk.f32.mxu0 %vm14580_vm1, %v17388_v49 }
 0xb94   :  { %v13711_v38 = vpop.f32.mrb[78].mxu0 }
 0xb95   :  { %v16046_v8 = vadd.f32 %v13711_v38, %v12779_v52  ;;  %v6435_v28 = vpop.f32.mrb[79].mxu0 }
 0xb96   :  { %v16052_v45 = vadd.f32 %v12779_v52, %v6435_v28 }
 0xb97   :  { %6500 = vrot.lane.b32.xlu1 %v16046_v8, %s14577_s16  ;;  %6484 = vrot.lane.b32.xlu0 %v16046_v8, %s14576_s15 }
 0xb9b   :  { %6498 = vrot.lane.b32.xlu0 %v16052_v45, %s14577_s16  ;;  %6482 = vrot.lane.b32.xlu1 %v16052_v45, %s14576_s15 }
 0xb9c   :  { %v13714_v16 = vpop.f32.mrb[80].mxu0 }
 0xb9d   :  { %v16058_v50 = vadd.f32 %v13714_v16, %v12779_v52  ;;  %v6445_v24 = vpop.f32.mrb[81].mxu0 }
 0xb9e   :  { %v16062_v10 = vadd.f32 %v12779_v52, %v6445_v24 }
 0xb9f   :  { %6488 = vrot.lane.b32.xlu1 %v16058_v50, %s14576_s15 }
 0xba0   :  { %v13717_v30 = vpop.f32.mrb[82].mxu0 }
 0xba1   :  { %v6455_v35 = vpop.f32.mrb[83].mxu0  ;;  %v16070_v62 = vadd.f32 %v13717_v30, %v12779_v52 }
 0xba2   :  { %v16064_v53 = vadd.f32 %v12779_v52, %v6455_v35 }
 0xba3   :  { %6486 = vrot.lane.b32.xlu1 %v16062_v10, %s14576_s15 }
 0xba4   :  { %6490 = vrot.lane.b32.xlu0 %v16064_v53, %s14576_s15 }
 0xba7   :  { %6492 = vrot.lane.b32.xlu1 %v16070_v62, %s14576_s15 }
 0xbca   :  { %v13720_v33 = vpop.f32.mrb[84].mxu0 }
 0xbcb   :  { %v16074_v29 = vadd.f32 %v13720_v33, %v12779_v52  ;;  %v6465_v34 = vpop.f32.mrb[85].mxu0 }
 0xbcc   :  { %v16076_v14 = vadd.f32 %v12779_v52, %v6465_v34 }
 0xbcd   :  { %6496 = vrot.lane.b32.xlu1 %v16074_v29, %s14576_s15 }
 0xbce   :  { %6494 = vrot.lane.b32.xlu0 %v16076_v14, %s14576_s15 }
 0xbd1   :  { %6504 = vrot.lane.b32.xlu1 %v16058_v50, %s14577_s16 }
 0xbd2   :  { %6502 = vrot.lane.b32.xlu0 %v16062_v10, %s14577_s16 }
 0xbd5   :  { %6508 = vrot.lane.b32.xlu1 %v16070_v62, %s14577_s16 }
 0xbd6   :  { %6506 = vrot.lane.b32.xlu0 %v16064_v53, %s14577_s16 }
 0xbd9   :  { %6512 = vrot.lane.b32.xlu1 %v16074_v29, %s14577_s16 }
 0xbda   :  { %6514 = vrot.lane.b32.xlu0 %v16052_v45, %s14579_s17 }
 0xbdd   :  { %6516 = vrot.lane.b32.xlu1 %v16046_v8, %s14579_s17 }
 0xbde   :  { %6510 = vrot.lane.b32.xlu0 %v16076_v14, %s14577_s16 }
 0xbe1   :  { %6520 = vrot.lane.b32.xlu1 %v16058_v50, %s14579_s17 }
 0xbe2   :  { %6518 = vrot.lane.b32.xlu0 %v16062_v10, %s14579_s17 }
 0xbe5   :  { %6524 = vrot.lane.b32.xlu1 %v16070_v62, %s14579_s17 }
 0xbe6   :  { %6522 = vrot.lane.b32.xlu0 %v16064_v53, %s14579_s17 }
 0xbe9   :  { %6606 = vrot.lane.b32.xlu1 %v16046_v8, %s14573_s22 }
 0xbea   :  { %6530 = vrot.lane.b32.xlu0 %v16052_v45, %s14573_s22 }
 0xbed   :  { %6528 = vrot.lane.b32.xlu1 %v16074_v29, %s14579_s17 }
 0xbee   :  { %6526 = vrot.lane.b32.xlu0 %v16076_v14, %s14579_s17 }
 0xbf1   :  { %6758 = vrot.lane.b32.xlu1 %v16058_v50, %s14573_s22 }
 0xbf2   :  { %6682 = vrot.lane.b32.xlu0 %v16062_v10, %s14573_s22 }
 0xbf5   :  { %6910 = vrot.lane.b32.xlu1 %v16070_v62, %s14573_s22 }
 0xbf6   :  { %6834 = vrot.lane.b32.xlu0 %v16064_v53, %s14573_s22 }
 0xbf9   :  { %7062 = vrot.lane.b32.xlu1 %v16074_v29, %s14573_s22 }
 0xbfa   :  { %6986 = vrot.lane.b32.xlu0 %v16076_v14, %s14573_s22 }
 0xc09   :  { %v16126_v20 = vpop.permute.xlu1 %6500  ;;  %v16128_v36 = vpop.permute.xlu0 %6484 }
 0xc0a   :  { %7214 = vrot.lane.b32.xlu1 %v16128_v36, %s14573_s22 }
 0xc0d   :  { %v16132_v63 = vpop.permute.xlu1 %6482  ;;  %v16140_v57 = vpop.permute.xlu0 %6498 }
 0xc0e   :  { %7138 = vrot.lane.b32.xlu0 %v16132_v63, %s14573_s22 }
 0xc11   :  { %v16136_v47 = vpop.permute.xlu1 %6488 }
 0xc12   :  { %7366 = vrot.lane.b32.xlu1 %v16136_v47, %s14573_s22 }
 0xc15   :  { %v16142_v32 = vpop.permute.xlu1 %6486 }
 0xc16   :  { %7290 = vrot.lane.b32.xlu0 %v16142_v32, %s14573_s22  ;;  %v16146_v21 = vpop.permute.xlu0 %6490 }
 0xc19   :  { %v16148_v42 = vpop.permute.xlu1 %6492 }
 0xc1a   :  { %7518 = vrot.lane.b32.xlu1 %v16148_v42, %s14573_s22  ;;  %7442 = vrot.lane.b32.xlu0 %v16146_v21, %s14573_s22 }
 0xc3f   :  { %v16154_v37 = vpop.permute.xlu1 %6496 }
 0xc40   :  { %7670 = vrot.lane.b32.xlu1 %v16154_v37, %s14573_s22  ;;  %v16158_v7 = vpop.permute.xlu0 %6494 }
 0xc41   :  { %7594 = vrot.lane.b32.xlu0 %v16158_v7, %s14573_s22 }
 0xc43   :  { %v16162_v26 = vpop.permute.xlu1 %6504 }
 0xc44   :  { %7822 = vrot.lane.b32.xlu1 %v16126_v20, %s14573_s22  ;;  %v16166_v54 = vpop.permute.xlu0 %6502 }
 0xc45   :  { %7746 = vrot.lane.b32.xlu0 %v16140_v57, %s14573_s22 }
 0xc47   :  { %v16170_v5 = vpop.permute.xlu1 %6508 }
 0xc48   :  { %7974 = vrot.lane.b32.xlu1 %v16162_v26, %s14573_s22  ;;  %v16174_v22 = vpop.permute.xlu0 %6506 }
 0xc49   :  { %7898 = vrot.lane.b32.xlu0 %v16166_v54, %s14573_s22 }
 0xc4b   :  { %v16178_v48 = vpop.permute.xlu1 %6512 }
 0xc4c   :  { %8126 = vrot.lane.b32.xlu1 %v16170_v5, %s14573_s22  ;;  %v16182_v1 = vpop.permute.xlu0 %6514 }
 0xc4d   :  { %8050 = vrot.lane.b32.xlu0 %v16174_v22, %s14573_s22 }
 0xc4f   :  { %v16186_v55 = vpop.permute.xlu1 %6516 }
 0xc50   :  { %8278 = vrot.lane.b32.xlu1 %v16178_v48, %s14573_s22  ;;  %v16190_v18 = vpop.permute.xlu0 %6510 }
 0xc51   :  { %8202 = vrot.lane.b32.xlu0 %v16190_v18, %s14573_s22 }
 0xc53   :  { %v16194_v41 = vpop.permute.xlu1 %6520 }
 0xc54   :  { %8430 = vrot.lane.b32.xlu1 %v16186_v55, %s14573_s22  ;;  %v16198_v2 = vpop.permute.xlu0 %6518 }
 0xc55   :  { %8354 = vrot.lane.b32.xlu0 %v16182_v1, %s14573_s22 }
 0xc57   :  { %v16202_v3 = vpop.permute.xlu1 %6524 }
 0xc58   :  { %8582 = vrot.lane.b32.xlu1 %v16194_v41, %s14573_s22  ;;  %v16206_v46 = vpop.permute.xlu0 %6522 }
 0xc59   :  { %8506 = vrot.lane.b32.xlu0 %v16198_v2, %s14573_s22 }
 0xc5b   :  { %v6607_v59 = vpop.permute.xlu1 %6606 }
 0xc5c   :  { %13727 = vmatpush3.xpose.msk.msra.mxu0 %vm275_vm2, %v6607_v59  ;;  %8734 = vrot.lane.b32.xlu1 %v16202_v3, %s14573_s22  ;;  %v6531_v60 = vpop.permute.xlu0 %6530 }
 0xc5d   :  { %8658 = vrot.lane.b32.xlu0 %v16206_v46, %s14573_s22  ;;  %13722 = vmatpush3.xpose.msk.msra.mxu1 %vm275_vm2, %v6531_v60 }
 0xc5e   :  { %13736 = vmatprep.subr.mxu0 %v17388_v49  ;;  %13731 = vmatprep.subr.mxu1 %v17388_v49 }
 0xc5f   :  { %13729 = vmatmul.mubr.msk.f32.vlgmr.msra.gmra.mrb[86].mxu0 %vm275_vm2, %v16046_v8  ;;  %v16220_v44 = vpop.permute.xlu1 %6528 }
 0xc60   :  { %8886 = vrot.lane.b32.xlu1 %v16220_v44, %s14573_s22  ;;  %13724 = vmatmul.mubr.msk.f32.vlgmr.msra.gmra.mrb[82].mxu1 %vm275_vm2, %v16052_v45  ;;  %v16226_v56 = vpop.permute.xlu0 %6526 }
 0xc61   :  { %8810 = vrot.lane.b32.xlu0 %v16226_v56, %s14573_s22  ;;  %13738 = vmatprep.mubr.msk.f32.mxu0 %vm14580_vm1, %v17388_v49 }
 0xc62   :  { %13733 = vmatprep.mubr.msk.f32.mxu1 %vm14580_vm1, %v17388_v49 }
 0xc63   :  { %v6759_v19 = vpop.permute.xlu1 %6758 }
 0xc64   :  { %13737 = vmatpush3.xpose.msk.msra.mxu0 %vm275_vm2, %v6759_v19  ;;  %9314 = vrot.lane.b32.xlu1 %v16052_v45, %s14575_s29  ;;  %v6683_v0 = vpop.permute.xlu0 %6682 }
 0xc65   :  { %9390 = vrot.lane.b32.xlu0 %v16046_v8, %s14575_s29  ;;  %13732 = vmatpush3.xpose.msk.msra.mxu1 %vm275_vm2, %v6683_v0 }
 0xc66   :  { %13746 = vmatprep.subr.mxu0 %v17388_v49  ;;  %13741 = vmatprep.subr.mxu1 %v17388_v49 }
 0xc67   :  { %13739 = vmatmul.mubr.msk.f32.vlgmr.msra.gmra.mrb[88].mxu0 %vm275_vm2, %v16058_v50  ;;  %v6911_v23 = vpop.permute.xlu1 %6910 }
 0xc68   :  { %13747 = vmatpush3.xpose.msk.msra.mxu0 %vm275_vm2, %v6911_v23  ;;  %9466 = vrot.lane.b32.xlu1 %v16062_v10, %s14575_s29  ;;  %v6835_v61 = vpop.permute.xlu0 %6834 }
 0xc69   :  { %13734 = vmatmul.mubr.msk.f32.vlgmr.msra.gmra.mrb[84].mxu1 %vm275_vm2, %v16062_v10  ;;  %9542 = vrot.lane.b32.xlu0 %v16058_v50, %s14575_s29 }
 0xc6a   :  { %13742 = vmatpush3.xpose.msk.msra.mxu1 %vm275_vm2, %v6835_v61  ;;  %13748 = vmatprep.mubr.msk.f32.mxu0 %vm14580_vm1, %v17388_v49 }
 0xc6b   :  { %13749 = vmatmul.mubr.msk.f32.vlgmr.msra.gmra.mrb[90].mxu0 %vm275_vm2, %v16070_v62  ;;  %13756 = vmatprep.subr.mxu0 %v17388_v49  ;;  %v7063_v31 = vpop.permute.xlu1 %7062 }
 0xc6c   :  { %13743 = vmatprep.mubr.msk.f32.mxu1 %vm14580_vm1, %v17388_v49  ;;  %13757 = vmatpush3.xpose.msk.msra.mxu0 %vm275_vm2, %v7063_v31  ;;  %v6987_v25 = vpop.permute.xlu0 %6986 }
 0xc6d   :  { %9618 = vrot.lane.b32.xlu1 %v16064_v53, %s14575_s29  ;;  %13744 = vmatmul.mubr.msk.f32.vlgmr.msra.gmra.mrb[86].mxu1 %vm275_vm2, %v16064_v53 }
 0xc6e   :  { %13751 = vmatprep.subr.mxu1 %v17388_v49  ;;  %9694 = vrot.lane.b32.xlu0 %v16070_v62, %s14575_s29 }
 0xc6f   :  { %13752 = vmatpush3.xpose.msk.msra.mxu1 %vm275_vm2, %v6987_v25  ;;  %13758 = vmatprep.mubr.msk.f32.mxu0 %vm14580_vm1, %v17388_v49 }
 0xc70   :  { %13753 = vmatprep.mubr.msk.f32.mxu1 %vm14580_vm1, %v17388_v49  ;;  %13759 = vmatmul.mubr.msk.f32.vlgmr.msra.gmra.mrb[92].mxu0 %vm275_vm2, %v16074_v29 }
 0xc71   :  { %9770 = vrot.lane.b32.xlu1 %v16076_v14, %s14575_s29  ;;  %13766 = vmatprep.subr.mxu0 %v17388_v49 }
 0xc72   :  { %13754 = vmatmul.mubr.msk.f32.vlgmr.msra.gmra.mrb[88].mxu1 %vm275_vm2, %v16076_v14  ;;  %9846 = vrot.lane.b32.xlu0 %v16074_v29, %s14575_s29 }
 0xc73   :  { %13768 = vmatprep.mubr.msk.f32.mxu0 %vm14580_vm1, %v17388_v49  ;;  %13761 = vmatprep.subr.mxu1 %v17388_v49 }
 0xc74   :  { %13763 = vmatprep.mubr.msk.f32.mxu1 %vm14580_vm1, %v17388_v49 }
 0xc75   :  { %9922 = vrot.lane.b32.xlu1 %v16132_v63, %s14575_s29 }
 0xc76   :  { %9998 = vrot.lane.b32.xlu0 %v16128_v36, %s14575_s29 }
 0xc79   :  { %10074 = vrot.lane.b32.xlu1 %v16142_v32, %s14575_s29 }
 0xc7a   :  { %10150 = vrot.lane.b32.xlu0 %v16136_v47, %s14575_s29 }
 0xc7c   :  { %v7215_v11 = vpop.permute.xlu1 %7214 }
 0xc7d   :  { %10226 = vrot.lane.b32.xlu1 %v16146_v21, %s14575_s29  ;;  %13767 = vmatpush3.xpose.msk.msra.mxu0 %vm275_vm2, %v7215_v11 }
 0xc7e   :  { %10302 = vrot.lane.b32.xlu0 %v16148_v42, %s14575_s29  ;;  %13776 = vmatprep.subr.mxu0 %v17388_v49 }
 0xc80   :  { %13769 = vmatmul.mubr.msk.f32.vlgmr.msra.gmra.mrb[94].mxu0 %vm275_vm2, %v16128_v36  ;;  %v7139_v51 = vpop.permute.xlu0 %7138 }
 0xc81   :  { %10530 = vrot.lane.b32.xlu1 %v16140_v57, %s14575_s29  ;;  %13762 = vmatpush3.xpose.msk.msra.mxu1 %vm275_vm2, %v7139_v51 }
 0xc82   :  { %10454 = vrot.lane.b32.xlu0 %v16154_v37, %s14575_s29  ;;  %13778 = vmatprep.mubr.msk.f32.mxu0 %vm14580_vm1, %v17388_v49 }
 0xc83   :  { %13771 = vmatprep.subr.mxu1 %v17388_v49 }
 0xc84   :  { %v7367_v43 = vpop.permute.xlu1 %7366  ;;  %13764 = vmatmul.mubr.msk.f32.vlgmr.msra.gmra.mrb[90].mxu1 %vm275_vm2, %v16132_v63 }
 0xc85   :  { %10682 = vrot.lane.b32.xlu1 %v16166_v54, %s14575_s29  ;;  %13777 = vmatpush3.xpose.msk.msra.mxu0 %vm275_vm2, %v7367_v43 }
 0xc86   :  { %10606 = vrot.lane.b32.xlu0 %v16126_v20, %s14575_s29  ;;  %13773 = vmatprep.mubr.msk.f32.mxu1 %vm14580_vm1, %v17388_v49 }
 0xc87   :  { %13786 = vmatprep.subr.mxu0 %v17388_v49 }
 0xc88   :  { %13779 = vmatmul.mubr.msk.f32.vlgmr.msra.gmra.mrb[96].mxu0 %vm275_vm2, %v16136_v47  ;;  %v7291_v27 = vpop.permute.xlu0 %7290 }
 0xc89   :  { %10834 = vrot.lane.b32.xlu1 %v16174_v22, %s14575_s29  ;;  %13772 = vmatpush3.xpose.msk.msra.mxu1 %vm275_vm2, %v7291_v27 }
 0xc8a   :  { %10758 = vrot.lane.b32.xlu0 %v16162_v26, %s14575_s29  ;;  %13781 = vmatprep.subr.mxu1 %v17388_v49 }
 0xc8b   :  { %13788 = vmatprep.mubr.msk.f32.mxu0 %vm14580_vm1, %v17388_v49 }
 0xc8c   :  { %v7519_v4 = vpop.permute.xlu1 %7518  ;;  %13774 = vmatmul.mubr.msk.f32.vlgmr.msra.gmra.mrb[92].mxu1 %vm275_vm2, %v16142_v32  ;;  %v7443_v15 = vpop.permute.xlu0 %7442 }
 0xc8d   :  { %10910 = vrot.lane.b32.xlu1 %v16170_v5, %s14575_s29  ;;  %13787 = vmatpush3.xpose.msk.msra.mxu0 %vm275_vm2, %v7519_v4 }
 0xc8e   :  { %11138 = vrot.lane.b32.xlu0 %v16182_v1, %s14575_s29  ;;  %13782 = vmatpush3.xpose.msk.msra.mxu1 %vm275_vm2, %v7443_v15 }
 0xc8f   :  { %13783 = vmatprep.mubr.msk.f32.mxu1 %vm14580_vm1, %v17388_v49  ;;  %13796 = vmatprep.subr.mxu0 %v17388_v49 }
 0xc90   :  { %13789 = vmatmul.mubr.msk.f32.vlgmr.msra.gmra.mrb[98].mxu0 %vm275_vm2, %v16148_v42  ;;  %13791 = vmatprep.subr.mxu1 %v17388_v49 }
 0xc91   :  { %11062 = vrot.lane.b32.xlu1 %v16178_v48, %s14575_s29  ;;  %13784 = vmatmul.mubr.msk.f32.vlgmr.msra.gmra.mrb[94].mxu1 %vm275_vm2, %v16146_v21 }
 0xc92   :  { %11290 = vrot.lane.b32.xlu0 %v16198_v2, %s14575_s29  ;;  %13798 = vmatprep.mubr.msk.f32.mxu0 %vm14580_vm1, %v17388_v49 }
 0xc93   :  { %13793 = vmatprep.mubr.msk.f32.mxu1 %vm14580_vm1, %v17388_v49 }
 0xc95   :  { %11214 = vrot.lane.b32.xlu1 %v16186_v55, %s14575_s29 }
 0xc96   :  { %10986 = vrot.lane.b32.xlu0 %v16190_v18, %s14575_s29 }
 0xc99   :  { %11366 = vrot.lane.b32.xlu1 %v16194_v41, %s14575_s29 }
 0xc9d   :  { %10378 = vrot.lane.b32.xlu1 %v16158_v7, %s14575_s29 }
 0xcb2   :  { %v7671_v52 = vpop.permute.xlu1 %7670 }
 0xcb3   :  { %13797 = vmatpush3.xpose.msk.msra.mxu0 %vm275_vm2, %v7671_v52  ;;  %v7595_v38 = vpop.permute.xlu0 %7594 }
 0xcb4   :  { %13792 = vmatpush3.xpose.msk.msra.mxu1 %vm275_vm2, %v7595_v38  ;;  %13806 = vmatprep.subr.mxu0 %v17388_v49 }
 0xcb5   :  { %13801 = vmatprep.subr.mxu1 %v17388_v49 }
 0xcb6   :  { %13799 = vmatmul.mubr.msk.f32.vlgmr.msra.gmra.mrb[100].mxu0 %vm275_vm2, %v16154_v37  ;;  %v7823_v8 = vpop.permute.xlu1 %7822 }
 0xcb7   :  { %13794 = vmatmul.mubr.msk.f32.vlgmr.msra.gmra.mrb[96].mxu1 %vm275_vm2, %v16158_v7  ;;  %13807 = vmatpush3.xpose.msk.msra.mxu0 %vm275_vm2, %v7823_v8  ;;  %v7747_v28 = vpop.permute.xlu0 %7746 }
 0xcb8   :  { %13802 = vmatpush3.xpose.msk.msra.mxu1 %vm275_vm2, %v7747_v28  ;;  %13808 = vmatprep.mubr.msk.f32.mxu0 %vm14580_vm1, %v17388_v49 }
 0xcb9   :  { %13816 = vmatprep.subr.mxu0 %v17388_v49  ;;  %13803 = vmatprep.mubr.msk.f32.mxu1 %vm14580_vm1, %v17388_v49 }
 0xcba   :  { %13809 = vmatmul.mubr.msk.f32.vlgmr.msra.gmra.mrb[102].mxu0 %vm275_vm2, %v16126_v20  ;;  %v7975_v45 = vpop.permute.xlu1 %7974  ;;  %13811 = vmatprep.subr.mxu1 %v17388_v49 }
 0xcbb   :  { %13804 = vmatmul.mubr.msk.f32.vlgmr.msra.gmra.mrb[98].mxu1 %vm275_vm2, %v16140_v57  ;;  %13817 = vmatpush3.xpose.msk.msra.mxu0 %vm275_vm2, %v7975_v45  ;;  %v7899_v16 = vpop.permute.xlu0 %7898 }
 0xcbc   :  { %13812 = vmatpush3.xpose.msk.msra.mxu1 %vm275_vm2, %v7899_v16  ;;  %13818 = vmatprep.mubr.msk.f32.mxu0 %vm14580_vm1, %v17388_v49 }
 0xcbd   :  { %13826 = vmatprep.subr.mxu0 %v17388_v49  ;;  %13813 = vmatprep.mubr.msk.f32.mxu1 %vm14580_vm1, %v17388_v49 }
 0xcbe   :  { %13819 = vmatmul.mubr.msk.f32.vlgmr.msra.gmra.mrb[104].mxu0 %vm275_vm2, %v16162_v26  ;;  %v8127_v50 = vpop.permute.xlu1 %8126  ;;  %13821 = vmatprep.subr.mxu1 %v17388_v49 }
 0xcbf   :  { %13814 = vmatmul.mubr.msk.f32.vlgmr.msra.gmra.mrb[100].mxu1 %vm275_vm2, %v16166_v54  ;;  %13827 = vmatpush3.xpose.msk.msra.mxu0 %vm275_vm2, %v8127_v50  ;;  %v8051_v24 = vpop.permute.xlu0 %8050 }
 0xcc0   :  { %13822 = vmatpush3.xpose.msk.msra.mxu1 %vm275_vm2, %v8051_v24  ;;  %13828 = vmatprep.mubr.msk.f32.mxu0 %vm14580_vm1, %v17388_v49 }
 0xcc1   :  { %13836 = vmatprep.subr.mxu0 %v17388_v49  ;;  %13823 = vmatprep.mubr.msk.f32.mxu1 %vm14580_vm1, %v17388_v49 }
 0xcc2   :  { %13829 = vmatmul.mubr.msk.f32.vlgmr.msra.gmra.mrb[106].mxu0 %vm275_vm2, %v16170_v5  ;;  %v8279_v30 = vpop.permute.xlu1 %8278  ;;  %13831 = vmatprep.subr.mxu1 %v17388_v49 }
 0xcc3   :  { %13824 = vmatmul.mubr.msk.f32.vlgmr.msra.gmra.mrb[102].mxu1 %vm275_vm2, %v16174_v22  ;;  %13837 = vmatpush3.xpose.msk.msra.mxu0 %vm275_vm2, %v8279_v30  ;;  %v8203_v10 = vpop.permute.xlu0 %8202 }
 0xcc4   :  { %13832 = vmatpush3.xpose.msk.msra.mxu1 %vm275_vm2, %v8203_v10  ;;  %13838 = vmatprep.mubr.msk.f32.mxu0 %vm14580_vm1, %v17388_v49 }
 0xcc5   :  { %13846 = vmatprep.subr.mxu0 %v17388_v49  ;;  %13833 = vmatprep.mubr.msk.f32.mxu1 %vm14580_vm1, %v17388_v49 }
 0xcc6   :  { %13839 = vmatmul.mubr.msk.f32.vlgmr.msra.gmra.mrb[108].mxu0 %vm275_vm2, %v16178_v48  ;;  %v8431_v35 = vpop.permute.xlu1 %8430  ;;  %13841 = vmatprep.subr.mxu1 %v17388_v49 }
 0xcc7   :  { %13834 = vmatmul.mubr.msk.f32.vlgmr.msra.gmra.mrb[104].mxu1 %vm275_vm2, %v16190_v18  ;;  %13847 = vmatpush3.xpose.msk.msra.mxu0 %vm275_vm2, %v8431_v35  ;;  %v8355_v53 = vpop.permute.xlu0 %8354 }
 0xcc8   :  { %13842 = vmatpush3.xpose.msk.msra.mxu1 %vm275_vm2, %v8355_v53  ;;  %13848 = vmatprep.mubr.msk.f32.mxu0 %vm14580_vm1, %v17388_v49 }
 0xcc9   :  { %13856 = vmatprep.subr.mxu0 %v17388_v49  ;;  %13843 = vmatprep.mubr.msk.f32.mxu1 %vm14580_vm1, %v17388_v49 }
 0xcca   :  { %13849 = vmatmul.mubr.msk.f32.vlgmr.msra.gmra.mrb[110].mxu0 %vm275_vm2, %v16186_v55  ;;  %v8583_v62 = vpop.permute.xlu1 %8582  ;;  %13851 = vmatprep.subr.mxu1 %v17388_v49 }
 0xccb   :  { %13844 = vmatmul.mubr.msk.f32.vlgmr.msra.gmra.mrb[106].mxu1 %vm275_vm2, %v16182_v1  ;;  %13857 = vmatpush3.xpose.msk.msra.mxu0 %vm275_vm2, %v8583_v62  ;;  %v8507_v33 = vpop.permute.xlu0 %8506 }
 0xccc   :  { %13852 = vmatpush3.xpose.msk.msra.mxu1 %vm275_vm2, %v8507_v33  ;;  %13858 = vmatprep.mubr.msk.f32.mxu0 %vm14580_vm1, %v17388_v49 }
 0xccd   :  { %13866 = vmatprep.subr.mxu0 %v17388_v49  ;;  %13853 = vmatprep.mubr.msk.f32.mxu1 %vm14580_vm1, %v17388_v49 }
 0xcce   :  { %13859 = vmatmul.mubr.msk.f32.vlgmr.msra.gmra.mrb[112].mxu0 %vm275_vm2, %v16194_v41  ;;  %v8735_v29 = vpop.permute.xlu1 %8734  ;;  %13861 = vmatprep.subr.mxu1 %v17388_v49 }
 0xccf   :  { %13854 = vmatmul.mubr.msk.f32.vlgmr.msra.gmra.mrb[108].mxu1 %vm275_vm2, %v16198_v2  ;;  %13867 = vmatpush3.xpose.msk.msra.mxu0 %vm275_vm2, %v8735_v29  ;;  %v8659_v34 = vpop.permute.xlu0 %8658 }
 0xcd0   :  { %13862 = vmatpush3.xpose.msk.msra.mxu1 %vm275_vm2, %v8659_v34  ;;  %13868 = vmatprep.mubr.msk.f32.mxu0 %vm14580_vm1, %v17388_v49 }
 0xcd1   :  { %13876 = vmatprep.subr.mxu0 %v17388_v49  ;;  %13863 = vmatprep.mubr.msk.f32.mxu1 %vm14580_vm1, %v17388_v49 }
 0xcd2   :  { %13869 = vmatmul.mubr.msk.f32.vlgmr.msra.gmra.mrb[114].mxu0 %vm275_vm2, %v16202_v3  ;;  %v8887_v14 = vpop.permute.xlu1 %8886  ;;  %13871 = vmatprep.subr.mxu1 %v17388_v49 }
 0xcd3   :  { %13864 = vmatmul.mubr.msk.f32.vlgmr.msra.gmra.mrb[110].mxu1 %vm275_vm2, %v16206_v46  ;;  %13877 = vmatpush3.xpose.msk.msra.mxu0 %vm275_vm2, %v8887_v14  ;;  %v8811_v20 = vpop.permute.xlu0 %8810 }
 0xcd4   :  { %13872 = vmatpush3.xpose.msk.msra.mxu1 %vm275_vm2, %v8811_v20  ;;  %13878 = vmatprep.mubr.msk.f32.mxu0 %vm14580_vm1, %v17388_v49 }
 0xcd5   :  { %13873 = vmatprep.mubr.msk.f32.mxu1 %vm14580_vm1, %v17388_v49  ;;  %13881 = vmatprep.subr.mxu1 %v17388_v49 }
 0xcd6   :  { %13879 = vmatmul.mubr.msk.f32.vlgmr.msra.gmra.mrb[116].mxu0 %vm275_vm2, %v16220_v44  ;;  %v9315_v36 = vpop.permute.xlu1 %9314  ;;  %13886 = vmatprep.subr.mxu0 %v17388_v49 }
 0xcd7   :  { %13874 = vmatmul.mubr.msk.f32.vlgmr.msra.gmra.mrb[112].mxu1 %vm275_vm2, %v16226_v56  ;;  %v9391_v63 = vpop.permute.xlu0 %9390  ;;  %13888 = vmatprep.mubr.msk.f32.mxu0 %vm14580_vm1, %v17388_v49 }
 0xcd8   :  { %13882 = vmatpush3.msra.mxu1 %v9315_v36  ;;  %13887 = vmatpush3.msra.mxu0 %v9391_v63 }
 0xcd9   :  { %13896 = vmatprep.subr.mxu0 %v17388_v49  ;;  %13883 = vmatprep.mubr.msk.f32.mxu1 %vm14580_vm1, %v17388_v49 }
 0xcda   :  { %13891 = vmatprep.subr.mxu1 %v17388_v49  ;;  %v16528_v53 = vpop.permute.xlu1 %9466 }
 0xcdb   :  { %v16532_v33 = vpop.permute.xlu0 %9542 }
 0xcdf   :  { %v16530_v62 = vpop.permute.xlu1 %9618 }
 0xce0   :  { %v16536_v34 = vpop.permute.xlu0 %9694 }
 0xce3   :  { %v16534_v29 = vpop.permute.xlu1 %9770 }
 0xce4   :  { %v16540_v20 = vpop.permute.xlu0 %9846 }
 0xce7   :  { %v16538_v14 = vpop.permute.xlu1 %9922 }
 0xceb   :  { %v16542_v36 = vpop.permute.xlu1 %10074 }
 0xd32   :  { %v16472_v47 = vpop.f32.mrb[86].mxu0 }
 0xd33   :  { %v16474_v57 = vpop.f32.mrb[82].mxu1  ;;  %v13730_v32 = vpop.f32.mrb[87].mxu0  ;;  %v8965_v21 = vsel %vm275_vm2, %v16472_v47, -inf }
 0xd34   :  { %8966 = vmax.xlane.f32.xlu1 %v8965_v21  ;;  %v13725_v42 = vpop.f32.mrb[83].mxu1  ;;  %v8962_v37 = vsel %vm275_vm2, %v16474_v57, -inf }
 0xd35   :  { %8963 = vmax.xlane.f32.xlu0 %v8962_v37  ;;  %v16550_v37 = vpop.permute.xlu0 %9998 }
 0xd3a   :  { %v16480_v7 = vpop.f32.mrb[88].mxu0 }
 0xd3b   :  { %v13740_v26 = vpop.f32.mrb[89].mxu0  ;;  %v8971_v54 = vsel %vm275_vm2, %v16480_v7, -inf }
 0xd3c   :  { %v16484_v5 = vpop.f32.mrb[84].mxu1  ;;  %8972 = vmax.xlane.f32.xlu0 %v8971_v54 }
 0xd3d   :  { %v13735_v22 = vpop.f32.mrb[85].mxu1  ;;  %v8968_v55 = vsel %vm275_vm2, %v16484_v5, -inf }
 0xd3e   :  { %v16486_v48 = vpop.f32.mrb[90].mxu0  ;;  %v16554_v22 = vpop.permute.xlu1 %10226 }
 0xd3f   :  { %v13750_v1 = vpop.f32.mrb[91].mxu0  ;;  %v8977_v60 = vsel %vm275_vm2, %v16486_v48, -inf }
 0xd40   :  { %v16490_v18 = vpop.f32.mrb[86].mxu1  ;;  %8969 = vmax.xlane.f32.xlu0 %v8968_v55 }
 0xd41   :  { %v13745_v41 = vpop.f32.mrb[87].mxu1  ;;  %v8974_v2 = vsel %vm275_vm2, %v16490_v18, -inf }
 0xd42   :  { %8975 = vmax.xlane.f32.xlu1 %v8974_v2 }
 0xd43   :  { %v16494_v59 = vpop.f32.mrb[92].mxu0 }
 0xd44   :  { %v13760_v19 = vpop.f32.mrb[93].mxu0  ;;  %8978 = vmax.xlane.f32.xlu0 %v8977_v60  ;;  %v8983_v31 = vsel %vm275_vm2, %v16494_v59, -inf }
 0xd45   :  { %v16498_v0 = vpop.f32.mrb[88].mxu1 }
 0xd46   :  { %v13755_v23 = vpop.f32.mrb[89].mxu1  ;;  %v8980_v61 = vsel %vm275_vm2, %v16498_v0, -inf }
 0xd47   :  { %8981 = vmax.xlane.f32.xlu1 %v8980_v61  ;;  %v16564_v23 = vpop.permute.xlu0 %10150 }
 0xd48   :  { %8984 = vmax.xlane.f32.xlu0 %v8983_v31 }
 0xd53   :  { %v16504_v25 = vpop.f32.mrb[94].mxu0 }
 0xd54   :  { %v13770_v11 = vpop.f32.mrb[95].mxu0  ;;  %v8989_v51 = vsel %vm275_vm2, %v16504_v25, -inf }
 0xd55   :  { %8990 = vmax.xlane.f32.xlu0 %v8989_v51 }
 0xd57   :  { %v16508_v43 = vpop.f32.mrb[90].mxu1 }
 0xd58   :  { %v13765_v27 = vpop.f32.mrb[91].mxu1  ;;  %v8986_v4 = vsel %vm275_vm2, %v16508_v43, -inf }
 0xd59   :  { %8987 = vmax.xlane.f32.xlu1 %v8986_v4  ;;  %v16572_v27 = vpop.permute.xlu1 %10530 }
 0xd5a   :  { %17415 = vst [vmem:[#allocation21_spill] sm:$0xff] %v16572_v27 }
 0xd5b   :  { %v16512_v15 = vpop.f32.mrb[96].mxu0 }
 0xd5c   :  { %v13780_v52 = vpop.f32.mrb[97].mxu0  ;;  %v8995_v38 = vsel %vm275_vm2, %v16512_v15, -inf }
 0xd5d   :  { %8996 = vmax.xlane.f32.xlu0 %v8995_v38 }
 0xd5f   :  { %v16516_v8 = vpop.f32.mrb[92].mxu1 }
 0xd60   :  { %v13775_v28 = vpop.f32.mrb[93].mxu1  ;;  %v8992_v45 = vsel %vm275_vm2, %v16516_v8, -inf }
 0xd61   :  { %8993 = vmax.xlane.f32.xlu1 %v8992_v45 }
 0xd63   :  { %v16520_v16 = vpop.f32.mrb[98].mxu0 }
 0xd64   :  { %v16522_v50 = vpop.f32.mrb[94].mxu1  ;;  %v13790_v24 = vpop.f32.mrb[99].mxu0  ;;  %v9001_v30 = vsel %vm275_vm2, %v16520_v16, -inf }
 0xd65   :  { %v13785_v10 = vpop.f32.mrb[95].mxu1  ;;  %9002 = vmax.xlane.f32.xlu0 %v9001_v30  ;;  %v8998_v35 = vsel %vm275_vm2, %v16522_v50, -inf  ;;  %v16582_v30 = vpop.permute.xlu0 %10302 }
 0xd66   :  { %8999 = vmax.xlane.f32.xlu1 %v8998_v35 }
 0xd89   :  { %v16544_v63 = vpop.f32.mrb[100].mxu0 }
 0xd8a   :  { %v16546_v32 = vpop.f32.mrb[96].mxu1  ;;  %v13800_v21 = vpop.f32.mrb[101].mxu0  ;;  %v9007_v42 = vsel %vm275_vm2, %v16544_v63, -inf }
 0xd8b   :  { %9008 = vmax.xlane.f32.xlu0 %v9007_v42  ;;  %v13795_v26 = vpop.f32.mrb[97].mxu1  ;;  %v9004_v54 = vsel %vm275_vm2, %v16546_v32, -inf  ;;  %v16586_v21 = vpop.permute.xlu1 %10682 }
 0xd8c   :  { %9005 = vmax.xlane.f32.xlu1 %v9004_v54  ;;  %17416 = vst [vmem:[#allocation22_spill] sm:$0xff] %v16586_v21 }
 0xd8d   :  { %v16556_v1 = vpop.f32.mrb[102].mxu0 }
 0xd8e   :  { %v16558_v55 = vpop.f32.mrb[98].mxu1  ;;  %v13810_v41 = vpop.f32.mrb[103].mxu0  ;;  %v9013_v2 = vsel %vm275_vm2, %v16556_v1, -inf }
 0xd8f   :  { %9014 = vmax.xlane.f32.xlu0 %v9013_v2  ;;  %v13805_v60 = vpop.f32.mrb[99].mxu1  ;;  %v9010_v19 = vsel %vm275_vm2, %v16558_v55, -inf }
 0xd90   :  { %9011 = vmax.xlane.f32.xlu1 %v9010_v19  ;;  %v16596_v19 = vpop.permute.xlu0 %10454 }
 0xd91   :  { %v16566_v61 = vpop.f32.mrb[104].mxu0  ;;  %17417 = vst [vmem:[#allocation23_spill] sm:$0xff] %v16596_v19 }
 0xd92   :  { %v16568_v31 = vpop.f32.mrb[100].mxu1  ;;  %v13820_v11 = vpop.f32.mrb[105].mxu0  ;;  %v9019_v51 = vsel %vm275_vm2, %v16566_v61, -inf }
 0xd93   :  { %9020 = vmax.xlane.f32.xlu0 %v9019_v51  ;;  %v13815_v4 = vpop.f32.mrb[101].mxu1  ;;  %v9016_v52 = vsel %vm275_vm2, %v16568_v31, -inf }
 0xd94   :  { %9017 = vmax.xlane.f32.xlu1 %v9016_v52  ;;  %v16616_v6 = vpop.permute.xlu0 %10606 }
 0xd95   :  { %v16576_v38 = vpop.f32.mrb[106].mxu0  ;;  %17419 = vst [vmem:[#allocation8_spill] sm:$0xff] %v16616_v6 }
 0xd96   :  { %v16578_v28 = vpop.f32.mrb[102].mxu1  ;;  %v13830_v45 = vpop.f32.mrb[107].mxu0  ;;  %v9025_v24 = vsel %vm275_vm2, %v16576_v38, -inf }
 0xd97   :  { %9026 = vmax.xlane.f32.xlu0 %v9025_v24  ;;  %v13825_v10 = vpop.f32.mrb[103].mxu1  ;;  %v9022_v35 = vsel %vm275_vm2, %v16578_v28, -inf  ;;  %v16604_v45 = vpop.permute.xlu1 %10834 }
 0xd98   :  { %9023 = vmax.xlane.f32.xlu1 %v9022_v35  ;;  %17418 = vst [vmem:[#allocation24_spill] sm:$0xff] %v16604_v45  ;;  %v16634_v17 = vpop.permute.xlu0 %10758 }
 0xd99   :  { %v16588_v42 = vpop.f32.mrb[108].mxu0  ;;  %17422 = vst [vmem:[#allocation11_spill] sm:$0xff] %v16634_v17 }
 0xd9a   :  { %v16590_v26 = vpop.f32.mrb[104].mxu1  ;;  %v13840_v54 = vpop.f32.mrb[109].mxu0  ;;  %v9031_v41 = vsel %vm275_vm2, %v16588_v42, -inf }
 0xd9b   :  { %9032 = vmax.xlane.f32.xlu0 %v9031_v41  ;;  %v13835_v2 = vpop.f32.mrb[105].mxu1  ;;  %v9028_v60 = vsel %vm275_vm2, %v16590_v26, -inf }
 0xd9c   :  { %9029 = vmax.xlane.f32.xlu1 %v9028_v60  ;;  %v16638_v40 = vpop.permute.xlu0 %11138 }
 0xd9d   :  { %v16598_v11 = vpop.f32.mrb[110].mxu0  ;;  %17424 = vst [vmem:[#allocation12_spill] sm:$0xff] %v16638_v40 }
 0xd9e   :  { %v16600_v51 = vpop.f32.mrb[106].mxu1  ;;  %v13850_v4 = vpop.f32.mrb[111].mxu0  ;;  %v9037_v52 = vsel %vm275_vm2, %v16598_v11, -inf }
 0xd9f   :  { %9038 = vmax.xlane.f32.xlu0 %v9037_v52  ;;  %v13845_v24 = vpop.f32.mrb[107].mxu1  ;;  %v9034_v10 = vsel %vm275_vm2, %v16600_v51, -inf  ;;  %v16618_v52 = vpop.permute.xlu1 %10910 }
 0xda0   :  { %9035 = vmax.xlane.f32.xlu1 %v9034_v10  ;;  %17420 = vst [vmem:[#allocation10_spill] sm:$0xff] %v16618_v52 }
 0xda1   :  { %v16608_v35 = vpop.f32.mrb[112].mxu0 }
 0xda2   :  { %v16610_v54 = vpop.f32.mrb[108].mxu1  ;;  %v13860_v41 = vpop.f32.mrb[113].mxu0  ;;  %v9043_v2 = vsel %vm275_vm2, %v16608_v35, -inf }
 0xda3   :  { %9044 = vmax.xlane.f32.xlu0 %v9043_v2  ;;  %v13855_v60 = vpop.f32.mrb[109].mxu1  ;;  %v9040_v4 = vsel %vm275_vm2, %v16610_v54, -inf  ;;  %v16632_v9 = vpop.permute.xlu1 %11062 }
 0xda4   :  { %9041 = vmax.xlane.f32.xlu1 %v9040_v4  ;;  %17421 = vst [vmem:[#allocation9_spill] sm:$0xff] %v16632_v9 }
 0xda5   :  { %v16620_v24 = vpop.f32.mrb[114].mxu0 }
 0xda6   :  { %v16622_v10 = vpop.f32.mrb[110].mxu1  ;;  %v13870_v12 = vpop.f32.mrb[115].mxu0  ;;  %v9049_v41 = vsel %vm275_vm2, %v16620_v24, -inf }
 0xda7   :  { %9050 = vmax.xlane.f32.xlu0 %v9049_v41  ;;  %v13865_v39 = vpop.f32.mrb[111].mxu1  ;;  %v9046_v2 = vsel %vm275_vm2, %v16622_v10, -inf  ;;  %v16636_v12 = vpop.permute.xlu1 %11214 }
 0xda8   :  { %9047 = vmax.xlane.f32.xlu1 %v9046_v2  ;;  %17423 = vst [vmem:[#allocation13_spill] sm:$0xff] %v16636_v12  ;;  %v16642_v39 = vpop.permute.xlu0 %11290 }
 0xda9   :  { %v16628_v60 = vpop.f32.mrb[116].mxu0  ;;  %17426 = vst [vmem:[#allocation27_spill] sm:$0xff] %v16642_v39 }
 0xdaa   :  { %v16630_v58 = vpop.f32.mrb[112].mxu1  ;;  %v13880_v4 = vpop.f32.mrb[117].mxu0 }
 0xdab   :  { %v13875_v13 = vpop.f32.mrb[113].mxu1  ;;  %v16640_v41 = vpop.permute.xlu1 %11366 }
 0xdac   :  { %17425 = vst [vmem:[#allocation26_spill] sm:$0xff] %v16640_v41  ;;  %v16646_v2 = vpop.permute.xlu0 %10986 }
 0xdad   :  { %17428 = vst [vmem:[#allocation29_spill] sm:$0xff] %v16646_v2 }
 0xdaf   :  { %v16644_v45 = vpop.permute.xlu1 %10378 }
 0xdb0   :  { %17427 = vst [vmem:[#allocation28_spill] sm:$0xff] %v16644_v45 }
 0xdc1   :  { %v8967_v52 = vpop.xlane.xlu1 %8966 }
 0xdc2   :  { %v9059_v4 = vsub.f32 %v16472_v47, %v8967_v52  ;;  %v8964_v21 = vpop.xlane.xlu0 %8963  ;;  %v9055_v47 = vsel %vm275_vm2, %v16628_v60, -inf }
 0xdc3   :  { %v9058_v13 = vsub.f32 %v16474_v57, %v8964_v21 }
 0xdc4   :  { %v9092_v9 = vmul.f32 1.442695, %v9059_v4 }
 0xdc5   :  { %v9090_v17 = vmul.f32 1.442695, %v9058_v13 }
 0xdc6   :  { %14362 = vpow2.f32 %v9092_v9  ;;  %v9052_v9 = vsel %vm275_vm2, %v16630_v58, -inf }
 0xdc7   :  { %14364 = vpow2.f32 %v9090_v17 }
 0xdc9   :  { %v8973_v17 = vpop.xlane.xlu0 %8972 }
 0xdcd   :  { %v8970_v57 = vpop.xlane.xlu0 %8969 }
 0xdcf   :  { %v8976_v21 = vpop.xlane.xlu1 %8975 }
 0xdd0   :  { %v16650_v12 = vpop.eup %14362 }
 0xdd1   :  { %v16652_v40 = vpop.eup %14364  ;;  %v9157_v39 = vsel %vm275_vm2, %v16650_v12, 0.0  ;;  %v8979_v52 = vpop.xlane.xlu0 %8978 }
 0xdd2   :  { %9158 = vadd.xlane.f32.xlu0 %v9157_v39  ;;  %v9154_v41 = vsel %vm275_vm2, %v16652_v40, 0.0  ;;  %v9060_v39 = vsub.f32 %v16484_v5, %v8970_v57  ;;  %v9063_v13 = vsub.f32 %v16486_v48, %v8979_v52 }
 0xdd3   :  { %9155 = vadd.xlane.f32.xlu1 %v9154_v41  ;;  %v9061_v41 = vsub.f32 %v16480_v7, %v8973_v17 }
 0xdd4   :  { %v9094_v2 = vmul.f32 1.442695, %v9060_v39 }
 0xdd5   :  { %v9096_v4 = vmul.f32 1.442695, %v9061_v41  ;;  %v8985_v27 = vpop.xlane.xlu0 %8984 }
 0xdd6   :  { %9056 = vmax.xlane.f32.xlu0 %v9055_v47  ;;  %v8982_v47 = vpop.xlane.xlu1 %8981  ;;  %v9065_v6 = vsub.f32 %v16494_v59, %v8985_v27 }
 0xdd7   :  { %9053 = vmax.xlane.f32.xlu1 %v9052_v9  ;;  %v9062_v9 = vsub.f32 %v16490_v18, %v8976_v21  ;;  %14366 = vpow2.f32 %v9096_v4  ;;  %v9064_v19 = vsub.f32 %v16498_v0, %v8982_v47 }
 0xdd8   :  { %14368 = vpow2.f32 %v9094_v2  ;;  %v9104_v5 = vmul.f32 1.442695, %v9065_v6 }
 0xdd9   :  { %v9098_v45 = vmul.f32 1.442695, %v9062_v9  ;;  %v9102_v57 = vmul.f32 1.442695, %v9064_v19 }
 0xde1   :  { %v16676_v41 = vpop.eup %14366 }
 0xde2   :  { %v8991_v7 = vpop.xlane.xlu0 %8990  ;;  %v16678_v39 = vpop.eup %14368 }
 0xde3   :  { %v9067_v17 = vsub.f32 %v16504_v25, %v8991_v7 }
 0xde5   :  { %v9108_v52 = vmul.f32 1.442695, %v9067_v17 }
 0xde8   :  { %11518 = vrot.lane.b32.xlu1 %v16202_v3, %s14575_s29  ;;  %v9100_v3 = vmul.f32 1.442695, %v9063_v13 }
 0xdea   :  { %14370 = vpow2.f32 %v9100_v3  ;;  %v8997_v21 = vpop.xlane.xlu0 %8996 }
 0xdeb   :  { %14372 = vpow2.f32 %v9098_v45  ;;  %v9069_v59 = vsub.f32 %v16512_v15, %v8997_v21  ;;  %v9163_v15 = vsel %vm275_vm2, %v16676_v41, 0.0 }
 0xdec   :  { %11442 = vrot.lane.b32.xlu0 %v16206_v46, %s14575_s29  ;;  %v8988_v46 = vpop.xlane.xlu1 %8987  ;;  %14374 = vpow2.f32 %v9104_v5 }
 0xded   :  { %v9066_v18 = vsub.f32 %v16508_v43, %v8988_v46  ;;  %14376 = vpow2.f32 %v9102_v57  ;;  %v9112_v25 = vmul.f32 1.442695, %v9069_v59 }
 0xdee   :  { %14378 = vpow2.f32 %v9108_v52 }
 0xdef   :  { %v9106_v27 = vmul.f32 1.442695, %v9066_v18 }
 0xdf0   :  { %v8994_v48 = vpop.xlane.xlu1 %8993 }
 0xdf1   :  { %v9068_v2 = vsub.f32 %v16516_v8, %v8994_v48  ;;  %14380 = vpow2.f32 %v9106_v27  ;;  %v9160_v8 = vsel %vm275_vm2, %v16678_v39, 0.0 }
 0xdf2   :  { %v9003_v0 = vpop.xlane.xlu0 %9002  ;;  %14382 = vpow2.f32 %v9112_v25 }
 0xdf3   :  { %v9071_v19 = vsub.f32 %v16520_v16, %v9003_v0  ;;  %v9110_v43 = vmul.f32 1.442695, %v9068_v2 }
 0xdf4   :  { %v9000_v6 = vpop.xlane.xlu1 %8999  ;;  %v16684_v4 = vpop.eup %14370 }
 0xdf5   :  { %v9070_v45 = vsub.f32 %v16522_v50, %v9000_v6  ;;  %v16688_v13 = vpop.eup %14372  ;;  %v9116_v47 = vmul.f32 1.442695, %v9071_v19  ;;  %14384 = vpow2.f32 %v9110_v43  ;;  %v9169_v9 = vsel %vm275_vm2, %v16684_v4, 0.0 }
 0xdf6   :  { %v16692_v50 = vpop.eup %14374  ;;  %v9166_v3 = vsel %vm275_vm2, %v16688_v13, 0.0 }
 0xdf7   :  { %v9114_v16 = vmul.f32 1.442695, %v9070_v45  ;;  %v16696_v46 = vpop.eup %14376  ;;  %14386 = vpow2.f32 %v9116_v47  ;;  %v9175_v7 = vsel %vm275_vm2, %v16692_v50, 0.0 }
 0xdf8   :  { %v16700_v5 = vpop.eup %14378  ;;  %v9172_v17 = vsel %vm275_vm2, %v16696_v46, 0.0 }
 0xdf9   :  { %14388 = vpow2.f32 %v9114_v16  ;;  %v9181_v57 = vsel %vm275_vm2, %v16700_v5, 0.0 }
 0xdfb   :  { %v16704_v48 = vpop.eup %14380 }
 0xdfc   :  { %v16708_v18 = vpop.eup %14382  ;;  %v9178_v21 = vsel %vm275_vm2, %v16704_v48, 0.0 }
 0xdfd   :  { %v9187_v6 = vsel %vm275_vm2, %v16708_v18, 0.0 }
 0xdff   :  { %v16712_v52 = vpop.eup %14384 }
 0xe00   :  { %v9184_v43 = vsel %vm275_vm2, %v16712_v52, 0.0 }
 0xe01   :  { %v16718_v25 = vpop.eup %14386 }
 0xe02   :  { %v9193_v16 = vsel %vm275_vm2, %v16718_v25, 0.0 }
 0xe03   :  { %v16722_v45 = vpop.eup %14388 }
 0xe0b   :  { %9164 = vadd.xlane.f32.xlu0 %v9163_v15 }
 0xe0c   :  { %9161 = vadd.xlane.f32.xlu1 %v9160_v8 }
 0xe0f   :  { %9170 = vadd.xlane.f32.xlu0 %v9169_v9 }
 0xe10   :  { %9167 = vadd.xlane.f32.xlu1 %v9166_v3  ;;  %v9190_v3 = vsel %vm275_vm2, %v16722_v45, 0.0 }
 0xe13   :  { %9176 = vadd.xlane.f32.xlu0 %v9175_v7 }
 0xe14   :  { %9173 = vadd.xlane.f32.xlu1 %v9172_v17 }
 0xe17   :  { %9182 = vadd.xlane.f32.xlu0 %v9181_v57 }
 0xe18   :  { %9179 = vadd.xlane.f32.xlu1 %v9178_v21  ;;  %v9009_v59 = vpop.xlane.xlu0 %9008 }
 0xe19   :  { %v9073_v27 = vsub.f32 %v16544_v63, %v9009_v59  ;;  %v9006_v2 = vpop.xlane.xlu1 %9005 }
 0xe1a   :  { %v9072_v0 = vsub.f32 %v16546_v32, %v9006_v2 }
 0xe1b   :  { %v9120_v19 = vmul.f32 1.442695, %v9073_v27  ;;  %9188 = vadd.xlane.f32.xlu0 %v9187_v6 }
 0xe1c   :  { %v9118_v15 = vmul.f32 1.442695, %v9072_v0  ;;  %9185 = vadd.xlane.f32.xlu1 %v9184_v43  ;;  %v9015_v8 = vpop.xlane.xlu0 %9014 }
 0xe1d   :  { %14390 = vpow2.f32 %v9120_v19  ;;  %v9075_v63 = vsub.f32 %v16556_v1, %v9015_v8  ;;  %v9012_v47 = vpop.xlane.xlu1 %9011 }
 0xe1e   :  { %14392 = vpow2.f32 %v9118_v15  ;;  %v9074_v32 = vsub.f32 %v16558_v55, %v9012_v47 }
 0xe1f   :  { %v9124_v9 = vmul.f32 1.442695, %v9075_v63  ;;  %9194 = vadd.xlane.f32.xlu0 %v9193_v16 }
 0xe20   :  { %v9122_v7 = vmul.f32 1.442695, %v9074_v32  ;;  %9191 = vadd.xlane.f32.xlu1 %v9190_v3  ;;  %v9021_v17 = vpop.xlane.xlu0 %9020 }
 0xe21   :  { %14394 = vpow2.f32 %v9124_v9  ;;  %v9077_v57 = vsub.f32 %v16566_v61, %v9021_v17  ;;  %v9018_v21 = vpop.xlane.xlu1 %9017 }
 0xe22   :  { %14396 = vpow2.f32 %v9122_v7  ;;  %v9076_v1 = vsub.f32 %v16568_v31, %v9018_v21 }
 0xe23   :  { %v9128_v59 = vmul.f32 1.442695, %v9077_v57 }
 0xe24   :  { %v9126_v55 = vmul.f32 1.442695, %v9076_v1  ;;  %v9027_v27 = vpop.xlane.xlu0 %9026 }
 0xe25   :  { %14398 = vpow2.f32 %v9128_v59  ;;  %v9079_v2 = vsub.f32 %v16576_v38, %v9027_v27  ;;  %v9024_v0 = vpop.xlane.xlu1 %9023 }
 0xe26   :  { %14400 = vpow2.f32 %v9126_v55  ;;  %v9078_v6 = vsub.f32 %v16578_v28, %v9024_v0 }
 0xe27   :  { %v16734_v19 = vpop.eup %14390  ;;  %v9132_v43 = vmul.f32 1.442695, %v9079_v2 }
 0xe28   :  { %v16736_v15 = vpop.eup %14392  ;;  %v9130_v61 = vmul.f32 1.442695, %v9078_v6  ;;  %v9033_v8 = vpop.xlane.xlu0 %9032  ;;  %v9199_v31 = vsel %vm275_vm2, %v16734_v19, 0.0 }
 0xe29   :  { %14402 = vpow2.f32 %v9132_v43  ;;  %v9081_v63 = vsub.f32 %v16588_v42, %v9033_v8  ;;  %v9030_v47 = vpop.xlane.xlu1 %9029  ;;  %9200 = vadd.xlane.f32.xlu0 %v9199_v31  ;;  %v9196_v38 = vsel %vm275_vm2, %v16736_v15, 0.0 }
 0xe2a   :  { %14404 = vpow2.f32 %v9130_v61  ;;  %v9080_v28 = vsub.f32 %v16590_v26, %v9030_v47  ;;  %9197 = vadd.xlane.f32.xlu1 %v9196_v38 }
 0xe2b   :  { %v16744_v32 = vpop.eup %14394  ;;  %v9136_v16 = vmul.f32 1.442695, %v9081_v63 }
 0xe2c   :  { %v16746_v9 = vpop.eup %14396  ;;  %v9134_v3 = vmul.f32 1.442695, %v9080_v28  ;;  %v9039_v7 = vpop.xlane.xlu0 %9038  ;;  %v9205_v17 = vsel %vm275_vm2, %v16744_v32, 0.0 }
 0xe2d   :  { %14406 = vpow2.f32 %v9136_v16  ;;  %v9083_v42 = vsub.f32 %v16598_v11, %v9039_v7  ;;  %v9036_v57 = vpop.xlane.xlu1 %9035  ;;  %9206 = vadd.xlane.f32.xlu0 %v9205_v17  ;;  %v9202_v21 = vsel %vm275_vm2, %v16746_v9, 0.0 }
 0xe2e   :  { %14408 = vpow2.f32 %v9134_v3  ;;  %v9082_v26 = vsub.f32 %v16600_v51, %v9036_v57  ;;  %9203 = vadd.xlane.f32.xlu1 %v9202_v21 }
 0xe2f   :  { %v16754_v1 = vpop.eup %14398  ;;  %v9140_v59 = vmul.f32 1.442695, %v9083_v42 }
 0xe30   :  { %v16756_v55 = vpop.eup %14400  ;;  %v9138_v27 = vmul.f32 1.442695, %v9082_v26  ;;  %v9045_v2 = vpop.xlane.xlu0 %9044  ;;  %v9211_v0 = vsel %vm275_vm2, %v16754_v1, 0.0 }
 0xe31   :  { %14410 = vpow2.f32 %v9140_v59  ;;  %v9085_v11 = vsub.f32 %v16608_v35, %v9045_v2  ;;  %v9042_v6 = vpop.xlane.xlu1 %9041  ;;  %9212 = vadd.xlane.f32.xlu0 %v9211_v0  ;;  %v9208_v43 = vsel %vm275_vm2, %v16756_v55, 0.0 }
 0xe32   :  { %14412 = vpow2.f32 %v9138_v27  ;;  %v9084_v51 = vsub.f32 %v16610_v54, %v9042_v6  ;;  %9209 = vadd.xlane.f32.xlu1 %v9208_v43 }
 0xe33   :  { %v16764_v61 = vpop.eup %14402  ;;  %v9144_v8 = vmul.f32 1.442695, %v9085_v11 }
 0xe34   :  { %v16766_v31 = vpop.eup %14404  ;;  %v9142_v63 = vmul.f32 1.442695, %v9084_v51  ;;  %v9051_v47 = vpop.xlane.xlu0 %9050  ;;  %v9217_v38 = vsel %vm275_vm2, %v16764_v61, 0.0 }
 0xe35   :  { %14414 = vpow2.f32 %v9144_v8  ;;  %v9087_v35 = vsub.f32 %v16620_v24, %v9051_v47  ;;  %v9048_v28 = vpop.xlane.xlu1 %9047  ;;  %9218 = vadd.xlane.f32.xlu0 %v9217_v38  ;;  %v9214_v16 = vsel %vm275_vm2, %v16766_v31, 0.0 }
 0xe36   :  { %14416 = vpow2.f32 %v9142_v63  ;;  %v9086_v54 = vsub.f32 %v16622_v10, %v9048_v28  ;;  %9215 = vadd.xlane.f32.xlu1 %v9214_v16 }
 0xe37   :  { %v16774_v3 = vpop.eup %14406  ;;  %v9148_v7 = vmul.f32 1.442695, %v9087_v35 }
 0xe38   :  { %v16776_v17 = vpop.eup %14408  ;;  %v9146_v42 = vmul.f32 1.442695, %v9086_v54  ;;  %v9223_v57 = vsel %vm275_vm2, %v16774_v3, 0.0 }
 0xe39   :  { %14418 = vpow2.f32 %v9148_v7  ;;  %9224 = vadd.xlane.f32.xlu0 %v9223_v57  ;;  %v9220_v24 = vsel %vm275_vm2, %v16776_v17, 0.0 }
 0xe3a   :  { %14420 = vpow2.f32 %v9146_v42  ;;  %9221 = vadd.xlane.f32.xlu1 %v9220_v24 }
 0xe3b   :  { %v16782_v21 = vpop.eup %14410 }
 0xe3c   :  { %v16784_v10 = vpop.eup %14412  ;;  %v9229_v26 = vsel %vm275_vm2, %v16782_v21, 0.0 }
 0xe3d   :  { %9230 = vadd.xlane.f32.xlu0 %v9229_v26  ;;  %v9226_v59 = vsel %vm275_vm2, %v16784_v10, 0.0 }
 0xe3e   :  { %9227 = vadd.xlane.f32.xlu1 %v9226_v59 }
 0xe3f   :  { %v16790_v27 = vpop.eup %14414 }
 0xe40   :  { %v16792_v2 = vpop.eup %14416  ;;  %v9235_v0 = vsel %vm275_vm2, %v16790_v27, 0.0 }
 0xe41   :  { %9236 = vadd.xlane.f32.xlu0 %v9235_v0  ;;  %v9232_v11 = vsel %vm275_vm2, %v16792_v2, 0.0 }
 0xe42   :  { %9233 = vadd.xlane.f32.xlu1 %v9232_v11 }
 0xe43   :  { %v16798_v6 = vpop.eup %14418 }
 0xe44   :  { %v16800_v43 = vpop.eup %14420  ;;  %v9241_v51 = vsel %vm275_vm2, %v16798_v6, 0.0 }
 0xe45   :  { %9242 = vadd.xlane.f32.xlu0 %v9241_v51  ;;  %v9238_v8 = vsel %vm275_vm2, %v16800_v43, 0.0 }
 0xe46   :  { %9239 = vadd.xlane.f32.xlu1 %v9238_v8 }
 0xe5f   :  { %v9159_v63 = vpop.xlane.xlu0 %9158 }
 0xe60   :  { %14422 = vrcp.f32 %v9159_v63  ;;  %v9156_v47 = vpop.xlane.xlu1 %9155 }
 0xe61   :  { %14424 = vrcp.f32 %v9156_v47 }
 0xe63   :  { %v9057_v38 = vpop.xlane.xlu0 %9056 }
 0xe64   :  { %v9089_v35 = vsub.f32 %v16628_v60, %v9057_v38  ;;  %v9054_v28 = vpop.xlane.xlu1 %9053 }
 0xe65   :  { %v9088_v16 = vsub.f32 %v16630_v58, %v9054_v28 }
 0xe66   :  { %v9152_v54 = vmul.f32 1.442695, %v9089_v35 }
 0xe67   :  { %v9150_v7 = vmul.f32 1.442695, %v9088_v16  ;;  %v16832_v60 = vpop.permute.xlu0 %11442 }
 0xe68   :  { %14426 = vpow2.f32 %v9152_v54 }
 0xe69   :  { %14428 = vpow2.f32 %v9150_v7 }
 0xe6a   :  { %v14423_v42 = vpop.eup %14422 }
 0xe6b   :  { %v14425_v57 = vpop.eup %14424  ;;  %v9283_v24 = vmul.f32 %v14423_v42, %v16650_v12  ;;  %v16834_v12 = vpop.permute.xlu1 %11518 }
 0xe6c   :  { %v9282_v26 = vmul.f32 %v14425_v57, %v16652_v40 }
 0xe6d   :  { %13889 = vmatmul.mubr.msk.f32.vlgmr.msra.gmra.mrb[118].mxu0 %vm275_vm2, %v9283_v24 }
 0xe6e   :  { %13897 = vmatpush3.msra.mxu0 %v16532_v33  ;;  %13884 = vmatmul.mubr.msk.f32.vlgmr.msra.gmra.mrb[114].mxu1 %vm275_vm2, %v9282_v26 }
 0xe6f   :  { %13892 = vmatpush3.msra.mxu1 %v16528_v53  ;;  %13898 = vmatprep.mubr.msk.f32.mxu0 %vm14580_vm1, %v17388_v49 }
 0xe70   :  { %13906 = vmatprep.subr.mxu0 %v17388_v49  ;;  %13893 = vmatprep.mubr.msk.f32.mxu1 %vm14580_vm1, %v17388_v49 }
 0xe71   :  { %13901 = vmatprep.subr.mxu1 %v17388_v49 }
 0xe72   :  { %v16820_v58 = vpop.eup %14426 }
 0xe73   :  { %v16822_v40 = vpop.eup %14428  ;;  %v9247_v33 = vsel %vm275_vm2, %v16820_v58, 0.0 }
 0xe74   :  { %9248 = vadd.xlane.f32.xlu0 %v9247_v33  ;;  %v9244_v53 = vsel %vm275_vm2, %v16822_v40, 0.0 }
 0xe75   :  { %9245 = vadd.xlane.f32.xlu1 %v9244_v53  ;;  %v17429_v53 = vld [vmem:[#allocation23_spill] sm:$0xff] }
 0xe86   :  { %11670 = vrot.lane.b32.xlu1 %v16220_v44, %s14575_s29 }
 0xe8a   :  { %11594 = vrot.lane.b32.xlu0 %v16226_v56, %s14575_s29 }
 0xe98   :  { %v9165_v59 = vpop.xlane.xlu0 %9164 }
 0xe99   :  { %14430 = vrcp.f32 %v9165_v59  ;;  %v9162_v0 = vpop.xlane.xlu1 %9161 }
 0xe9a   :  { %14432 = vrcp.f32 %v9162_v0 }
 0xe9c   :  { %v9171_v11 = vpop.xlane.xlu0 %9170 }
 0xe9d   :  { %14434 = vrcp.f32 %v9171_v11  ;;  %v9168_v51 = vpop.xlane.xlu1 %9167 }
 0xe9e   :  { %14436 = vrcp.f32 %v9168_v51 }
 0xea0   :  { %v9177_v8 = vpop.xlane.xlu0 %9176 }
 0xea1   :  { %14438 = vrcp.f32 %v9177_v8  ;;  %v9174_v63 = vpop.xlane.xlu1 %9173 }
 0xea2   :  { %14440 = vrcp.f32 %v9174_v63 }
 0xea3   :  { %v14431_v44 = vpop.eup %14430 }
 0xea4   :  { %v14433_v47 = vpop.eup %14432  ;;  %v9285_v56 = vmul.f32 %v14431_v44, %v16676_v41  ;;  %v9183_v38 = vpop.xlane.xlu0 %9182 }
 0xea5   :  { %v9284_v35 = vmul.f32 %v14433_v47, %v16678_v39  ;;  %14442 = vrcp.f32 %v9183_v38  ;;  %v9180_v28 = vpop.xlane.xlu1 %9179 }
 0xea6   :  { %14444 = vrcp.f32 %v9180_v28  ;;  %13899 = vmatmul.mubr.msk.f32.vlgmr.msra.gmra.mrb[120].mxu0 %vm275_vm2, %v9285_v56  ;;  %v17431_v56 = vld [vmem:[#allocation8_spill] sm:$0xff]  ;;  %v17432_v28 = vld [vmem:[#allocation21_spill] sm:$0xff] }
 0xea7   :  { %v14435_v16 = vpop.eup %14434  ;;  %13907 = vmatpush3.msra.mxu0 %v16536_v34  ;;  %13894 = vmatmul.mubr.msk.f32.vlgmr.msra.gmra.mrb[116].mxu1 %vm275_vm2, %v9284_v35 }
 0xea8   :  { %v14437_v54 = vpop.eup %14436  ;;  %v9287_v7 = vmul.f32 %v14435_v16, %v16684_v4  ;;  %13902 = vmatpush3.msra.mxu1 %v16530_v62  ;;  %v9189_v42 = vpop.xlane.xlu0 %9188  ;;  %13908 = vmatprep.mubr.msk.f32.mxu0 %vm14580_vm1, %v17388_v49 }
 0xea9   :  { %v9286_v41 = vmul.f32 %v14437_v54, %v16688_v13  ;;  %14446 = vrcp.f32 %v9189_v42  ;;  %v9186_v39 = vpop.xlane.xlu1 %9185  ;;  %13916 = vmatprep.subr.mxu0 %v17388_v49  ;;  %13903 = vmatprep.mubr.msk.f32.mxu1 %vm14580_vm1, %v17388_v49  ;;  %v17433_v54 = vld [vmem:[#allocation11_spill] sm:$0xff]  ;;  %v17434_v42 = vld [vmem:[#allocation22_spill] sm:$0xff] }
 0xeaa   :  { %14448 = vrcp.f32 %v9186_v39  ;;  %13909 = vmatmul.mubr.msk.f32.vlgmr.msra.gmra.mrb[122].mxu0 %vm275_vm2, %v9287_v7  ;;  %13911 = vmatprep.subr.mxu1 %v17388_v49 }
 0xeab   :  { %v14439_v34 = vpop.eup %14438  ;;  %13917 = vmatpush3.msra.mxu0 %v16540_v20  ;;  %13904 = vmatmul.mubr.msk.f32.vlgmr.msra.gmra.mrb[118].mxu1 %vm275_vm2, %v9286_v41 }
 0xeac   :  { %v14441_v62 = vpop.eup %14440  ;;  %v9289_v4 = vmul.f32 %v14439_v34, %v16692_v50  ;;  %13912 = vmatpush3.msra.mxu1 %v16534_v29  ;;  %v9195_v13 = vpop.xlane.xlu0 %9194  ;;  %13918 = vmatprep.mubr.msk.f32.mxu0 %vm14580_vm1, %v17388_v49 }
 0xead   :  { %v9288_v57 = vmul.f32 %v14441_v62, %v16696_v46  ;;  %14450 = vrcp.f32 %v9195_v13  ;;  %v9192_v24 = vpop.xlane.xlu1 %9191  ;;  %13926 = vmatprep.subr.mxu0 %v17388_v49  ;;  %13913 = vmatprep.mubr.msk.f32.mxu1 %vm14580_vm1, %v17388_v49  ;;  %v17435_v62 = vld [vmem:[#allocation10_spill] sm:$0xff]  ;;  %v17436_v13 = vld [vmem:[#allocation24_spill] sm:$0xff] }
 0xeae   :  { %14452 = vrcp.f32 %v9192_v24  ;;  %13919 = vmatmul.mubr.msk.f32.vlgmr.msra.gmra.mrb[124].mxu0 %vm275_vm2, %v9289_v4  ;;  %13921 = vmatprep.subr.mxu1 %v17388_v49 }
 0xeaf   :  { %v14443_v20 = vpop.eup %14442  ;;  %13927 = vmatpush3.msra.mxu0 %v16550_v37  ;;  %13914 = vmatmul.mubr.msk.f32.vlgmr.msra.gmra.mrb[120].mxu1 %vm275_vm2, %v9288_v57 }
 0xeb0   :  { %v14445_v29 = vpop.eup %14444  ;;  %v9291_v50 = vmul.f32 %v14443_v20, %v16700_v5  ;;  %13922 = vmatpush3.msra.mxu1 %v16538_v14  ;;  %13928 = vmatprep.mubr.msk.f32.mxu0 %vm14580_vm1, %v17388_v49 }
 0xeb1   :  { %v9290_v46 = vmul.f32 %v14445_v29, %v16704_v48  ;;  %13936 = vmatprep.subr.mxu0 %v17388_v49  ;;  %13923 = vmatprep.mubr.msk.f32.mxu1 %vm14580_vm1, %v17388_v49  ;;  %v17437_v29 = vld [vmem:[#allocation9_spill] sm:$0xff] }
 0xeb2   :  { %13929 = vmatmul.mubr.msk.f32.vlgmr.msra.gmra.mrb[126].mxu0 %vm275_vm2, %v9291_v50  ;;  %13931 = vmatprep.subr.mxu1 %v17388_v49 }
 0xeb3   :  { %v14447_v37 = vpop.eup %14446  ;;  %13937 = vmatpush3.msra.mxu0 %v16564_v23  ;;  %13924 = vmatmul.mubr.msk.f32.vlgmr.msra.gmra.mrb[122].mxu1 %vm275_vm2, %v9290_v46  ;;  %v17438_v46 = vld [vmem:[#allocation29_spill] sm:$0xff] }
 0xeb4   :  { %v14449_v14 = vpop.eup %14448  ;;  %v9293_v5 = vmul.f32 %v14447_v37, %v16708_v18  ;;  %13932 = vmatpush3.msra.mxu1 %v16542_v36  ;;  %13938 = vmatprep.mubr.msk.f32.mxu0 %vm14580_vm1, %v17388_v49 }
 0xeb5   :  { %v9292_v48 = vmul.f32 %v14449_v14, %v16712_v52  ;;  %13946 = vmatprep.subr.mxu0 %v17388_v49  ;;  %13933 = vmatprep.mubr.msk.f32.mxu1 %vm14580_vm1, %v17388_v49 }
 0xeb6   :  { %13939 = vmatmul.mubr.msk.f32.vlgmr.msra.gmra.mrb[128].mxu0 %vm275_vm2, %v9293_v5  ;;  %13941 = vmatprep.subr.mxu1 %v17388_v49  ;;  %v9201_v23 = vpop.xlane.xlu0 %9200 }
 0xeb7   :  { %v14451_v26 = vpop.eup %14450  ;;  %13947 = vmatpush3.msra.mxu0 %v16582_v30  ;;  %14454 = vrcp.f32 %v9201_v23  ;;  %13934 = vmatmul.mubr.msk.f32.vlgmr.msra.gmra.mrb[124].mxu1 %vm275_vm2, %v9292_v48  ;;  %v9198_v36 = vpop.xlane.xlu1 %9197  ;;  %v17439_v48 = vld [vmem:[#allocation13_spill] sm:$0xff] }
 0xeb8   :  { %v14453_v18 = vpop.eup %14452  ;;  %v9295_v52 = vmul.f32 %v14451_v26, %v16718_v25  ;;  %13942 = vmatpush3.msra.mxu1 %v16554_v22  ;;  %14456 = vrcp.f32 %v9198_v36  ;;  %13948 = vmatprep.mubr.msk.f32.mxu0 %vm14580_vm1, %v17388_v49  ;;  %v17430_v25 = vld [vmem:[#allocation28_spill] sm:$0xff] }
 0xeb9   :  { %v9294_v33 = vmul.f32 %v14453_v18, %v16722_v45  ;;  %13956 = vmatprep.subr.mxu0 %v17388_v49  ;;  %13943 = vmatprep.mubr.msk.f32.mxu1 %vm14580_vm1, %v17388_v49  ;;  %v17440_v26 = vld [vmem:[#allocation12_spill] sm:$0xff] }
 0xeba   :  { %13949 = vmatmul.mubr.msk.f32.vlgmr.msra.gmra.mrb[130].mxu0 %vm275_vm2, %v9295_v52  ;;  %13951 = vmatprep.subr.mxu1 %v17388_v49  ;;  %v9207_v30 = vpop.xlane.xlu0 %9206  ;;  %v17441_v52 = vld [vmem:[#allocation26_spill] sm:$0xff] }
 0xebb   :  { %13957 = vmatpush3.msra.mxu0 %v17429_v53  ;;  %14458 = vrcp.f32 %v9207_v30  ;;  %13944 = vmatmul.mubr.msk.f32.vlgmr.msra.gmra.mrb[126].mxu1 %vm275_vm2, %v9294_v33  ;;  %v9204_v22 = vpop.xlane.xlu1 %9203  ;;  %v17442_v30 = vld [vmem:[#allocation27_spill] sm:$0xff] }
 0xebc   :  { %13952 = vmatpush3.msra.mxu1 %v17430_v25  ;;  %14460 = vrcp.f32 %v9204_v22  ;;  %13958 = vmatprep.mubr.msk.f32.mxu0 %vm14580_vm1, %v17388_v49 }
 0xebd   :  { %13966 = vmatprep.subr.mxu0 %v17388_v49  ;;  %13953 = vmatprep.mubr.msk.f32.mxu1 %vm14580_vm1, %v17388_v49 }
 0xebe   :  { %v9213_v45 = vpop.xlane.xlu0 %9212  ;;  %13961 = vmatprep.subr.mxu1 %v17388_v49 }
 0xebf   :  { %14462 = vrcp.f32 %v9213_v45  ;;  %v9210_v59 = vpop.xlane.xlu1 %9209 }
 0xec0   :  { %14464 = vrcp.f32 %v9210_v59 }
 0xec1   :  { %v14455_v0 = vpop.eup %14454 }
 0xec2   :  { %v14457_v11 = vpop.eup %14456  ;;  %v9297_v51 = vmul.f32 %v14455_v0, %v16734_v19  ;;  %v9219_v8 = vpop.xlane.xlu0 %9218 }
 0xec3   :  { %v9296_v63 = vmul.f32 %v14457_v11, %v16736_v15  ;;  %14466 = vrcp.f32 %v9219_v8  ;;  %v9216_v44 = vpop.xlane.xlu1 %9215 }
 0xec4   :  { %14468 = vrcp.f32 %v9216_v44  ;;  %13959 = vmatmul.mubr.msk.f32.vlgmr.msra.gmra.mrb[132].mxu0 %vm275_vm2, %v9297_v51 }
 0xec5   :  { %v14459_v47 = vpop.eup %14458  ;;  %13967 = vmatpush3.msra.mxu0 %v17431_v56  ;;  %13954 = vmatmul.mubr.msk.f32.vlgmr.msra.gmra.mrb[128].mxu1 %vm275_vm2, %v9296_v63 }
 0xec6   :  { %v14461_v38 = vpop.eup %14460  ;;  %v9299_v35 = vmul.f32 %v14459_v47, %v16744_v32  ;;  %13962 = vmatpush3.msra.mxu1 %v17432_v28  ;;  %v9225_v16 = vpop.xlane.xlu0 %9224  ;;  %13968 = vmatprep.mubr.msk.f32.mxu0 %vm14580_vm1, %v17388_v49 }
 0xec7   :  { %v9298_v19 = vmul.f32 %v14461_v38, %v16746_v9  ;;  %14470 = vrcp.f32 %v9225_v16  ;;  %v9222_v15 = vpop.xlane.xlu1 %9221  ;;  %13976 = vmatprep.subr.mxu0 %v17388_v49  ;;  %13963 = vmatprep.mubr.msk.f32.mxu1 %vm14580_vm1, %v17388_v49 }
 0xec8   :  { %14472 = vrcp.f32 %v9222_v15  ;;  %13969 = vmatmul.mubr.msk.f32.vlgmr.msra.gmra.mrb[134].mxu0 %vm275_vm2, %v9299_v35  ;;  %13971 = vmatprep.subr.mxu1 %v17388_v49 }
 0xec9   :  { %v14463_v32 = vpop.eup %14462  ;;  %13977 = vmatpush3.msra.mxu0 %v17433_v54  ;;  %13964 = vmatmul.mubr.msk.f32.vlgmr.msra.gmra.mrb[130].mxu1 %vm275_vm2, %v9298_v19 }
 0xeca   :  { %v14465_v7 = vpop.eup %14464  ;;  %v9301_v9 = vmul.f32 %v14463_v32, %v16754_v1  ;;  %13972 = vmatpush3.msra.mxu1 %v17434_v42  ;;  %v9231_v41 = vpop.xlane.xlu0 %9230  ;;  %13978 = vmatprep.mubr.msk.f32.mxu0 %vm14580_vm1, %v17388_v49 }
 0xecb   :  { %v9300_v39 = vmul.f32 %v14465_v7, %v16756_v55  ;;  %14474 = vrcp.f32 %v9231_v41  ;;  %v9228_v34 = vpop.xlane.xlu1 %9227  ;;  %13986 = vmatprep.subr.mxu0 %v17388_v49  ;;  %13973 = vmatprep.mubr.msk.f32.mxu1 %vm14580_vm1, %v17388_v49 }
 0xecc   :  { %14476 = vrcp.f32 %v9228_v34  ;;  %13979 = vmatmul.mubr.msk.f32.vlgmr.msra.gmra.mrb[136].mxu0 %vm275_vm2, %v9301_v9  ;;  %13981 = vmatprep.subr.mxu1 %v17388_v49 }
 0xecd   :  { %v14467_v1 = vpop.eup %14466  ;;  %13987 = vmatpush3.msra.mxu0 %v17435_v62  ;;  %13974 = vmatmul.mubr.msk.f32.vlgmr.msra.gmra.mrb[132].mxu1 %vm275_vm2, %v9300_v39 }
 0xece   :  { %v14469_v4 = vpop.eup %14468  ;;  %v9303_v55 = vmul.f32 %v14467_v1, %v16764_v61  ;;  %13982 = vmatpush3.msra.mxu1 %v17436_v13  ;;  %v9237_v57 = vpop.xlane.xlu0 %9236  ;;  %13988 = vmatprep.mubr.msk.f32.mxu0 %vm14580_vm1, %v17388_v49 }
 0xecf   :  { %v9302_v24 = vmul.f32 %v14469_v4, %v16766_v31  ;;  %14478 = vrcp.f32 %v9237_v57  ;;  %v9234_v20 = vpop.xlane.xlu1 %9233  ;;  %13996 = vmatprep.subr.mxu0 %v17388_v49  ;;  %13983 = vmatprep.mubr.msk.f32.mxu1 %vm14580_vm1, %v17388_v49 }
 0xed0   :  { %14480 = vrcp.f32 %v9234_v20  ;;  %13989 = vmatmul.mubr.msk.f32.vlgmr.msra.gmra.mrb[138].mxu0 %vm275_vm2, %v9303_v55  ;;  %13991 = vmatprep.subr.mxu1 %v17388_v49 }
 0xed1   :  { %v14471_v61 = vpop.eup %14470  ;;  %13997 = vmatpush3.msra.mxu0 %v17437_v29  ;;  %13984 = vmatmul.mubr.msk.f32.vlgmr.msra.gmra.mrb[134].mxu1 %vm275_vm2, %v9302_v24  ;;  %v12775_v29 = vld [vmem:[%s17341_s3 + $0x28] sm:$0xff] }
 0xed2   :  { %v14473_v50 = vpop.eup %14472  ;;  %v9305_v31 = vmul.f32 %v14471_v61, %v16774_v3  ;;  %13992 = vmatpush3.msra.mxu1 %v17438_v46  ;;  %v9243_v37 = vpop.xlane.xlu0 %9242  ;;  %13998 = vmatprep.mubr.msk.f32.mxu0 %vm14580_vm1, %v17388_v49  ;;  %v12774_v61 = vld [vmem:[%s17341_s3 + $0x20] sm:$0xff] }
 0xed3   :  { %v9304_v14 = vmul.f32 %v14473_v50, %v16776_v17  ;;  %14482 = vrcp.f32 %v9243_v37  ;;  %v9240_v5 = vpop.xlane.xlu1 %9239  ;;  %14006 = vmatprep.subr.mxu0 %v17388_v49  ;;  %13993 = vmatprep.mubr.msk.f32.mxu1 %vm14580_vm1, %v17388_v49  ;;  %v14157_v50 = vpack.c.bf16 %v12775_v29, %v12774_v61 }
 0xed4   :  { %14484 = vrcp.f32 %v9240_v5  ;;  %13999 = vmatmul.mubr.msk.f32.vlgmr.msra.gmra.mrb[140].mxu0 %vm275_vm2, %v9305_v31  ;;  %14001 = vmatprep.subr.mxu1 %v17388_v49  ;;  %v12776_v5 = vld [vmem:[%s17341_s3 + $0x30] sm:$0xff] }
 0xed5   :  { %v14475_v3 = vpop.eup %14474  ;;  %14007 = vmatpush3.msra.mxu0 %v17439_v48  ;;  %13994 = vmatmul.mubr.msk.f32.vlgmr.msra.gmra.mrb[136].mxu1 %vm275_vm2, %v9304_v14 }
 0xed6   :  { %v14477_v23 = vpop.eup %14476  ;;  %v9307_v17 = vmul.f32 %v14475_v3, %v16782_v21  ;;  %14002 = vmatpush3.msra.mxu1 %v17440_v26  ;;  %14008 = vmatprep.mubr.msk.f32.mxu0 %vm14580_vm1, %v17388_v49  ;;  %v12777_v3 = vld [vmem:[%s17341_s3 + $0x38] sm:$0xff] }
 0xed7   :  { %v9306_v36 = vmul.f32 %v14477_v23, %v16784_v10  ;;  %14016 = vmatprep.subr.mxu0 %v17388_v49  ;;  %14003 = vmatprep.mubr.msk.f32.mxu1 %vm14580_vm1, %v17388_v49  ;;  %v14161_v48 = vpack.c.bf16 %v12777_v3, %v12776_v5 }
 0xed8   :  { %14009 = vmatmul.mubr.msk.f32.vlgmr.msra.gmra.mrb[142].mxu0 %vm275_vm2, %v9307_v17  ;;  %14011 = vmatprep.subr.mxu1 %v17388_v49 }
 0xed9   :  { %v14479_v18 = vpop.eup %14478  ;;  %14017 = vmatpush3.msra.mxu0 %v17441_v52  ;;  %14004 = vmatmul.mubr.msk.f32.vlgmr.msra.gmra.mrb[138].mxu1 %vm275_vm2, %v9306_v36 }
 0xeda   :  { %v14481_v21 = vpop.eup %14480  ;;  %v9309_v33 = vmul.f32 %v14479_v18, %v16790_v27  ;;  %14012 = vmatpush3.msra.mxu1 %v17442_v30  ;;  %14018 = vmatprep.mubr.msk.f32.mxu0 %vm14580_vm1, %v17388_v49 }
 0xedb   :  { %v9308_v10 = vmul.f32 %v14481_v21, %v16792_v2  ;;  %14026 = vmatprep.subr.mxu0 %v17388_v49  ;;  %14013 = vmatprep.mubr.msk.f32.mxu1 %vm14580_vm1, %v17388_v49 }
 0xedc   :  { %14019 = vmatmul.mubr.msk.f32.vlgmr.msra.gmra.mrb[144].mxu0 %vm275_vm2, %v9309_v33  ;;  %14021 = vmatprep.subr.mxu1 %v17388_v49 }
 0xedd   :  { %v14483_v53 = vpop.eup %14482  ;;  %14027 = vmatpush3.msra.mxu0 %v16834_v12  ;;  %14014 = vmatmul.mubr.msk.f32.vlgmr.msra.gmra.mrb[140].mxu1 %vm275_vm2, %v9308_v10 }
 0xede   :  { %v14485_v27 = vpop.eup %14484  ;;  %v9311_v22 = vmul.f32 %v14483_v53, %v16798_v6  ;;  %14022 = vmatpush3.msra.mxu1 %v16832_v60  ;;  %14028 = vmatprep.mubr.msk.f32.mxu0 %vm14580_vm1, %v17388_v49 }
 0xedf   :  { %v9310_v2 = vmul.f32 %v14485_v27, %v16800_v43  ;;  %14023 = vmatprep.mubr.msk.f32.mxu1 %vm14580_vm1, %v17388_v49  ;;  %14031 = vmatprep.subr.mxu1 %v17388_v49 }
 0xee0   :  { %14029 = vmatmul.mubr.msk.f32.vlgmr.msra.gmra.mrb[146].mxu0 %vm275_vm2, %v9311_v22  ;;  %14036 = vmatprep.subr.mxu0 %v17388_v49 }
 0xee1   :  { %14024 = vmatmul.mubr.msk.f32.vlgmr.msra.gmra.mrb[142].mxu1 %vm275_vm2, %v9310_v2  ;;  %14038 = vmatprep.mubr.msk.f32.mxu0 %vm14580_vm1, %v17388_v49 }
 0xee2   :  { %14033 = vmatprep.mubr.msk.f32.mxu1 %vm14580_vm1, %v17388_v49 }
 0xf01   :  { %v9249_v6 = vpop.xlane.xlu0 %9248 }
 0xf02   :  { %14486 = vrcp.f32 %v9249_v6  ;;  %v9246_v43 = vpop.xlane.xlu1 %9245 }
 0xf03   :  { %14488 = vrcp.f32 %v9246_v43 }
 0xf05   :  { %v11595_v60 = vpop.permute.xlu0 %11594 }
 0xf06   :  { %v11671_v12 = vpop.permute.xlu1 %11670  ;;  %14032 = vmatpush3.msra.mxu1 %v11595_v60 }
 0xf07   :  { %14037 = vmatpush3.msra.mxu0 %v11671_v12  ;;  %14158 = vmatprep.subr.bf16.mxu1 %v14157_v50 }
 0xf0c   :  { %v14487_v25 = vpop.eup %14486 }
 0xf0d   :  { %v14489_v45 = vpop.eup %14488  ;;  %v9313_v59 = vmul.f32 %v14487_v25, %v16820_v58 }
 0xf0e   :  { %v9312_v0 = vmul.f32 %v14489_v45, %v16822_v40 }
 0xf0f   :  { %14039 = vmatmul.mubr.msk.f32.vlgmr.msra.gmra.mrb[148].mxu0 %vm275_vm2, %v9313_v59 }
 0xf10   :  { %14034 = vmatmul.mubr.msk.f32.vlgmr.msra.gmra.mrb[144].mxu1 %vm275_vm2, %v9312_v0 }
 0xf11   :  { %14160 = vmatpush3.bf16.msra.mxu1 %v14157_v50 }
 0xf12   :  { %14162 = vmatprep.subr.bf16.mxu1 %v14161_v48 }
 0xf15   :  { %14164 = vmatpush3.bf16.msra.mxu1 %v14161_v48 }
 0xf40   :  { %v17004_v11 = vpop.f32.mrb[118].mxu0 }
 0xf41   :  { %v17006_v49 = vpop.f32.mrb[114].mxu1  ;;  %v13890_v51 = vpop.f32.mrb[119].mxu0 }
 0xf42   :  { %v13885_v8 = vpop.f32.mrb[115].mxu1 }
 0xf79   :  { %v17008_v63 = vpop.f32.mrb[120].mxu0 }
 0xf7a   :  { %v17010_v44 = vpop.f32.mrb[116].mxu1  ;;  %v13900_v47 = vpop.f32.mrb[121].mxu0 }
 0xf7b   :  { %v13895_v56 = vpop.f32.mrb[117].mxu1 }
 0xf7d   :  { %v17012_v38 = vpop.f32.mrb[122].mxu0 }
 0xf7e   :  { %v17014_v58 = vpop.f32.mrb[118].mxu1  ;;  %v13910_v40 = vpop.f32.mrb[123].mxu0 }
 0xf7f   :  { %v13905_v35 = vpop.f32.mrb[119].mxu1 }
 0xf81   :  { %v17016_v28 = vpop.f32.mrb[124].mxu0 }
 0xf82   :  { %v17018_v16 = vpop.f32.mrb[120].mxu1  ;;  %v13920_v19 = vpop.f32.mrb[125].mxu0 }
 0xf83   :  { %v13915_v15 = vpop.f32.mrb[121].mxu1 }
 0xf85   :  { %v10070_v32 = vpop.f32.mrb[126].mxu0 }
 0xf86   :  { %v9994_v54 = vpop.f32.mrb[122].mxu1  ;;  %11756 = vrot.lane.b32.xlu1 %v10070_v32, %s14581_s18  ;;  %v13930_v7 = vpop.f32.mrb[127].mxu0 }
 0xf87   :  { %v13925_v9 = vpop.f32.mrb[123].mxu1  ;;  %11754 = vrot.lane.b32.xlu0 %v9994_v54, %s14581_s18 }
 0xf89   :  { %v10222_v42 = vpop.f32.mrb[128].mxu0 }
 0xf8a   :  { %v10146_v41 = vpop.f32.mrb[124].mxu1  ;;  %11760 = vrot.lane.b32.xlu1 %v10222_v42, %s14581_s18  ;;  %v13940_v39 = vpop.f32.mrb[129].mxu0 }
 0xf8b   :  { %v13935_v34 = vpop.f32.mrb[125].mxu1  ;;  %11758 = vrot.lane.b32.xlu0 %v10146_v41, %s14581_s18 }
 0xf8d   :  { %v10374_v1 = vpop.f32.mrb[130].mxu0 }
 0xf8e   :  { %v10298_v62 = vpop.f32.mrb[126].mxu1  ;;  %11764 = vrot.lane.b32.xlu1 %v10374_v1, %s14581_s18  ;;  %v13950_v4 = vpop.f32.mrb[131].mxu0 }
 0xf8f   :  { %v13945_v55 = vpop.f32.mrb[127].mxu1  ;;  %11762 = vrot.lane.b32.xlu0 %v10298_v62, %s14581_s18 }
 0xf97   :  { %v10526_v13 = vpop.f32.mrb[132].mxu0 }
 0xf98   :  { %v10450_v57 = vpop.f32.mrb[128].mxu1  ;;  %11768 = vrot.lane.b32.xlu1 %v10526_v13, %s14581_s18  ;;  %v13960_v24 = vpop.f32.mrb[133].mxu0 }
 0xf99   :  { %v13955_v20 = vpop.f32.mrb[129].mxu1  ;;  %11766 = vrot.lane.b32.xlu0 %v10450_v57, %s14581_s18 }
 0xf9b   :  { %v10678_v31 = vpop.f32.mrb[134].mxu0 }
 0xf9c   :  { %v10602_v46 = vpop.f32.mrb[130].mxu1  ;;  %11788 = vrot.lane.b32.xlu1 %v10678_v31, %s14582_s25  ;;  %v13970_v37 = vpop.f32.mrb[135].mxu0 }
 0xf9d   :  { %v13965_v14 = vpop.f32.mrb[131].mxu1  ;;  %11786 = vrot.lane.b32.xlu0 %v10602_v46, %s14582_s25 }
 0xf9f   :  { %v10830_v23 = vpop.f32.mrb[136].mxu0 }
 0xfa0   :  { %v10754_v17 = vpop.f32.mrb[132].mxu1  ;;  %11792 = vrot.lane.b32.xlu1 %v10830_v23, %s14582_s25  ;;  %v13980_v26 = vpop.f32.mrb[137].mxu0 }
 0xfa1   :  { %v13975_v36 = vpop.f32.mrb[133].mxu1  ;;  %11790 = vrot.lane.b32.xlu0 %v10754_v17, %s14582_s25 }
 0xfa3   :  { %v10982_v18 = vpop.f32.mrb[138].mxu0 }
 0xfa4   :  { %v10906_v52 = vpop.f32.mrb[134].mxu1  ;;  %11796 = vrot.lane.b32.xlu1 %v10982_v18, %s14582_s25  ;;  %v13990_v21 = vpop.f32.mrb[139].mxu0 }
 0xfa5   :  { %v13985_v33 = vpop.f32.mrb[135].mxu1  ;;  %11794 = vrot.lane.b32.xlu0 %v10906_v52, %s14582_s25 }
 0xfa7   :  { %v11134_v30 = vpop.f32.mrb[140].mxu0 }
 0xfa8   :  { %v11058_v10 = vpop.f32.mrb[136].mxu1  ;;  %11800 = vrot.lane.b32.xlu1 %v11134_v30, %s14582_s25  ;;  %v14000_v53 = vpop.f32.mrb[141].mxu0 }
 0xfa9   :  { %v13995_v27 = vpop.f32.mrb[137].mxu1  ;;  %11798 = vrot.lane.b32.xlu0 %v11058_v10, %s14582_s25 }
 0xfab   :  { %v11286_v22 = vpop.f32.mrb[142].mxu0 }
 0xfac   :  { %v11210_v2 = vpop.f32.mrb[138].mxu1  ;;  %11820 = vrot.lane.b32.xlu1 %v11286_v22, %s14583_s30  ;;  %v14010_v6 = vpop.f32.mrb[143].mxu0  ;;  %v12884_v22 = vld [vmem:[%s17342_s4 + $0x1] ss:$0 sm:$0xff] }
 0xfad   :  { %v14005_v43 = vpop.f32.mrb[139].mxu1  ;;  %11818 = vrot.lane.b32.xlu0 %v11210_v2, %s14583_s30 }
 0xfaf   :  { %v11438_v60 = vpop.f32.mrb[144].mxu0 }
 0xfb0   :  { %v11362_v12 = vpop.f32.mrb[140].mxu1  ;;  %11824 = vrot.lane.b32.xlu1 %v11438_v60, %s14583_s30  ;;  %v14020_v25 = vpop.f32.mrb[145].mxu0 }
 0xfb1   :  { %v14015_v45 = vpop.f32.mrb[141].mxu1  ;;  %11822 = vrot.lane.b32.xlu0 %v11362_v12, %s14583_s30  ;;  %v17443_v12 = vld [vmem:[#allocation14_spill] sm:$0xff] }
 0xfb2   :  { %v17444_v45 = vld [vmem:[#allocation18_spill] sm:$0xff] }
 0xfb3   :  { %v11590_v59 = vpop.f32.mrb[146].mxu0 }
 0xfb4   :  { %v11514_v0 = vpop.f32.mrb[142].mxu1  ;;  %11828 = vrot.lane.b32.xlu1 %v11590_v59, %s14583_s30  ;;  %v14030_v51 = vpop.f32.mrb[147].mxu0 }
 0xfb5   :  { %11826 = vrot.lane.b32.xlu0 %v11514_v0, %s14583_s30  ;;  %v14025_v8 = vpop.f32.mrb[143].mxu1 }
 0xfe2   :  { %v11742_v47 = vpop.f32.mrb[148].mxu0 }
 0xfe3   :  { %11832 = vrot.lane.b32.xlu1 %v11742_v47, %s14583_s30  ;;  %v11666_v56 = vpop.f32.mrb[144].mxu1  ;;  %v14040_v40 = vpop.f32.mrb[149].mxu0 }
 0xfe4   :  { %11830 = vrot.lane.b32.xlu0 %v11666_v56, %s14583_s30  ;;  %v14035_v35 = vpop.f32.mrb[145].mxu1 }
 0xfe5   :  { %v17445_v35 = vld [vmem:[#allocation20_spill] sm:$0xff] }
 0xff8   :  { %v11757_v19 = vpop.permute.xlu1 %11756 }
 0xff9   :  { %v11755_v15 = vpop.permute.xlu0 %11754  ;;  %v11843_v50 = vsel %vm275_vm2, %v17004_v11, %v11757_v19 }
 0xffa   :  { %v11842_v61 = vsel %vm275_vm2, %v17006_v49, %v11755_v15 }
 0xffc   :  { %v11761_v32 = vpop.permute.xlu1 %11760 }
 0xffd   :  { %v11759_v54 = vpop.permute.xlu0 %11758  ;;  %v11845_v11 = vsel %vm275_vm2, %v17008_v63, %v11761_v32 }
 0xffe   :  { %v11844_v14 = vsel %vm275_vm2, %v17010_v44, %v11759_v54  ;;  %v17446_v54 = vld [vmem:[#allocation15_spill] sm:$0xff] }
0x1000   :  { %v11765_v7 = vpop.permute.xlu1 %11764 }
0x1001   :  { %v11763_v9 = vpop.permute.xlu0 %11762  ;;  %v11847_v63 = vsel %vm275_vm2, %v17012_v38, %v11765_v7 }
0x1002   :  { %v11846_v44 = vsel %vm275_vm2, %v17014_v58, %v11763_v9 }
0x100a   :  { %v11769_v42 = vpop.permute.xlu1 %11768 }
0x100b   :  { %v11849_v41 = vsel %vm275_vm2, %v17016_v28, %v11769_v42  ;;  %v11767_v39 = vpop.permute.xlu0 %11766 }
0x100c   :  { %v11848_v34 = vsel %vm275_vm2, %v17018_v16, %v11767_v39  ;;  %v17447_v39 = vld [vmem:[#allocation17_spill] sm:$0xff] }
0x100e   :  { %v11789_v1 = vpop.permute.xlu1 %11788 }
0x100f   :  { %v11787_v62 = vpop.permute.xlu0 %11786  ;;  %v11851_v16 = vsel %vm5594_vm3, %v11843_v50, %v11789_v1  ;;  %v17448_v1 = vld [vmem:[#allocation16_spill] sm:$0xff] }
0x1010   :  { %v11850_v28 = vsel %vm5594_vm3, %v11842_v61, %v11787_v62 }
0x1012   :  { %v11793_v4 = vpop.permute.xlu1 %11792 }
0x1013   :  { %v11791_v55 = vpop.permute.xlu0 %11790  ;;  %v11853_v48 = vsel %vm5594_vm3, %v11845_v11, %v11793_v4 }
0x1014   :  { %v11852_v49 = vsel %vm5594_vm3, %v11844_v14, %v11791_v55 }
0x1016   :  { %v11797_v13 = vpop.permute.xlu1 %11796 }
0x1017   :  { %v11795_v57 = vpop.permute.xlu0 %11794  ;;  %v11855_v52 = vsel %vm5594_vm3, %v11847_v63, %v11797_v13 }
0x1018   :  { %v11854_v36 = vsel %vm5594_vm3, %v11846_v44, %v11795_v57 }
0x101a   :  { %v11801_v24 = vpop.permute.xlu1 %11800 }
0x101b   :  { %v11799_v20 = vpop.permute.xlu0 %11798  ;;  %v11857_v53 = vsel %vm5594_vm3, %v11849_v41, %v11801_v24 }
0x101c   :  { %v11856_v30 = vsel %vm5594_vm3, %v11848_v34, %v11799_v20 }
0x101e   :  { %v11821_v29 = vpop.permute.xlu1 %11820 }
0x101f   :  { %v11819_v31 = vpop.permute.xlu0 %11818  ;;  %v11859_v37 = vsel %vm5603_vm4, %v11851_v16, %v11821_v29  ;;  %v17449_v29 = vld [vmem:[#allocation25_spill] sm:$0xff] }
0x1020   :  { %v11858_v46 = vsel %vm5603_vm4, %v11850_v28, %v11819_v31  ;;  %v17450_v28 = vld [vmem:[#allocation19_spill] sm:$0xff] }
0x1021   :  { %14049 = vmatprep.mubr.msk.f32.mxu1 %vm95_vm0, %v11858_v46 }
0x1022   :  { %v11825_v5 = vpop.permute.xlu1 %11824  ;;  %14050 = vmatmul.mubr.msk.f32.vlgmr.msra.gmra.mrb[146].mxu1 %vm95_vm0, %v11859_v37 }
0x1023   :  { %v11823_v3 = vpop.permute.xlu0 %11822  ;;  %v11861_v17 = vsel %vm5603_vm4, %v11853_v48, %v11825_v5 }
0x1024   :  { %v11860_v23 = vsel %vm5603_vm4, %v11852_v49, %v11823_v3 }
0x1025   :  { %14052 = vmatprep.mubr.msk.f32.mxu1 %vm95_vm0, %v11860_v23 }
0x1026   :  { %v11829_v26 = vpop.permute.xlu1 %11828  ;;  %14053 = vmatmul.mubr.msk.f32.gmra.mrb[148].mxu1 %vm95_vm0, %v11861_v17 }
0x1027   :  { %v11827_v18 = vpop.permute.xlu0 %11826  ;;  %v11863_v33 = vsel %vm5603_vm4, %v11855_v52, %v11829_v26 }
0x1028   :  { %v11862_v21 = vsel %vm5603_vm4, %v11854_v36, %v11827_v18 }
0x1029   :  { %14055 = vmatprep.mubr.msk.f32.mxu1 %vm95_vm0, %v11862_v21 }
0x102a   :  { %14056 = vmatmul.mubr.msk.f32.gmra.mrb[150].mxu1 %vm95_vm0, %v11863_v33 }
0x1055   :  { %v11833_v58 = vpop.permute.xlu1 %11832 }
0x1056   :  { %v11831_v10 = vpop.permute.xlu0 %11830  ;;  %v11865_v27 = vsel %vm5603_vm4, %v11857_v53, %v11833_v58 }
0x1057   :  { %v11864_v38 = vsel %vm5603_vm4, %v11856_v30, %v11831_v10 }
0x1058   :  { %14058 = vmatprep.mubr.msk.f32.mxu1 %vm95_vm0, %v11864_v38 }
0x1059   :  { %14059 = vmatmul.mubr.msk.f32.gmra.mrb[152].mxu1 %vm95_vm0, %v11865_v27 }
0x10f5   :  { %v14051_v2 = vpop.f32.mrb[146].mxu1 }
0x10f6   :  { %v11968_v6 = vadd.f32 %v14051_v2, %v12884_v22  ;;  %v11962_v43 = vpop.f32.mrb[147].mxu1 }
0x10f7   :  { %v11963_v60 = vadd.f32 %v12884_v22, %v11962_v43 }
0x10f8   :  { %v12002_v25 = vadd.f32 %v11968_v6, %v17443_v12 }
0x10f9   :  { %v12001_v59 = vadd.f32 %v11963_v60, %v17444_v45  ;;  %v14054_v0 = vpop.f32.mrb[148].mxu1  ;;  %v12897_v45 = vld [vmem:[%s17343_s5 + $0x20] sm:$0xff] }
0x10fa   :  { %v11972_v51 = vpop.f32.mrb[149].mxu1  ;;  %v12016_v8 = vsel %vm95_vm0, %v12002_v25, 0.0  ;;  %v11978_v47 = vadd.f32 %v14054_v0, %v12884_v22 }
0x10fb   :  { %v11973_v56 = vadd.f32 %v12884_v22, %v11972_v51  ;;  %12017 = vadd.xlane.f32.xlu1 %v12016_v8  ;;  %v12013_v40 = vsel %vm95_vm0, %v12001_v59, 0.0  ;;  %v12899_v51 = vld [vmem:[%s17343_s5 + $0x30] sm:$0xff]  ;;  %v12900_v8 = vld [vmem:[%s17343_s5 + $0x38] sm:$0xff] }
0x10fc   :  { %12014 = vadd.xlane.f32.xlu0 %v12013_v40  ;;  %v12004_v7 = vadd.f32 %v11978_v47, %v17446_v54  ;;  %v14169_v47 = vpack.c.bf16 %v12900_v8, %v12899_v51 }
0x10fd   :  { %v12003_v19 = vadd.f32 %v11973_v56, %v17445_v35  ;;  %v14057_v15 = vpop.f32.mrb[150].mxu1 }
0x10fe   :  { %v11982_v32 = vpop.f32.mrb[151].mxu1  ;;  %v11988_v9 = vadd.f32 %v14057_v15, %v12884_v22  ;;  %v12022_v4 = vsel %vm95_vm0, %v12004_v7, 0.0 }
0x10ff   :  { %v11983_v42 = vadd.f32 %v12884_v22, %v11982_v32  ;;  %v12019_v41 = vsel %vm95_vm0, %v12003_v19, 0.0 }
0x1100   :  { %12020 = vadd.xlane.f32.xlu0 %v12019_v41  ;;  %v12006_v62 = vadd.f32 %v11988_v9, %v17448_v1  ;;  %v12911_v41 = vld [vmem:[%s17345_s7 + $0x40] sm:$0xff] }
0x1101   :  { %v12005_v34 = vadd.f32 %v11983_v42, %v17447_v39  ;;  %v12912_v39 = vld [vmem:[%s17345_s7 + $0x48] sm:$0xff] }
0x1102   :  { %v12028_v13 = vsel %vm95_vm0, %v12006_v62, 0.0  ;;  %v14173_v1 = vpack.c.bf16 %v12912_v39, %v12911_v41 }
0x1103   :  { %v12025_v55 = vsel %vm95_vm0, %v12005_v34, 0.0 }
0x1104   :  { %12023 = vadd.xlane.f32.xlu0 %v12022_v4  ;;  %12026 = vadd.xlane.f32.xlu1 %v12025_v55  ;;  %v12915_v55 = vld [vmem:[%s17345_s7 + $0x60] sm:$0xff] }
0x1105   :  { %14174 = vmatprep.subr.bf16.mxu1 %v14173_v1 }
0x1106   :  { %14176 = vmatpush3.bf16.msra.mxu1 %v14173_v1 }
0x1108   :  { %12029 = vadd.xlane.f32.xlu0 %v12028_v13  ;;  %v12916_v13 = vld [vmem:[%s17345_s7 + $0x68] sm:$0xff] }
0x112c   :  { %v14060_v57 = vpop.f32.mrb[152].mxu1 }
0x112d   :  { %v11998_v24 = vadd.f32 %v14060_v57, %v12884_v22  ;;  %v11992_v20 = vpop.f32.mrb[153].mxu1  ;;  %v14181_v57 = vpack.c.bf16 %v12916_v13, %v12915_v55  ;;  %v12902_v55 = vld [vmem:[%s17344_s6 + $0x1] ss:$0 sm:$0xff] }
0x112e   :  { %v11993_v61 = vadd.f32 %v12884_v22, %v11992_v20 }
0x112f   :  { %v12008_v50 = vadd.f32 %v11998_v24, %v17449_v29 }
0x1130   :  { %v12007_v31 = vadd.f32 %v11993_v61, %v17450_v28 }
0x1131   :  { %v12034_v16 = vsel %vm95_vm0, %v12008_v50, 0.0 }
0x1132   :  { %12035 = vadd.xlane.f32.xlu0 %v12034_v16  ;;  %v12031_v46 = vsel %vm95_vm0, %v12007_v31, 0.0 }
0x1133   :  { %12032 = vadd.xlane.f32.xlu1 %v12031_v46 }
0x1188   :  { %v12018_v37 = vpop.xlane.xlu1 %12017 }
0x1189   :  { %v12038_v14 = vmul.f32 0.03125, %v12018_v37  ;;  %v12015_v5 = vpop.xlane.xlu0 %12014 }
0x118a   :  { %v12037_v11 = vmul.f32 0.03125, %v12015_v5 }
0x118b   :  { %v17115_v49 = vsub.f32 %v12002_v25, %v12038_v14 }
0x118c   :  { %v17117_v3 = vsub.f32 %v12001_v59, %v12037_v11  ;;  %v12898_v59 = vld [vmem:[%s17343_s5 + $0x28] sm:$0xff] }
0x118d   :  { %v12021_v48 = vpop.xlane.xlu0 %12020  ;;  %v12054_v23 = vmul.f32 %v17115_v49, %v17115_v49  ;;  %v14165_v0 = vpack.c.bf16 %v12898_v59, %v12897_v45 }
0x118e   :  { %v12039_v17 = vmul.f32 0.03125, %v12021_v48  ;;  %v12053_v44 = vmul.f32 %v17117_v3, %v17117_v3 }
0x118f   :  { %v12064_v26 = vsel %vm95_vm0, %v12054_v23, 0.0  ;;  %14166 = vmatprep.subr.bf16.mxu0 %v14165_v0 }
0x1190   :  { %v17124_v63 = vsub.f32 %v12003_v19, %v12039_v17  ;;  %12065 = vadd.xlane.f32.xlu0 %v12064_v26  ;;  %v12061_v36 = vsel %vm95_vm0, %v12053_v44, 0.0  ;;  %14168 = vmatpush3.bf16.msra.mxu0 %v14165_v0 }
0x1191   :  { %v12027_v18 = vpop.xlane.xlu1 %12026  ;;  %12062 = vadd.xlane.f32.xlu1 %v12061_v36  ;;  %v12024_v52 = vpop.xlane.xlu0 %12023  ;;  %14170 = vmatprep.subr.bf16.mxu0 %v14169_v47  ;;  %v12895_v36 = vld [vmem:[%s17347_s9 + $0x1] ss:$0 sm:$0xff] }
0x1192   :  { %v12041_v21 = vmul.f32 0.03125, %v12027_v18  ;;  %v12040_v33 = vmul.f32 0.03125, %v12024_v52  ;;  %v12055_v58 = vmul.f32 %v17124_v63, %v17124_v63 }
0x1194   :  { %v17129_v30 = vsub.f32 %v12005_v34, %v12041_v21  ;;  %v17131_v10 = vsub.f32 %v12004_v7, %v12040_v33  ;;  %v12067_v53 = vsel %vm95_vm0, %v12055_v58, 0.0  ;;  %14172 = vmatpush3.bf16.msra.mxu0 %v14169_v47  ;;  %v12913_v34 = vld [vmem:[%s17345_s7 + $0x50] sm:$0xff]  ;;  %v12896_v58 = vld [vmem:[%s17348_s10 + $0x1] ss:$0 sm:$0xff] }
0x1195   :  { %12068 = vadd.xlane.f32.xlu1 %v12067_v53  ;;  %v12030_v38 = vpop.xlane.xlu0 %12029 }
0x1196   :  { %v12042_v27 = vmul.f32 0.03125, %v12030_v38  ;;  %v12057_v22 = vmul.f32 %v17129_v30, %v17129_v30  ;;  %v12056_v2 = vmul.f32 %v17131_v10, %v17131_v10 }
0x1198   :  { %v17138_v6 = vsub.f32 %v12006_v62, %v12042_v27  ;;  %v12073_v43 = vsel %vm95_vm0, %v12057_v22, 0.0  ;;  %v12070_v60 = vsel %vm95_vm0, %v12056_v2, 0.0  ;;  %v12914_v62 = vld [vmem:[%s17345_s7 + $0x58] sm:$0xff] }
0x1199   :  { %12074 = vadd.xlane.f32.xlu1 %v12073_v43  ;;  %12071 = vadd.xlane.f32.xlu0 %v12070_v60  ;;  %v14177_v4 = vpack.c.bf16 %v12914_v62, %v12913_v34 }
0x119a   :  { %v12058_v12 = vmul.f32 %v17138_v6, %v17138_v6 }
0x119b   :  { %14178 = vmatprep.subr.bf16.mxu1 %v14177_v4 }
0x119c   :  { %v12076_v25 = vsel %vm95_vm0, %v12058_v12, 0.0  ;;  %14180 = vmatpush3.bf16.msra.mxu1 %v14177_v4  ;;  %v12917_v4 = vld [vmem:[%s17345_s7 + $0x70] sm:$0xff] }
0x119d   :  { %12077 = vadd.xlane.f32.xlu0 %v12076_v25  ;;  %14182 = vmatprep.subr.bf16.mxu1 %v14181_v57 }
0x11a0   :  { %14184 = vmatpush3.bf16.msra.mxu1 %v14181_v57 }
0x11bf   :  { %v12036_v56 = vpop.xlane.xlu0 %12035 }
0x11c0   :  { %v12044_v40 = vmul.f32 0.03125, %v12036_v56  ;;  %v12033_v35 = vpop.xlane.xlu1 %12032 }
0x11c1   :  { %v12043_v19 = vmul.f32 0.03125, %v12033_v35 }
0x11c2   :  { %v17157_v15 = vsub.f32 %v12008_v50, %v12044_v40 }
0x11c3   :  { %v17159_v32 = vsub.f32 %v12007_v31, %v12043_v19 }
0x11c4   :  { %v12060_v54 = vmul.f32 %v17157_v15, %v17157_v15 }
0x11c5   :  { %v12059_v7 = vmul.f32 %v17159_v32, %v17159_v32 }
0x11c6   :  { %v12082_v9 = vsel %vm95_vm0, %v12060_v54, 0.0 }
0x11c7   :  { %12083 = vadd.xlane.f32.xlu0 %v12082_v9  ;;  %v12079_v42 = vsel %vm95_vm0, %v12059_v7, 0.0 }
0x11c8   :  { %12080 = vadd.xlane.f32.xlu1 %v12079_v42 }
0x121d   :  { %v12066_v24 = vpop.xlane.xlu0 %12065 }
0x121e   :  { %v12086_v20 = vmul.f32 0.03125, %v12066_v24  ;;  %v12063_v61 = vpop.xlane.xlu1 %12062 }
0x121f   :  { %v12085_v29 = vmul.f32 0.03125, %v12063_v61 }
0x1220   :  { %v12094_v50 = vadd.f32 1e-05, %v12086_v20 }
0x1221   :  { %v12093_v28 = vadd.f32 1e-05, %v12085_v29 }
0x1222   :  { %14490 = vrsqrt.f32 %v12094_v50  ;;  %v12069_v31 = vpop.xlane.xlu1 %12068 }
0x1223   :  { %14492 = vrsqrt.f32 %v12093_v28  ;;  %v12087_v16 = vmul.f32 0.03125, %v12069_v31 }
0x1225   :  { %v12095_v46 = vadd.f32 1e-05, %v12087_v16 }
0x1226   :  { %v12075_v37 = vpop.xlane.xlu1 %12074  ;;  %v12072_v14 = vpop.xlane.xlu0 %12071 }
0x1227   :  { %14494 = vrsqrt.f32 %v12095_v46  ;;  %v12089_v5 = vmul.f32 0.03125, %v12075_v37  ;;  %v12088_v11 = vmul.f32 0.03125, %v12072_v14 }
0x1229   :  { %v12097_v48 = vadd.f32 1e-05, %v12089_v5  ;;  %v12096_v23 = vadd.f32 1e-05, %v12088_v11 }
0x122a   :  { %v12078_v17 = vpop.xlane.xlu0 %12077 }
0x122b   :  { %14496 = vrsqrt.f32 %v12097_v48  ;;  %v12090_v44 = vmul.f32 0.03125, %v12078_v17 }
0x122c   :  { %v14491_v26 = vpop.eup %14490  ;;  %14498 = vrsqrt.f32 %v12096_v23 }
0x122d   :  { %v14493_v18 = vpop.eup %14492  ;;  %v12110_v52 = vmul.f32 %v14491_v26, %v17115_v49  ;;  %v12098_v21 = vadd.f32 1e-05, %v12090_v44 }
0x122e   :  { %v12109_v33 = vmul.f32 %v14493_v18, %v17117_v3 }
0x122f   :  { %14500 = vrsqrt.f32 %v12098_v21  ;;  %v12124_v53 = vmul.f32 %v12895_v36, %v12110_v52 }
0x1230   :  { %v12123_v38 = vmul.f32 %v12895_v36, %v12109_v33  ;;  %v12920_v33 = vld [vmem:[%s17346_s8 + $0x1] ss:$0 sm:$0xff] }
0x1231   :  { %v14495_v27 = vpop.eup %14494  ;;  %v17196_v43 = vadd.f32 %v12896_v58, %v12124_v53 }
0x1232   :  { %v17193_v22 = vadd.f32 %v12896_v58, %v12123_v38  ;;  %v12111_v2 = vmul.f32 %v14495_v27, %v17124_v63 }
0x1234   :  { %14069 = vmatprep.mubr.msk.f32.mxu0 %vm95_vm0, %v17193_v22  ;;  %v12125_v49 = vmul.f32 %v12895_v36, %v12111_v2 }
0x1235   :  { %v14497_v60 = vpop.eup %14496  ;;  %14070 = vmatmul.mubr.msk.f32.vlgmr.msra.gmra.mrb[150].mxu0 %vm95_vm0, %v17196_v43 }
0x1236   :  { %v14499_v3 = vpop.eup %14498  ;;  %v17202_v12 = vadd.f32 %v12896_v58, %v12125_v49  ;;  %v12113_v25 = vmul.f32 %v14497_v60, %v17129_v30 }
0x1237   :  { %v12112_v45 = vmul.f32 %v14499_v3, %v17131_v10 }
0x1238   :  { %14072 = vmatprep.mubr.msk.f32.mxu0 %vm95_vm0, %v17202_v12  ;;  %v12127_v63 = vmul.f32 %v12895_v36, %v12113_v25 }
0x1239   :  { %v14501_v59 = vpop.eup %14500  ;;  %v12126_v0 = vmul.f32 %v12895_v36, %v12112_v45 }
0x123a   :  { %v17208_v51 = vadd.f32 %v12896_v58, %v12127_v63  ;;  %v12114_v8 = vmul.f32 %v14501_v59, %v17138_v6 }
0x123b   :  { %v17211_v47 = vadd.f32 %v12896_v58, %v12126_v0 }
0x123c   :  { %v12128_v56 = vmul.f32 %v12895_v36, %v12114_v8 }
0x123d   :  { %14073 = vmatmul.mubr.msk.f32.gmra.mrb[152].mxu0 %vm95_vm0, %v17211_v47 }
0x123e   :  { %14075 = vmatprep.mubr.msk.f32.mxu0 %vm95_vm0, %v17208_v51  ;;  %v17217_v30 = vadd.f32 %v12896_v58, %v12128_v56 }
0x1241   :  { %14076 = vmatmul.mubr.msk.f32.gmra.mrb[154].mxu0 %vm95_vm0, %v17217_v30 }
0x1254   :  { %v12084_v10 = vpop.xlane.xlu0 %12083 }
0x1255   :  { %v12092_v40 = vmul.f32 0.03125, %v12084_v10  ;;  %v12081_v35 = vpop.xlane.xlu1 %12080 }
0x1256   :  { %v12091_v19 = vmul.f32 0.03125, %v12081_v35 }
0x1257   :  { %v12100_v54 = vadd.f32 1e-05, %v12092_v40 }
0x1258   :  { %v12099_v6 = vadd.f32 1e-05, %v12091_v19 }
0x1259   :  { %14502 = vrsqrt.f32 %v12100_v54 }
0x125a   :  { %14504 = vrsqrt.f32 %v12099_v6 }
0x1263   :  { %v14503_v7 = vpop.eup %14502 }
0x1264   :  { %v14505_v9 = vpop.eup %14504  ;;  %v12116_v42 = vmul.f32 %v14503_v7, %v17157_v15  ;;  %v12918_v15 = vld [vmem:[%s17345_s7 + $0x78] sm:$0xff] }
0x1265   :  { %v12115_v41 = vmul.f32 %v14505_v9, %v17159_v32  ;;  %v14185_v32 = vpack.c.bf16 %v12918_v15, %v12917_v4 }
0x1266   :  { %v12130_v39 = vmul.f32 %v12895_v36, %v12116_v42 }
0x1267   :  { %v12129_v34 = vmul.f32 %v12895_v36, %v12115_v41  ;;  %14186 = vmatprep.subr.bf16.mxu1 %v14185_v32 }
0x1268   :  { %v17225_v62 = vadd.f32 %v12896_v58, %v12130_v39  ;;  %14188 = vmatpush3.bf16.msra.mxu1 %v14185_v32 }
0x1269   :  { %v17223_v1 = vadd.f32 %v12896_v58, %v12129_v34 }
0x126b   :  { %14078 = vmatprep.mubr.msk.f32.mxu0 %vm95_vm0, %v17223_v1 }
0x126c   :  { %14079 = vmatmul.mubr.msk.f32.gmra.mrb[156].mxu0 %vm95_vm0, %v17225_v62 }
0x1308   :  { %v14071_v13 = vpop.f32.mrb[150].mxu0 }
0x1309   :  { %v12254_v57 = vadd.f32 %v14071_v13, %v12902_v55  ;;  %v12248_v24 = vpop.f32.mrb[151].mxu0 }
0x130a   :  { %v12249_v20 = vadd.f32 %v12902_v55, %v12248_v24 }
0x130b   :  { %v12288_v29 = vmax.f32 %v12254_v57, 0.0 }
0x130c   :  { %v12287_v61 = vmax.f32 %v12249_v20, 0.0 }
0x130e   :  { %14097 = vmatprep.mubr.msk.f32.mxu1 %vm6053_vm5, %v12287_v61 }
0x130f   :  { %14098 = vmatmul.mubr.msk.f32.vlgmr.msra.gmra.mrb[154].mxu1 %vm6053_vm5, %v12288_v29 }
0x1310   :  { %v14074_v50 = vpop.f32.mrb[152].mxu0 }
0x1311   :  { %v12264_v28 = vadd.f32 %v14074_v50, %v12902_v55  ;;  %v12258_v31 = vpop.f32.mrb[153].mxu0 }
0x1312   :  { %v12259_v16 = vadd.f32 %v12902_v55, %v12258_v31 }
0x1313   :  { %v12290_v14 = vmax.f32 %v12264_v28, 0.0 }
0x1314   :  { %v12289_v46 = vmax.f32 %v12259_v16, 0.0  ;;  %v14077_v37 = vpop.f32.mrb[154].mxu0 }
0x1315   :  { %v12274_v5 = vadd.f32 %v14077_v37, %v12902_v55  ;;  %v12268_v11 = vpop.f32.mrb[155].mxu0 }
0x1316   :  { %v12269_v48 = vadd.f32 %v12902_v55, %v12268_v11  ;;  %14100 = vmatprep.mubr.msk.f32.mxu1 %vm6053_vm5, %v12289_v46 }
0x1317   :  { %14101 = vmatmul.mubr.msk.f32.gmra.mrb[156].mxu1 %vm6053_vm5, %v12290_v14  ;;  %v12292_v17 = vmax.f32 %v12274_v5, 0.0 }
0x1318   :  { %v12291_v23 = vmax.f32 %v12269_v48, 0.0 }
0x131a   :  { %14103 = vmatprep.mubr.msk.f32.mxu1 %vm6053_vm5, %v12291_v23 }
0x131b   :  { %14104 = vmatmul.mubr.msk.f32.gmra.mrb[158].mxu1 %vm6053_vm5, %v12292_v17 }
0x133f   :  { %v14080_v44 = vpop.f32.mrb[156].mxu0 }
0x1340   :  { %v12284_v26 = vadd.f32 %v14080_v44, %v12902_v55  ;;  %v12278_v36 = vpop.f32.mrb[157].mxu0 }
0x1341   :  { %v12279_v18 = vadd.f32 %v12902_v55, %v12278_v36 }
0x1342   :  { %v12294_v21 = vmax.f32 %v12284_v26, 0.0 }
0x1343   :  { %v12293_v52 = vmax.f32 %v12279_v18, 0.0 }
0x1345   :  { %14106 = vmatprep.mubr.msk.f32.mxu1 %vm6053_vm5, %v12293_v52 }
0x1346   :  { %14107 = vmatmul.mubr.msk.f32.gmra.mrb[160].mxu1 %vm6053_vm5, %v12294_v21 }
0x13e2   :  { %v14099_v58 = vpop.f32.mrb[154].mxu1 }
0x13e3   :  { %v12408_v53 = vadd.f32 %v14099_v58, %v12920_v33  ;;  %v12402_v38 = vpop.f32.mrb[155].mxu1 }
0x13e4   :  { %v12403_v8 = vadd.f32 %v12920_v33, %v12402_v38 }
0x13e5   :  { %v12442_v27 = vadd.f32 %v12408_v53, %v17196_v43 }
0x13e6   :  { %v12441_v19 = vadd.f32 %v12403_v8, %v17193_v22 }
0x13e7   :  { %v12456_v2 = vsel %vm95_vm0, %v12442_v27, 0.0 }
0x13e8   :  { %12457 = vadd.xlane.f32.xlu1 %v12456_v2 }
0x13ea   :  { %v14102_v49 = vpop.f32.mrb[156].mxu1 }
0x13eb   :  { %v12412_v60 = vpop.f32.mrb[157].mxu1  ;;  %v12418_v3 = vadd.f32 %v14102_v49, %v12920_v33 }
0x13ec   :  { %v12413_v25 = vadd.f32 %v12920_v33, %v12412_v60 }
0x13ed   :  { %v12444_v56 = vadd.f32 %v12418_v3, %v17211_v47 }
0x13ee   :  { %v12443_v45 = vadd.f32 %v12413_v25, %v17202_v12  ;;  %v14105_v63 = vpop.f32.mrb[158].mxu1  ;;  %v12453_v12 = vsel %vm95_vm0, %v12441_v19, 0.0 }
0x13ef   :  { %v12428_v59 = vadd.f32 %v14105_v63, %v12920_v33  ;;  %v12422_v0 = vpop.f32.mrb[159].mxu1  ;;  %v12462_v54 = vsel %vm95_vm0, %v12444_v56, 0.0 }
0x13f0   :  { %v12423_v10 = vadd.f32 %v12920_v33, %v12422_v0  ;;  %v12459_v40 = vsel %vm95_vm0, %v12443_v45, 0.0 }
0x13f1   :  { %v12446_v43 = vadd.f32 %v12428_v59, %v17217_v30  ;;  %12460 = vadd.xlane.f32.xlu1 %v12459_v40 }
0x13f2   :  { %v12445_v22 = vadd.f32 %v12423_v10, %v17208_v51 }
0x13f3   :  { %v12468_v35 = vsel %vm95_vm0, %v12446_v43, 0.0 }
0x13f4   :  { %12469 = vadd.xlane.f32.xlu0 %v12468_v35  ;;  %v12465_v34 = vsel %vm95_vm0, %v12445_v22, 0.0 }
0x13f5   :  { %12463 = vadd.xlane.f32.xlu1 %v12462_v54  ;;  %v12931_v54 = vld [vmem:[%s17349_s11 + $0x1] ss:$0 sm:$0xff]  ;;  %s14584_s11 = smov [#allocation5]  }
0x13f9   :  { %12454 = vadd.xlane.f32.xlu1 %v12453_v12 }
0x1419   :  { %v14108_v6 = vpop.f32.mrb[160].mxu1 }
0x141a   :  { %v12432_v7 = vpop.f32.mrb[161].mxu1  ;;  %v12438_v47 = vadd.f32 %v14108_v6, %v12920_v33 }
0x141b   :  { %v12433_v9 = vadd.f32 %v12920_v33, %v12432_v7 }
0x141c   :  { %v12448_v30 = vadd.f32 %v12438_v47, %v17225_v62  ;;  %v12932_v47 = vld [vmem:[%s17350_s12 + $0x1] ss:$0 sm:$0xff]  ;;  %s12624_s12 = sshll.u32 %s14584_s11, 4  ;;  %s12625_s12 = int_to_ptr.vmem [resolvable:$true] %s12624_s12 }
0x141d   :  { %v12447_v42 = vadd.f32 %v12433_v9, %v17223_v1  ;;  %p14551_p9 = scmp.lt.s32.totalorder %s12625_s12, %s12625_s12 }
0x141e   :  { %v12474_v39 = vsel %vm95_vm0, %v12448_v30, 0.0 }
0x141f   :  { %v12471_v41 = vsel %vm95_vm0, %v12447_v42, 0.0 }
0x1420   :  { %12472 = vadd.xlane.f32.xlu0 %v12471_v41 }
0x1424   :  { %12475 = vadd.xlane.f32.xlu0 %v12474_v39 }
0x1428   :  { %12466 = vadd.xlane.f32.xlu0 %v12465_v34 }
0x1475   :  { %v12458_v4 = vpop.xlane.xlu1 %12457 }
0x1476   :  { %v12478_v15 = vmul.f32 0.03125, %v12458_v4 }
0x1478   :  { %v12486_v32 = vsub.f32 %v12442_v27, %v12478_v15 }
0x147a   :  { %v12494_v55 = vmul.f32 %v12486_v32, %v12486_v32 }
0x147c   :  { %v12504_v13 = vsel %vm95_vm0, %v12494_v55, 0.0 }
0x147d   :  { %12505 = vadd.xlane.f32.xlu1 %v12504_v13 }
0x147e   :  { %v12461_v1 = vpop.xlane.xlu1 %12460 }
0x147f   :  { %v12479_v62 = vmul.f32 0.03125, %v12461_v1 }
0x1481   :  { %v17268_v57 = vsub.f32 %v12443_v45, %v12479_v62  ;;  %v12470_v24 = vpop.xlane.xlu0 %12469 }
0x1482   :  { %v12482_v20 = vmul.f32 0.03125, %v12470_v24  ;;  %v12464_v51 = vpop.xlane.xlu1 %12463 }
0x1483   :  { %v12480_v61 = vmul.f32 0.03125, %v12464_v51  ;;  %v12495_v29 = vmul.f32 %v17268_v57, %v17268_v57 }
0x1484   :  { %v17272_v50 = vsub.f32 %v12446_v43, %v12482_v20 }
0x1485   :  { %v17274_v28 = vsub.f32 %v12444_v56, %v12480_v61  ;;  %v12507_v31 = vsel %vm95_vm0, %v12495_v29, 0.0 }
0x1486   :  { %12508 = vadd.xlane.f32.xlu1 %v12507_v31  ;;  %v12455_v16 = vpop.xlane.xlu1 %12454  ;;  %v12498_v46 = vmul.f32 %v17272_v50, %v17272_v50 }
0x1487   :  { %v12477_v37 = vmul.f32 0.03125, %v12455_v16  ;;  %v12496_v14 = vmul.f32 %v17274_v28, %v17274_v28 }
0x1488   :  { %v12516_v5 = vsel %vm95_vm0, %v12498_v46, 0.0 }
0x1489   :  { %v17282_v11 = vsub.f32 %v12441_v19, %v12477_v37  ;;  %12517 = vadd.xlane.f32.xlu0 %v12516_v5  ;;  %v12510_v48 = vsel %vm95_vm0, %v12496_v14, 0.0 }
0x148a   :  { %12511 = vadd.xlane.f32.xlu1 %v12510_v48 }
0x148b   :  { %v12493_v23 = vmul.f32 %v17282_v11, %v17282_v11 }
0x148d   :  { %v12501_v17 = vsel %vm95_vm0, %v12493_v23, 0.0 }
0x148e   :  { %12502 = vadd.xlane.f32.xlu1 %v12501_v17 }
0x14ad   :  { %v12473_v44 = vpop.xlane.xlu0 %12472 }
0x14ae   :  { %v12483_v26 = vmul.f32 0.03125, %v12473_v44 }
0x14b0   :  { %v17288_v36 = vsub.f32 %v12447_v42, %v12483_v26 }
0x14b1   :  { %v12476_v18 = vpop.xlane.xlu0 %12475 }
0x14b2   :  { %v12484_v52 = vmul.f32 0.03125, %v12476_v18  ;;  %v12499_v21 = vmul.f32 %v17288_v36, %v17288_v36 }
0x14b4   :  { %v17292_v33 = vsub.f32 %v12448_v30, %v12484_v52  ;;  %v12519_v58 = vsel %vm95_vm0, %v12499_v21, 0.0 }
0x14b5   :  { %12520 = vadd.xlane.f32.xlu0 %v12519_v58  ;;  %v12467_v53 = vpop.xlane.xlu0 %12466 }
0x14b6   :  { %v12481_v38 = vmul.f32 0.03125, %v12467_v53  ;;  %v12500_v27 = vmul.f32 %v17292_v33, %v17292_v33 }
0x14b8   :  { %v17297_v2 = vsub.f32 %v12445_v22, %v12481_v38  ;;  %v12522_v49 = vsel %vm95_vm0, %v12500_v27, 0.0 }
0x14b9   :  { %12523 = vadd.xlane.f32.xlu0 %v12522_v49 }
0x14ba   :  { %v12497_v60 = vmul.f32 %v17297_v2, %v17297_v2 }
0x14bc   :  { %v12513_v3 = vsel %vm95_vm0, %v12497_v60, 0.0 }
0x14bd   :  { %12514 = vadd.xlane.f32.xlu0 %v12513_v3 }
0x150a   :  { %v12506_v25 = vpop.xlane.xlu1 %12505 }
0x150b   :  { %v12526_v45 = vmul.f32 0.03125, %v12506_v25 }
0x150d   :  { %v12534_v63 = vadd.f32 1e-05, %v12526_v45 }
0x150f   :  { %14506 = vrsqrt.f32 %v12534_v63 }
0x1513   :  { %v12509_v59 = vpop.xlane.xlu1 %12508 }
0x1514   :  { %v12527_v0 = vmul.f32 0.03125, %v12509_v59 }
0x1516   :  { %v12535_v8 = vadd.f32 1e-05, %v12527_v0  ;;  %v12518_v56 = vpop.xlane.xlu0 %12517 }
0x1517   :  { %v12530_v10 = vmul.f32 0.03125, %v12518_v56  ;;  %v12512_v40 = vpop.xlane.xlu1 %12511 }
0x1518   :  { %14508 = vrsqrt.f32 %v12535_v8  ;;  %v12528_v43 = vmul.f32 0.03125, %v12512_v40 }
0x1519   :  { %v14507_v35 = vpop.eup %14506  ;;  %v12538_v19 = vadd.f32 1e-05, %v12530_v10 }
0x151a   :  { %v12536_v12 = vadd.f32 1e-05, %v12528_v43  ;;  %v12550_v6 = vmul.f32 %v14507_v35, %v12486_v32 }
0x151b   :  { %14510 = vrsqrt.f32 %v12538_v19  ;;  %v12503_v7 = vpop.xlane.xlu1 %12502 }
0x151c   :  { %14512 = vrsqrt.f32 %v12536_v12  ;;  %v12525_v9 = vmul.f32 0.03125, %v12503_v7  ;;  %v12564_v42 = vmul.f32 %v12931_v54, %v12550_v6 }
0x151e   :  { %v12533_v30 = vadd.f32 1e-05, %v12525_v9  ;;  %v12578_v41 = vadd.f32 %v12932_v47, %v12564_v42 }
0x1520   :  { %14514 = vrsqrt.f32 %v12533_v30  ;;  %12586 = vrot.lane.b32.xlu1 %v12578_v41, %s17451_s0 }
0x1522   :  { %v14509_v22 = vpop.eup %14508 }
0x1523   :  { %v12551_v39 = vmul.f32 %v14509_v22, %v17268_v57 }
0x1525   :  { %v14511_v34 = vpop.eup %14510  ;;  %v12565_v4 = vmul.f32 %v12931_v54, %v12551_v39 }
0x1526   :  { %v14513_v15 = vpop.eup %14512  ;;  %v12554_v32 = vmul.f32 %v14511_v34, %v17272_v50 }
0x1527   :  { %v12579_v55 = vadd.f32 %v12932_v47, %v12565_v4  ;;  %v12552_v13 = vmul.f32 %v14513_v15, %v17274_v28 }
0x1528   :  { %v12568_v1 = vmul.f32 %v12931_v54, %v12554_v32 }
0x1529   :  { %12590 = vrot.lane.b32.xlu1 %v12579_v55, %s14575_s29  ;;  %v12566_v20 = vmul.f32 %v12931_v54, %v12552_v13 }
0x152a   :  { %v14515_v62 = vpop.eup %14514  ;;  %v12582_v24 = vadd.f32 %v12932_v47, %v12568_v1 }
0x152b   :  { %v12549_v51 = vmul.f32 %v14515_v62, %v17282_v11  ;;  %v12580_v57 = vadd.f32 %v12932_v47, %v12566_v20 }
0x152c   :  { %12598 = vrot.lane.b32.xlu0 %v12582_v24, %s17451_s0 }
0x152d   :  { %v12563_v61 = vmul.f32 %v12931_v54, %v12549_v51 }
0x152f   :  { %v12577_v29 = vadd.f32 %v12932_v47, %v12563_v61 }
0x1530   :  { %12594 = vrot.lane.b32.xlu0 %v12580_v57, %s14573_s22 }
0x1542   :  { %v12521_v31 = vpop.xlane.xlu0 %12520 }
0x1543   :  { %v12531_v50 = vmul.f32 0.03125, %v12521_v31 }
0x1545   :  { %v12539_v16 = vadd.f32 1e-05, %v12531_v50 }
0x1546   :  { %v12524_v46 = vpop.xlane.xlu0 %12523 }
0x1547   :  { %14516 = vrsqrt.f32 %v12539_v16  ;;  %v12532_v28 = vmul.f32 0.03125, %v12524_v46 }
0x1549   :  { %v12540_v37 = vadd.f32 1e-05, %v12532_v28 }
0x154a   :  { %v12515_v14 = vpop.xlane.xlu0 %12514 }
0x154b   :  { %14518 = vrsqrt.f32 %v12540_v37  ;;  %v12529_v5 = vmul.f32 0.03125, %v12515_v14 }
0x154d   :  { %v12537_v48 = vadd.f32 1e-05, %v12529_v5 }
0x154f   :  { %14520 = vrsqrt.f32 %v12537_v48 }
0x1551   :  { %v14517_v11 = vpop.eup %14516 }
0x1552   :  { %v12555_v23 = vmul.f32 %v14517_v11, %v17288_v36 }
0x1554   :  { %v12569_v17 = vmul.f32 %v12931_v54, %v12555_v23 }
0x1555   :  { %v14519_v44 = vpop.eup %14518 }
0x1556   :  { %v12583_v26 = vadd.f32 %v12932_v47, %v12569_v17  ;;  %v12556_v18 = vmul.f32 %v14519_v44, %v17292_v33 }
0x1558   :  { %12602 = vrot.lane.b32.xlu1 %v12583_v26, %s14575_s29  ;;  %v12570_v52 = vmul.f32 %v12931_v54, %v12556_v18 }
0x1559   :  { %v14521_v21 = vpop.eup %14520 }
0x155a   :  { %v12584_v58 = vadd.f32 %v12932_v47, %v12570_v52  ;;  %v12553_v53 = vmul.f32 %v14521_v21, %v17297_v2 }
0x155c   :  { %12606 = vrot.lane.b32.xlu1 %v12584_v58, %s14573_s22  ;;  %v12567_v38 = vmul.f32 %v12931_v54, %v12553_v53  ;;  %s14546_s22 = scalar_lea.vmem %s12625_s12, 256 }
0x155d   :  { %p14547_p8 = scmp.ne.s32.totalorder %s12625_s12, %s14546_s22  ;;  %p14552_p10 = scmp.lt.s32.totalorder %s14546_s22, %s14546_s22 }
0x155e   :  { %v12581_v27 = vadd.f32 %v12932_v47, %v12567_v38 }
0x155f   :  { %p14553_p11 = por %p14552_p10, %p14551_p9 }
0x1561   :  { %p14554_p12 = pnand %p14553_p11, %p14547_p8 }
0x1592   :  { %v12587_v49 = vpop.permute.xlu1 %12586 }
0x1593   :  { %v12609_v36 = vsel %vm95_vm0, %v12577_v29, %v12587_v49 }
0x159b   :  { %v12591_v3 = vpop.permute.xlu1 %12590 }
0x159c   :  { %v12610_v25 = vsel %vm6053_vm5, %v12609_v36, %v12591_v3 }
0x159e   :  { %v12599_v60 = vpop.permute.xlu0 %12598 }
0x159f   :  { %v12613_v2 = vsel %vm95_vm0, %v12581_v27, %v12599_v60 }
0x15a2   :  { %v12595_v33 = vpop.permute.xlu0 %12594 }
0x15a3   :  { %v12612_v45 = vsel %vm12611_vm6, %v12610_v25, %v12595_v33 }
0x15a4   :  { %12616 = vst [vmem:[#allocation5] sm:$0xff] %v12612_v45 }
0x15ca   :  { %v12603_v63 = vpop.permute.xlu1 %12602 }
0x15cb   :  { %v12614_v59 = vsel %vm6053_vm5, %v12613_v2, %v12603_v63 }
0x15ce   :  { %v12607_v0 = vpop.permute.xlu1 %12606 }
0x15cf   :  { %v12615_v8 = vsel %vm12611_vm6, %v12614_v59, %v12607_v0 }
0x15d0   :  { %12617 = vst [vmem:[#allocation5 + $0x8] sm:$0xff] %v12615_v8 }
0x15d1   :  { %14557 = shalt.err (!%p14554_p12)
}
0x15d2   :  { %s14558_s15 = scalar_lea.hbm %s17351_s13, 256 }
0x15d3   :  { %p14559_p13 = scmp.ne.s32.totalorder %s17351_s13, %s14558_s15  ;;  %p14562_p0 = scmp.lt.u32.totalorder %s14558_s15, %s17351_s13 }
0x15d5   :  { %p14564_p1 = pnand %p14562_p0, %p14559_p13 }
0x15d7   :  { %14567 = shalt.err (!%p14564_p1)
}
0x15d8   :  { %12627 = dma.vmem_to_hbm [thread:$0]  %s12625_s12, 256, %s17351_s13, [#allocation4]  }
0x15d9   :  { %14570 = dma.done.wait [#allocation4], 256  }
0x15da   :  { %14571 = vsyncadd [#allocation4], 4294967040 }
0x15db   :  { %12631 = vsyncpa [#allocation3], 1 }
0x15dc   :  { %12632 = vsyncpa [#allocation4], 1 }

</bundles_post_ra>
